<compile_context>
chip_gen: v6e
topology: v6e:2x2x1
jax: 0.10.0
libtpu: 0.0.40
codegen_flags: <defaults>
</compile_context>

<pallas_src>
import functools

import jax
import jax.numpy as jnp
from jax import lax
from jax.experimental import pallas as pl
from jax.experimental.pallas import tpu as pltpu


def _round_up(v, m):
    return (v + m - 1) // m * m


def _pad2d(a, rows, cols):
    r, c = a.shape
    if r == rows and c == cols:
        return a
    return jnp.pad(a, ((0, rows - r), (0, cols - c)))


def _supports_buffered():
    """Explicit feature/signature check for BlockSpec(pipeline_mode=pl.Buffered(1))."""
    if not hasattr(pl, "Buffered"):
        return False
    try:
        pl.BlockSpec((8, 128), lambda i: (0, 0), pipeline_mode=pl.Buffered(1))
    except TypeError:
        return False
    return True


_SINGLE_BUFFER_WEIGHTS = _supports_buffered()


def _vmem_budget_bytes():
    """~75% of this generation's per-core VMEM (≈48 MiB v7x, ≈96 MiB v5e/v6e)."""
    cap = None
    if hasattr(pltpu, "get_tpu_info"):
        try:
            cap = int(pltpu.get_tpu_info().vmem_capacity_bytes)
        except Exception:  # hardware query unavailable (e.g. interpret mode)
            cap = None
    if cap is None or cap <= 0:
        cap = 64 * 1024 * 1024  # conservative default: v7x per-TC size
    return (cap * 3) // 4


def _pick_tile_rows(n, dim_p, hidden_p, x_bytes, w_bytes, budget, row_align, requested):
    """Largest row tile (multiple of 256 when possible) fitting the VMEM budget."""
    weight_copies = 1 if _SINGLE_BUFFER_WEIGHTS else 2
    weight_bytes = weight_copies * (
        2 * dim_p * hidden_p * w_bytes          # w1 + w2
        + (3 * dim_p + hidden_p) * w_bytes)     # gamma, beta, b2, b1
    # Per-row VMEM: double-buffered x and out tiles plus the f32 intermediates
    # (xn, h, y) kept around while the MXU works on the tile.
    per_row = 4 * dim_p * x_bytes + (2 * dim_p + 2 * hidden_p) * 4
    avail = budget - weight_bytes - (4 << 20)   # 4 MiB headroom for compiler scratch
    if avail < per_row * row_align:
        # Weights dominate VMEM.
        # TODO(synk): add a hidden-dim (K) grid axis with an f32 accumulator for FFN
        # weights too large to stay resident (mainly v7x with 64 MiB per-TC VMEM).
        return row_align
    t = min(requested if requested is not None else 1024, avail // per_row)
    if t >= 256:
        t = (t // 256) * 256                    # multiple of the 256-wide MXU M dim
    else:
        t = max(row_align, (t // row_align) * row_align)
    t = min(t, _round_up(n, row_align))         # don't tile wider than the input
    return max(t, row_align)


def _residual_ffn_kernel(x_ref, gamma_ref, beta_ref, w1_ref, b1_ref,
                         w2_ref, b2_ref, o_ref, *, true_dim, approx_gelu):
    xf = x_ref[...].astype(jnp.float32)
    dim_p = xf.shape[-1]
    inv_d = jnp.float32(1.0 / true_dim)

    # LayerNorm over the *true* feature width (eps=1e-5, biased variance, matching
    # torch.nn.LayerNorm).  Two-pass variance for numerical robustness; padded
    # feature lanes are masked out of the statistics.
    mean = jnp.sum(xf, axis=-1, keepdims=True) * inv_d
    diff = xf - mean
    if dim_p != true_dim:
        lane = lax.broadcasted_iota(jnp.int32, xf.shape, dimension=1)
        diff = jnp.where(lane < true_dim, diff, 0.0)
    var = jnp.sum(diff * diff, axis=-1, keepdims=True) * inv_d
    xn = diff * lax.rsqrt(var + 1e-5)
    xn = xn * gamma_ref[...].astype(jnp.float32) + beta_ref[...].astype(jnp.float32)

    # FeedForwardModule: Linear -> GELU -> Linear.  Matmuls run in the weights'
    # native dtype on the MXU with f32 accumulation; dropout is identity in eval.
    # TODO(synk): training-mode dropout not implemented.
    h = jnp.dot(xn.astype(w1_ref.dtype), w1_ref[...],
                preferred_element_type=jnp.float32)
    h = h + b1_ref[...].astype(jnp.float32)
    if approx_gelu:
        h = jax.nn.gelu(h, approximate=True)     # opt-in tanh/EUP path (v5e VALU relief)
    else:
        h = 0.5 * h * (1.0 + lax.erf(h * 0.7071067811865476))  # exact, matches nn.GELU
    y = jnp.dot(h.astype(w2_ref.dtype), w2_ref[...],
                preferred_element_type=jnp.float32)
    y = y + b2_ref[...].astype(jnp.float32)

    # Residual add: re-read x from VMEM instead of keeping the f32 cast of the whole
    # tile live across both matmuls (keeps vreg pressure low at large tile_rows).
    o_ref[...] = (x_ref[...].astype(jnp.float32) + y).astype(o_ref.dtype)


def _build_call(n, dim_p, hidden_p, tile_rows, out_dtype, true_dim, approx_gelu,
                x_bytes, w_bytes, vmem_limit):
    const_kwargs = {}
    if _SINGLE_BUFFER_WEIGHTS:
        const_kwargs["pipeline_mode"] = pl.Buffered(1)   # weights: 1x VMEM copy

    def const_spec(shape):
        return pl.BlockSpec(shape, lambda i: (0, 0), **const_kwargs)

    kernel = functools.partial(_residual_ffn_kernel, true_dim=true_dim,
                               approx_gelu=approx_gelu)
    cost = pl.CostEstimate(
        flops=4 * n * dim_p * hidden_p,                          # two matmuls
        transcendentals=n * hidden_p,                            # GELU erf/tanh
        bytes_accessed=2 * n * dim_p * x_bytes + 2 * dim_p * hidden_p * w_bytes,
    )
    return pl.pallas_call(
        kernel,
        out_shape=jax.ShapeDtypeStruct((n, dim_p), out_dtype),
        grid_spec=pltpu.PrefetchScalarGridSpec(
            num_scalar_prefetch=0,
            grid=(pl.cdiv(n, tile_rows),),       # ragged last tile: OOB writes masked
            in_specs=[
                pl.BlockSpec((tile_rows, dim_p), lambda i: (i, 0)),  # x (streamed)
                const_spec((1, dim_p)),           # gamma
                const_spec((1, dim_p)),           # beta
                const_spec((dim_p, hidden_p)),    # w1
                const_spec((1, hidden_p)),        # b1
                const_spec((hidden_p, dim_p)),    # w2
                const_spec((1, dim_p)),           # b2
            ],
            out_specs=pl.BlockSpec((tile_rows, dim_p), lambda i: (i, 0)),
        ),
        compiler_params=pltpu.CompilerParams(
            dimension_semantics=("parallel",),    # row grid shards across TCs (v7x)
            vmem_limit_bytes=int(vmem_limit),
        ),
        cost_estimate=cost,
    )


def residual_module_wrapper(x, params, *, tile_rows=None, approx_gelu=False,
                            cast_weights_to_bf16=False):
    """out = x + FFN(LayerNorm(x)).  x: [num_nodes, dim] node features.

    The `graph` argument of the PyTorch module is unused by FeedForwardModule.
    """
    n, dim = x.shape
    hidden = params["w1"].shape[1]

    # Lane-dense padding of the *feature* dims only; skipped entirely when dim is
    # already a multiple of 128 (no row padding, no output row slice either way).
    dim_p = _round_up(dim, 128)
    hidden_p = _round_up(hidden, 128)
    pad_cols = dim_p != dim
    # TODO(synk): align dim_p/hidden_p to 256 if profiling shows the kernel is
    # MXU-bound on v6e/v7x (256-wide systolic array); memory-bound -> keep 128.

    w1, w2 = params["w1"], params["w2"]
    if cast_weights_to_bf16:
        w1 = w1.astype(jnp.bfloat16)
        w2 = w2.astype(jnp.bfloat16)
    w_bytes = jnp.dtype(w1.dtype).itemsize
    x_bytes = jnp.dtype(x.dtype).itemsize

    row_align = 16 if x_bytes == 2 else 8      # bf16 packs 16 rows per sublane tile
    budget = _vmem_budget_bytes()
    tile_rows = _pick_tile_rows(n, dim_p, hidden_p, x_bytes, w_bytes, budget,
                                row_align, tile_rows)

    x_in = _pad2d(x, n, dim_p) if pad_cols else x
    gamma = _pad2d(params["gamma"].reshape(1, dim), 1, dim_p)
    beta = _pad2d(params["beta"].reshape(1, dim), 1, dim_p)
    w1 = _pad2d(w1, dim_p, hidden_p)
    b1 = _pad2d(params["b1"].reshape(1, hidden), 1, hidden_p)
    w2 = _pad2d(w2, hidden_p, dim_p)
    b2 = _pad2d(params["b2"].reshape(1, dim), 1, dim_p)

    out = _build_call(n, dim_p, hidden_p, tile_rows, x.dtype, dim, approx_gelu,
                      x_bytes, w_bytes, budget)(x_in, gamma, beta, w1, b1, w2, b2)
    return out[:, :dim] if pad_cols else out


def _reference(x, params):
    xf = x.astype(jnp.float32)
    mean = jnp.mean(xf, axis=-1, keepdims=True)
    var = jnp.mean((xf - mean) ** 2, axis=-1, keepdims=True)
    xn = (xf - mean) / jnp.sqrt(var + 1e-5)
    xn = xn * params["gamma"].astype(jnp.float32) + params["beta"].astype(jnp.float32)
    h = xn @ params["w1"].astype(jnp.float32) + params["b1"].astype(jnp.float32)
    h = 0.5 * h * (1.0 + lax.erf(h / jnp.sqrt(jnp.float32(2.0))))
    y = h @ params["w2"].astype(jnp.float32) + params["b2"].astype(jnp.float32)
    return (xf + y).astype(x.dtype)


if __name__ == "__main__":
    key = jax.random.PRNGKey(0)
    # Small synthetic graph: 500 nodes (deliberately not a multiple of the row tile,
    # exercising the ragged-tile path), dim=64, hidden=2*dim (FFN expansion).
    N, DIM, HIDDEN = 500, 64, 128

    kx, kg, kb, k1, k2, k3, k4 = jax.random.split(key, 7)
    x = jax.random.normal(kx, (N, DIM), dtype=jnp.float32)
    params = {
        "gamma": 1.0 + 0.1 * jax.random.normal(kg, (DIM,), jnp.float32),
        "beta": 0.1 * jax.random.normal(kb, (DIM,), jnp.float32),
        "w1": 0.1 * jax.random.normal(k1, (DIM, HIDDEN), jnp.float32),
        "b1": 0.01 * jax.random.normal(k2, (HIDDEN,), jnp.float32),
        "w2": 0.1 * jax.random.normal(k3, (HIDDEN, DIM), jnp.float32),
        "b2": 0.01 * jax.random.normal(k4, (DIM,), jnp.float32),
    }

    # f32 path (tight tolerance), ragged row count.
    out = jax.block_until_ready(residual_module_wrapper(x, params))
    ref = _reference(x, params)
    assert out.shape == (N, DIM) and out.dtype == x.dtype
    assert jnp.allclose(out, ref, atol=1e-4, rtol=1e-4), "f32 mismatch vs JAX reference"

    # bf16 path: matmuls run natively in bf16 on the MXU with f32 accumulation.
    xb = x.astype(jnp.bfloat16)
    params_b = {k: v.astype(jnp.bfloat16) for k, v in params.items()}
    out_b = jax.block_until_ready(residual_module_wrapper(xb, params_b))
    ref_b = _reference(xb, params_b)
    assert out_b.shape == (N, DIM) and out_b.dtype == jnp.bfloat16
    assert jnp.allclose(out_b.astype(jnp.float32), ref_b.astype(jnp.float32),
                        atol=5e-2, rtol=5e-2), "bf16 mismatch vs JAX reference"

    print("KERNEL_OK")
</pallas_src>

<mosaic_0001>
module attributes {stable_mosaic.version = 11 : i64} {
  func.func @_residual_ffn_kernel(%arg0: i32, %arg1: memref<504x128xf32, #tpu.memory_space<vmem>>, %arg2: memref<1x128xf32, #tpu.memory_space<vmem>>, %arg3: memref<1x128xf32, #tpu.memory_space<vmem>>, %arg4: memref<128x128xf32, #tpu.memory_space<vmem>>, %arg5: memref<1x128xf32, #tpu.memory_space<vmem>>, %arg6: memref<128x128xf32, #tpu.memory_space<vmem>>, %arg7: memref<1x128xf32, #tpu.memory_space<vmem>>, %arg8: memref<504x128xf32, #tpu.memory_space<vmem>>) attributes {dimension_semantics = [#tpu.dimension_semantics<parallel>], iteration_bounds = array<i64: 1>, scalar_prefetch = 0 : i64, scratch_operands = 0 : i64, tpu.core_type = #tpu.core_type<tc>, window_params = [{transform_indices = @transform_0, window_bounds = array<i64: 504, 128>}, {pipeline_mode = #tpu.pipeline_mode<synchronous>, transform_indices = @transform_1, window_bounds = array<i64: 1, 128>}, {pipeline_mode = #tpu.pipeline_mode<synchronous>, transform_indices = @transform_2, window_bounds = array<i64: 1, 128>}, {pipeline_mode = #tpu.pipeline_mode<synchronous>, transform_indices = @transform_3, window_bounds = array<i64: 128, 128>}, {pipeline_mode = #tpu.pipeline_mode<synchronous>, transform_indices = @transform_4, window_bounds = array<i64: 1, 128>}, {pipeline_mode = #tpu.pipeline_mode<synchronous>, transform_indices = @transform_5, window_bounds = array<i64: 128, 128>}, {pipeline_mode = #tpu.pipeline_mode<synchronous>, transform_indices = @transform_6, window_bounds = array<i64: 1, 128>}, {transform_indices = @transform_7, window_bounds = array<i64: 504, 128>}]} {
    %c0 = arith.constant 0 : index
    %c0_0 = arith.constant 0 : index
    %0 = vector.load %arg1[%c0, %c0_0] : memref<504x128xf32, #tpu.memory_space<vmem>>, vector<504x128xf32>
    %cst = arith.constant dense<0.000000e+00> : vector<504xf32>
    %1 = vector.multi_reduction <add>, %0, %cst [1] : vector<504x128xf32> to vector<504xf32>
    %2 = vector.shape_cast %1 : vector<504xf32> to vector<504x1xf32>
    %cst_1 = arith.constant 1.562500e-02 : f32
    %3 = vector.broadcast %cst_1 : f32 to vector<504x1xf32>
    %4 = arith.mulf %2, %3 : vector<504x1xf32>
    %5 = vector.broadcast %4 : vector<504x1xf32> to vector<504x128xf32>
    %6 = arith.subf %0, %5 : vector<504x128xf32>
    %7 = tpu.iota {dimensions = array<i32: 1>} : vector<504x128xi32>
    %c64_i32 = arith.constant 64 : i32
    %8 = vector.broadcast %c64_i32 : i32 to vector<504x128xi32>
    %9 = arith.cmpi slt, %7, %8 : vector<504x128xi32>
    %cst_2 = arith.constant 0.000000e+00 : f32
    %10 = vector.broadcast %cst_2 : f32 to vector<504x128xf32>
    %11 = arith.select %9, %6, %10 : vector<504x128xi1>, vector<504x128xf32>
    %12 = arith.mulf %11, %11 : vector<504x128xf32>
    %cst_3 = arith.constant dense<0.000000e+00> : vector<504xf32>
    %13 = vector.multi_reduction <add>, %12, %cst_3 [1] : vector<504x128xf32> to vector<504xf32>
    %14 = vector.shape_cast %13 : vector<504xf32> to vector<504x1xf32>
    %cst_4 = arith.constant 1.562500e-02 : f32
    %15 = vector.broadcast %cst_4 : f32 to vector<504x1xf32>
    %16 = arith.mulf %14, %15 : vector<504x1xf32>
    %cst_5 = arith.constant 9.99999974E-6 : f32
    %17 = vector.broadcast %cst_5 : f32 to vector<504x1xf32>
    %18 = arith.addf %16, %17 : vector<504x1xf32>
    %19 = math.rsqrt %18 : vector<504x1xf32>
    %20 = vector.broadcast %19 : vector<504x1xf32> to vector<504x128xf32>
    %21 = arith.mulf %11, %20 : vector<504x128xf32>
    %c0_6 = arith.constant 0 : index
    %c0_7 = arith.constant 0 : index
    %22 = vector.load %arg2[%c0_6, %c0_7] : memref<1x128xf32, #tpu.memory_space<vmem>>, vector<1x128xf32>
    %23 = vector.broadcast %22 : vector<1x128xf32> to vector<504x128xf32>
    %24 = arith.mulf %21, %23 : vector<504x128xf32>
    %c0_8 = arith.constant 0 : index
    %c0_9 = arith.constant 0 : index
    %25 = vector.load %arg3[%c0_8, %c0_9] : memref<1x128xf32, #tpu.memory_space<vmem>>, vector<1x128xf32>
    %26 = vector.broadcast %25 : vector<1x128xf32> to vector<504x128xf32>
    %27 = arith.addf %24, %26 : vector<504x128xf32>
    %c0_10 = arith.constant 0 : index
    %c0_11 = arith.constant 0 : index
    %28 = vector.load %arg4[%c0_10, %c0_11] : memref<128x128xf32, #tpu.memory_space<vmem>>, vector<128x128xf32>
    %cst_12 = arith.constant dense<0.000000e+00> : vector<504x128xf32>
    %29 = tpu.matmul %27, %28, %cst_12 {dimension_numbers = #tpu.dot_dimension_numbers<[1], [0], [0], [1], [0, 0, 1, 1], [], []>} : vector<504x128xf32>, vector<128x128xf32>, vector<504x128xf32> -> vector<504x128xf32>
    %c0_13 = arith.constant 0 : index
    %c0_14 = arith.constant 0 : index
    %30 = vector.load %arg5[%c0_13, %c0_14] : memref<1x128xf32, #tpu.memory_space<vmem>>, vector<1x128xf32>
    %31 = vector.broadcast %30 : vector<1x128xf32> to vector<504x128xf32>
    %32 = arith.addf %29, %31 : vector<504x128xf32>
    %cst_15 = arith.constant 5.000000e-01 : f32
    %33 = vector.broadcast %cst_15 : f32 to vector<504x128xf32>
    %34 = arith.mulf %33, %32 : vector<504x128xf32>
    %cst_16 = arith.constant 0.707106769 : f32
    %35 = vector.broadcast %cst_16 : f32 to vector<504x128xf32>
    %36 = arith.mulf %32, %35 : vector<504x128xf32>
    %37 = math.erf %36 : vector<504x128xf32>
    %cst_17 = arith.constant 1.000000e+00 : f32
    %38 = vector.broadcast %cst_17 : f32 to vector<504x128xf32>
    %39 = arith.addf %38, %37 : vector<504x128xf32>
    %40 = arith.mulf %34, %39 : vector<504x128xf32>
    %c0_18 = arith.constant 0 : index
    %c0_19 = arith.constant 0 : index
    %41 = vector.load %arg6[%c0_18, %c0_19] : memref<128x128xf32, #tpu.memory_space<vmem>>, vector<128x128xf32>
    %cst_20 = arith.constant dense<0.000000e+00> : vector<504x128xf32>
    %42 = tpu.matmul %40, %41, %cst_20 {dimension_numbers = #tpu.dot_dimension_numbers<[1], [0], [0], [1], [0, 0, 1, 1], [], []>} : vector<504x128xf32>, vector<128x128xf32>, vector<504x128xf32> -> vector<504x128xf32>
    %c0_21 = arith.constant 0 : index
    %c0_22 = arith.constant 0 : index
    %43 = vector.load %arg7[%c0_21, %c0_22] : memref<1x128xf32, #tpu.memory_space<vmem>>, vector<1x128xf32>
    %44 = vector.broadcast %43 : vector<1x128xf32> to vector<504x128xf32>
    %45 = arith.addf %42, %44 : vector<504x128xf32>
    %c0_23 = arith.constant 0 : index
    %c0_24 = arith.constant 0 : index
    %46 = vector.load %arg1[%c0_23, %c0_24] : memref<504x128xf32, #tpu.memory_space<vmem>>, vector<504x128xf32>
    %47 = arith.addf %46, %45 : vector<504x128xf32>
    %c0_25 = arith.constant 0 : index
    %c0_26 = arith.constant 0 : index
    %48 = vector.load %arg8[%c0_25, %c0_26] : memref<504x128xf32, #tpu.memory_space<vmem>>, vector<504x128xf32>
    tpu.vector_store %arg8[%c0_25, %c0_26], %47 {strides = array<i32>} : memref<504x128xf32, #tpu.memory_space<vmem>>, vector<504x128xf32>,
    return
  }
  func.func @transform_0(%arg0: i32) -> (i32, i32) {
    %c0_i32 = arith.constant 0 : i32
    %c0_i32_0 = arith.constant 0 : i32
    return %arg0, %c0_i32 : i32, i32
  }
  func.func @transform_1(%arg0: i32) -> (i32, i32) {
    %c0_i32 = arith.constant 0 : i32
    %c0_i32_0 = arith.constant 0 : i32
    %c0_i32_1 = arith.constant 0 : i32
    return %c0_i32, %c0_i32_0 : i32, i32
  }
  func.func @transform_2(%arg0: i32) -> (i32, i32) {
    %c0_i32 = arith.constant 0 : i32
    %c0_i32_0 = arith.constant 0 : i32
    %c0_i32_1 = arith.constant 0 : i32
    return %c0_i32, %c0_i32_0 : i32, i32
  }
  func.func @transform_3(%arg0: i32) -> (i32, i32) {
    %c0_i32 = arith.constant 0 : i32
    %c0_i32_0 = arith.constant 0 : i32
    %c0_i32_1 = arith.constant 0 : i32
    return %c0_i32, %c0_i32_0 : i32, i32
  }
  func.func @transform_4(%arg0: i32) -> (i32, i32) {
    %c0_i32 = arith.constant 0 : i32
    %c0_i32_0 = arith.constant 0 : i32
    %c0_i32_1 = arith.constant 0 : i32
    return %c0_i32, %c0_i32_0 : i32, i32
  }
  func.func @transform_5(%arg0: i32) -> (i32, i32) {
    %c0_i32 = arith.constant 0 : i32
    %c0_i32_0 = arith.constant 0 : i32
    %c0_i32_1 = arith.constant 0 : i32
    return %c0_i32, %c0_i32_0 : i32, i32
  }
  func.func @transform_6(%arg0: i32) -> (i32, i32) {
    %c0_i32 = arith.constant 0 : i32
    %c0_i32_0 = arith.constant 0 : i32
    %c0_i32_1 = arith.constant 0 : i32
    return %c0_i32, %c0_i32_0 : i32, i32
  }
  func.func @transform_7(%arg0: i32) -> (i32, i32) {
    %c0_i32 = arith.constant 0 : i32
    %c0_i32_0 = arith.constant 0 : i32
    return %arg0, %c0_i32 : i32, i32
  }
}

</mosaic_0001>

<bundles_post_ra>
// kernel: tpu_custom_call.1
= control target key start
LH: loop header
LB: loop body
LE: loop exit
PB: predicated region body
PF: predicated region fallthrough
CT: control target
= control target key end

     0   :  { %12 = vsyncpa [#allocation3], 0  ;;  %s4784_s0 = inlined_call_operand.hbm [shape: f32[500,128], index: 0, kind: input, shape index: {}]   ;;  %s4785_s1 = inlined_call_operand.vmem [shape: f32[1,128], index: 1, kind: input, shape index: {}]   ;;  %s4786_s2 = inlined_call_operand.vmem [shape: f32[1,128], index: 2, kind: input, shape index: {}]   ;;  %s4787_s3 = inlined_call_operand.hbm [shape: f32[128,128], index: 3, kind: input, shape index: {}]   ;;  %s4788_s4 = inlined_call_operand.vmem [shape: f32[1,128], index: 4, kind: input, shape index: {}]   ;;  %s4789_s5 = inlined_call_operand.hbm [shape: f32[128,128], index: 5, kind: input, shape index: {}]   ;;  %s4790_s6 = inlined_call_operand.vmem [shape: f32[1,128], index: 6, kind: input, shape index: {}]   ;;  %s4791_s7 = inlined_call_operand.hbm [shape: f32[500,128], index: 7, kind: output, shape index: {}]  }
   0x1   :  { %13 = vsyncpa [#allocation6], 0 }
   0x2   :  { %14 = vsyncpa [#allocation4], 0  ;;  %s3311_s24 = smov [#allocation5]   ;;  %s3312_s26 = smov [#allocation2]  }
   0x3   :  { %s36_s25 = sshll.u32 %s3311_s24, 4  ;;  %s20_s27 = sshll.u32 %s3312_s26, 4  ;;  %s37_s25 = int_to_ptr.vmem [resolvable:$true] %s36_s25  ;;  %s21_s27 = int_to_ptr.vmem [resolvable:$true] %s20_s27 }
   0x4   :  { %s3233_s28 = scalar_lea.vmem %s37_s25, 2048  ;;  %p3238_p1 = scmp.lt.s32.totalorder %s37_s25, %s37_s25 }
   0x5   :  { %p3234_p0 = scmp.ne.s32.totalorder %s37_s25, %s3233_s28  ;;  %p3239_p2 = scmp.lt.s32.totalorder %s3233_s28, %s3233_s28 }
   0x7   :  { %p3240_p3 = por %p3239_p2, %p3238_p1 }
   0x9   :  { %p3241_p4 = pnand %p3240_p3, %p3234_p0 }
   0xb   :  { %3244 = shalt.err (!%p3241_p4)
}
   0xc   :  { %s3313_s29 = smov 128   ;;  %s3314_s30 = smov 8  }
   0xd   :  { %42 = dma.hbm_to_vmem [thread:$0]  %s4787_s3, 2048, %s37_s25, [#allocation6], %s3313_s29, %s3313_s29, %s3314_s30  }
   0xe   :  { %s3253_s10 = scalar_lea.vmem %s21_s27, 8064  ;;  %p3258_p6 = scmp.lt.s32.totalorder %s21_s27, %s21_s27 }
   0xf   :  { %p3254_p5 = scmp.ne.s32.totalorder %s21_s27, %s3253_s10  ;;  %p3259_p7 = scmp.lt.s32.totalorder %s3253_s10, %s3253_s10 }
  0x11   :  { %p3260_p8 = por %p3259_p7, %p3258_p6 }
  0x13   :  { %p3261_p9 = pnand %p3260_p8, %p3254_p5 }
  0x15   :  { %3264 = shalt.err (!%p3261_p9)
}
  0x16   :  { %26 = dma.hbm_to_vmem [thread:$0]  %s4784_s0, 8064, %s21_s27, [#allocation3], %s3313_s29, %s3313_s29, %s3314_s30  }
  0x17   :  { %s3315_s13 = smov [#allocation7]  }
  0x18   :  { %s50_s14 = sshll.u32 %s3315_s13, 4  ;;  %s51_s14 = int_to_ptr.vmem [resolvable:$true] %s50_s14 }
  0x19   :  { %s3273_s15 = scalar_lea.vmem %s51_s14, 2048  ;;  %p3278_p11 = scmp.lt.s32.totalorder %s51_s14, %s51_s14 }
  0x1a   :  { %p3274_p10 = scmp.ne.s32.totalorder %s51_s14, %s3273_s15  ;;  %p3279_p12 = scmp.lt.s32.totalorder %s3273_s15, %s3273_s15 }
  0x1c   :  { %p3280_p13 = por %p3279_p12, %p3278_p11 }
  0x1e   :  { %p3281_p0 = pnand %p3280_p13, %p3274_p10 }
  0x20   :  { %3284 = shalt.err (!%p3281_p0)
}
  0x21   :  { %56 = dma.hbm_to_vmem [thread:$0]  %s4789_s5, 2048, %s51_s14, [#allocation6], %s3313_s29, %s3313_s29, %s3314_s30  }
  0x22   :  { %3305 = dma.done.wait [#allocation3], 8064  }
  0x23   :  { %3306 = vsyncadd [#allocation3], 4294959232 }
  0x24   :  { %3307 = dma.done.wait [#allocation6], 4096  }
  0x25   :  { %3308 = vsyncadd [#allocation6], 4294963200  ;;  %v3377_v0 = vld [vmem:[#allocation2 + $0x10] sm:$0xff]  ;;  %v3379_v1 = vld [vmem:[#allocation2] sm:$0xff]  ;;  %v383_v44 = vlaneseq  ;;  %vm3317_vm1 = vmmov 0  }
  0x26   :  { %135 = vadd.xlane.f32.xlu1 %v3377_v0  ;;  %131 = vadd.xlane.f32.xlu0 %v3379_v1  ;;  %v3383_v2 = vld [vmem:[#allocation2 + $0x18] sm:$0xff]  ;;  %v3385_v3 = vld [vmem:[#allocation2 + $0x8] sm:$0xff]  ;;  %v3391_v5 = vld [vmem:[#allocation2 + $0x20] sm:$0xff] }
  0x27   :  { %v3389_v4 = vld [vmem:[#allocation2 + $0x28] sm:$0xff]  ;;  %v3395_v6 = vld [vmem:[#allocation2 + $0x38] sm:$0xff]  ;;  %v3397_v7 = vld [vmem:[#allocation2 + $0x30] sm:$0xff]  ;;  %v3511_v46 = vand.u32 127, %v383_v44 }
  0x28   :  { %v3401_v8 = vld [vmem:[#allocation2 + $0x48] sm:$0xff]  ;;  %v3403_v9 = vld [vmem:[#allocation2 + $0x40] sm:$0xff]  ;;  %v3407_v10 = vld [vmem:[#allocation2 + $0x58] sm:$0xff] }
  0x29   :  { %v3409_v11 = vld [vmem:[#allocation2 + $0x50] sm:$0xff]  ;;  %v3413_v12 = vld [vmem:[#allocation2 + $0x68] sm:$0xff]  ;;  %v3415_v13 = vld [vmem:[#allocation2 + $0x60] sm:$0xff]  ;;  %vm385_vm0 = vcmp.lt.s32.totalorder %v3511_v46, 64 }
  0x2a   :  { %137 = vadd.xlane.f32.xlu1 %v3383_v2  ;;  %133 = vadd.xlane.f32.xlu0 %v3385_v3  ;;  %v3419_v14 = vld [vmem:[#allocation2 + $0x78] sm:$0xff]  ;;  %v3421_v15 = vld [vmem:[#allocation2 + $0x70] sm:$0xff]  ;;  %v3425_v16 = vld [vmem:[#allocation2 + $0x88] sm:$0xff] }
  0x2b   :  { %v3427_v17 = vld [vmem:[#allocation2 + $0x80] sm:$0xff]  ;;  %v3431_v18 = vld [vmem:[#allocation2 + $0x98] sm:$0xff]  ;;  %v3433_v19 = vld [vmem:[#allocation2 + $0x90] sm:$0xff] }
  0x2c   :  { %v3437_v20 = vld [vmem:[#allocation2 + $0xa0] sm:$0xff]  ;;  %v3440_v21 = vld [vmem:[#allocation2 + $0xa8] sm:$0xff]  ;;  %v3443_v22 = vld [vmem:[#allocation2 + $0xb0] sm:$0xff] }
  0x2d   :  { %v3446_v23 = vld [vmem:[#allocation2 + $0xb8] sm:$0xff]  ;;  %v3449_v24 = vld [vmem:[#allocation2 + $0xc0] sm:$0xff]  ;;  %v3452_v25 = vld [vmem:[#allocation2 + $0xc8] sm:$0xff] }
  0x2e   :  { %141 = vadd.xlane.f32.xlu1 %v3389_v4  ;;  %139 = vadd.xlane.f32.xlu0 %v3391_v5  ;;  %v3455_v26 = vld [vmem:[#allocation2 + $0xd0] sm:$0xff]  ;;  %v3458_v27 = vld [vmem:[#allocation2 + $0xd8] sm:$0xff]  ;;  %v3461_v28 = vld [vmem:[#allocation2 + $0xe0] sm:$0xff] }
  0x2f   :  { %v3464_v29 = vld [vmem:[#allocation2 + $0xe8] sm:$0xff]  ;;  %v3467_v30 = vld [vmem:[#allocation2 + $0xf0] sm:$0xff]  ;;  %v3470_v31 = vld [vmem:[#allocation2 + $0xf8] sm:$0xff] }
  0x30   :  { %v3473_v32 = vld [vmem:[#allocation2 + $0x100] sm:$0xff]  ;;  %v3476_v33 = vld [vmem:[#allocation2 + $0x108] sm:$0xff]  ;;  %v3479_v34 = vld [vmem:[#allocation2 + $0x110] sm:$0xff] }
  0x31   :  { %v3482_v35 = vld [vmem:[#allocation2 + $0x118] sm:$0xff]  ;;  %v3485_v36 = vld [vmem:[#allocation2 + $0x120] sm:$0xff]  ;;  %v3488_v37 = vld [vmem:[#allocation2 + $0x128] sm:$0xff] }
  0x32   :  { %145 = vadd.xlane.f32.xlu1 %v3395_v6  ;;  %143 = vadd.xlane.f32.xlu0 %v3397_v7  ;;  %v3491_v38 = vld [vmem:[#allocation2 + $0x130] sm:$0xff]  ;;  %v3494_v39 = vld [vmem:[#allocation2 + $0x138] sm:$0xff]  ;;  %v3497_v40 = vld [vmem:[#allocation2 + $0x140] sm:$0xff] }
  0x33   :  { %v3500_v41 = vld [vmem:[#allocation2 + $0x148] sm:$0xff]  ;;  %v3503_v42 = vld [vmem:[#allocation2 + $0x150] sm:$0xff]  ;;  %v3506_v43 = vld [vmem:[#allocation2 + $0x158] sm:$0xff] }
  0x34   :  { %v3509_v45 = vld [vmem:[#allocation2 + $0x160] sm:$0xff]  ;;  %v3514_v49 = vld [vmem:[#allocation2 + $0x168] sm:$0xff]  ;;  %v3519_v55 = vld [vmem:[#allocation2 + $0x170] sm:$0xff] }
  0x35   :  { %v3530_v63 = vld [vmem:[#allocation2 + $0x178] sm:$0xff] }
  0x36   :  { %149 = vadd.xlane.f32.xlu1 %v3401_v8  ;;  %147 = vadd.xlane.f32.xlu0 %v3403_v9  ;;  %4816 = vst [vmem:[#allocation12_spill] sm:$0xff] %v3530_v63 }
  0x3a   :  { %153 = vadd.xlane.f32.xlu1 %v3407_v10  ;;  %151 = vadd.xlane.f32.xlu0 %v3409_v11 }
  0x3e   :  { %157 = vadd.xlane.f32.xlu1 %v3413_v12  ;;  %155 = vadd.xlane.f32.xlu0 %v3415_v13 }
  0x42   :  { %161 = vadd.xlane.f32.xlu1 %v3419_v14  ;;  %159 = vadd.xlane.f32.xlu0 %v3421_v15 }
  0x46   :  { %165 = vadd.xlane.f32.xlu1 %v3425_v16  ;;  %163 = vadd.xlane.f32.xlu0 %v3427_v17 }
  0x4a   :  { %169 = vadd.xlane.f32.xlu1 %v3431_v18  ;;  %167 = vadd.xlane.f32.xlu0 %v3433_v19 }
  0x4e   :  { %171 = vadd.xlane.f32.xlu1 %v3437_v20 }
  0x52   :  { %173 = vadd.xlane.f32.xlu1 %v3440_v21 }
  0x56   :  { %175 = vadd.xlane.f32.xlu1 %v3443_v22 }
  0x5a   :  { %177 = vadd.xlane.f32.xlu1 %v3446_v23 }
  0x5e   :  { %179 = vadd.xlane.f32.xlu1 %v3449_v24 }
  0x62   :  { %181 = vadd.xlane.f32.xlu1 %v3452_v25 }
  0x66   :  { %183 = vadd.xlane.f32.xlu1 %v3455_v26 }
  0x6a   :  { %185 = vadd.xlane.f32.xlu1 %v3458_v27 }
  0x6e   :  { %187 = vadd.xlane.f32.xlu1 %v3461_v28 }
  0x72   :  { %189 = vadd.xlane.f32.xlu1 %v3464_v29 }
  0x76   :  { %191 = vadd.xlane.f32.xlu1 %v3467_v30 }
  0x7a   :  { %193 = vadd.xlane.f32.xlu1 %v3470_v31 }
  0x7e   :  { %195 = vadd.xlane.f32.xlu1 %v3473_v32 }
  0x82   :  { %197 = vadd.xlane.f32.xlu1 %v3476_v33 }
  0x86   :  { %199 = vadd.xlane.f32.xlu1 %v3479_v34 }
  0x8a   :  { %201 = vadd.xlane.f32.xlu1 %v3482_v35 }
  0x8e   :  { %203 = vadd.xlane.f32.xlu1 %v3485_v36 }
  0x92   :  { %205 = vadd.xlane.f32.xlu1 %v3488_v37 }
  0x96   :  { %207 = vadd.xlane.f32.xlu1 %v3491_v38 }
  0x9a   :  { %209 = vadd.xlane.f32.xlu1 %v3494_v39 }
  0x9e   :  { %211 = vadd.xlane.f32.xlu1 %v3497_v40 }
  0xa2   :  { %213 = vadd.xlane.f32.xlu1 %v3500_v41 }
  0xa6   :  { %215 = vadd.xlane.f32.xlu1 %v3503_v42 }
  0xaa   :  { %217 = vadd.xlane.f32.xlu1 %v3506_v43 }
  0xae   :  { %219 = vadd.xlane.f32.xlu1 %v3509_v45 }
  0xaf   :  { %v136_v47 = vpop.xlane.xlu1 %135  ;;  %v132_v48 = vpop.xlane.xlu0 %131 }
  0xb0   :  { %v259_v50 = vmul.f32 0.015625, %v136_v47  ;;  %v257_v51 = vmul.f32 0.015625, %v132_v48 }
  0xb2   :  { %v320_v52 = vsub.f32 %v3379_v1, %v257_v51  ;;  %221 = vadd.xlane.f32.xlu1 %v3514_v49  ;;  %v322_v56 = vsub.f32 %v3377_v0, %v259_v50  ;;  %v1045_v50 = vld [vmem:[#allocation5 + $0x78] sm:$0xff]  ;;  %v4800_v51 = vmov 0.0  }
  0xb3   :  { %v138_v53 = vpop.xlane.xlu1 %137  ;;  %v134_v54 = vpop.xlane.xlu0 %133  ;;  %2457 = vmatprep.subr.mxu0 %v4800_v51  ;;  %2678 = vmatprep.subr.mxu1 %v4800_v51 }
  0xb4   :  { %v260_v57 = vmul.f32 0.015625, %v138_v53  ;;  %v258_v58 = vmul.f32 0.015625, %v134_v54  ;;  %v3524_v59 = vsel %vm385_vm0, %v320_v52, 0.0  ;;  %v3539_v47 = vsel %vm385_vm0, %v322_v56, 0.0  ;;  %2458 = vmatpush3.msra.mxu0 %v1045_v50  ;;  %v1044_v54 = vld [vmem:[#allocation5 + $0x70] sm:$0xff]  ;;  %2489 = vmatprep.mubr.msk.f32.mxu0 %vm3317_vm1, %v4800_v51 }
  0xb5   :  { %v449_v60 = vmul.f32 %v3524_v59, %v3524_v59  ;;  %v451_v53 = vmul.f32 %v3539_v47, %v3539_v47  ;;  %2459 = vmatprep.subr.mxu0 %v4800_v51  ;;  %2710 = vmatprep.mubr.msk.f32.mxu1 %vm3317_vm1, %v4800_v51 }
  0xb6   :  { %v321_v61 = vsub.f32 %v3385_v3, %v258_v58  ;;  %223 = vadd.xlane.f32.xlu1 %v3519_v55  ;;  %v323_v0 = vsub.f32 %v3383_v2, %v260_v57  ;;  %v3545_v2 = vld [vmem:[#allocation2 + $0x180] sm:$0xff]  ;;  %2460 = vmatpush3.msra.mxu0 %v1044_v54  ;;  %v1041_v54 = vld [vmem:[#allocation5 + $0x58] sm:$0xff] }
  0xb7   :  { %v142_v62 = vpop.xlane.xlu1 %141  ;;  %512 = vadd.xlane.f32.xlu0 %v449_v60  ;;  %v140_v1 = vpop.xlane.xlu0 %139  ;;  %2461 = vmatprep.subr.mxu0 %v4800_v51 }
  0xb8   :  { %v3535_v44 = vsel %vm385_vm0, %v321_v61, 0.0  ;;  %v261_v48 = vmul.f32 0.015625, %v140_v1  ;;  %v262_v56 = vmul.f32 0.015625, %v142_v62  ;;  %v3552_v58 = vsel %vm385_vm0, %v323_v0, 0.0  ;;  %v1043_v61 = vld [vmem:[#allocation5 + $0x68] sm:$0xff]  ;;  %v3558_v62 = vld [vmem:[#allocation2 + $0x188] sm:$0xff] }
  0xb9   :  { %v450_v3 = vmul.f32 %v3535_v44, %v3535_v44  ;;  %4817 = vst [vmem:[#allocation13_spill] sm:$0xff] %v3558_v62  ;;  %2462 = vmatpush3.msra.mxu0 %v1043_v61  ;;  %v1042_v0 = vld [vmem:[#allocation5 + $0x60] sm:$0xff]  ;;  %v3572_v61 = vld [vmem:[#allocation2 + $0x190] sm:$0xff] }
  0xba   :  { %225 = vadd.xlane.f32.xlu1 %v3530_v63  ;;  %v324_v57 = vsub.f32 %v3391_v5, %v261_v48  ;;  %v452_v5 = vmul.f32 %v3552_v58, %v3552_v58  ;;  %v325_v48 = vsub.f32 %v3389_v4, %v262_v56  ;;  %2463 = vmatprep.subr.mxu0 %v4800_v51  ;;  %v1040_v56 = vld [vmem:[#allocation5 + $0x50] sm:$0xff]  ;;  %v1039_v63 = vld [vmem:[#allocation5 + $0x48] sm:$0xff] }
  0xbb   :  { %v146_v52 = vpop.xlane.xlu1 %145  ;;  %514 = vadd.xlane.f32.xlu0 %v450_v3  ;;  %v144_v60 = vpop.xlane.xlu0 %143  ;;  %2464 = vmatpush3.msra.mxu0 %v1042_v0 }
  0xbc   :  { %v3565_v3 = vsel %vm385_vm0, %v324_v57, 0.0  ;;  %v263_v50 = vmul.f32 0.015625, %v144_v60  ;;  %2465 = vmatprep.subr.mxu0 %v4800_v51  ;;  %v264_v57 = vmul.f32 0.015625, %v146_v52  ;;  %v3579_v0 = vsel %vm385_vm0, %v325_v48, 0.0  ;;  %v1038_v52 = vld [vmem:[#allocation5 + $0x40] sm:$0xff] }
  0xbd   :  { %4818 = vst [vmem:[#allocation14_spill] sm:$0xff] %v3565_v3  ;;  %v453_v4 = vmul.f32 %v3565_v3, %v3565_v3  ;;  %2466 = vmatpush3.msra.mxu0 %v1041_v54  ;;  %4819 = vst [vmem:[#allocation15_spill] sm:$0xff] %v3579_v0  ;;  %v3586_v54 = vld [vmem:[#allocation2 + $0x198] sm:$0xff]  ;;  %v1037_v3 = vld [vmem:[#allocation5 + $0x38] sm:$0xff] }
  0xbe   :  { %227 = vadd.xlane.f32.xlu1 %v3545_v2  ;;  %v326_v60 = vsub.f32 %v3397_v7, %v263_v50  ;;  %2467 = vmatprep.subr.mxu0 %v4800_v51  ;;  %4820 = vst [vmem:[#allocation16_spill] sm:$0xff] %v3586_v54  ;;  %v454_v7 = vmul.f32 %v3579_v0, %v3579_v0  ;;  %v1035_v0 = vld [vmem:[#allocation5 + $0x28] sm:$0xff] }
  0xbf   :  { %v150_v1 = vpop.xlane.xlu1 %149  ;;  %516 = vadd.xlane.f32.xlu0 %v451_v53  ;;  %2468 = vmatpush3.msra.mxu0 %v1040_v56  ;;  %v327_v48 = vsub.f32 %v3395_v6, %v264_v57  ;;  %v1036_v57 = vld [vmem:[#allocation5 + $0x30] sm:$0xff] }
  0xc0   :  { %2469 = vmatprep.subr.mxu0 %v4800_v51  ;;  %v3593_v50 = vsel %vm385_vm0, %v326_v60, 0.0  ;;  %v266_v60 = vmul.f32 0.015625, %v150_v1  ;;  %v1034_v1 = vld [vmem:[#allocation5 + $0x20] sm:$0xff] }
  0xc1   :  { %2470 = vmatpush3.msra.mxu0 %v1039_v63  ;;  %4821 = vst [vmem:[#allocation17_spill] sm:$0xff] %v3593_v50  ;;  %v3600_v63 = vld [vmem:[#allocation2 + $0x1a0] sm:$0xff]  ;;  %v455_v6 = vmul.f32 %v3593_v50, %v3593_v50  ;;  %v1033_v50 = vld [vmem:[#allocation5 + $0x18] sm:$0xff] }
  0xc2   :  { %229 = vadd.xlane.f32.xlu1 %v3558_v62  ;;  %v148_v62 = vpop.xlane.xlu0 %147  ;;  %2471 = vmatprep.subr.mxu0 %v4800_v51 }
  0xc3   :  { %v3570_v53 = vpop.xlane.xlu1 %153  ;;  %518 = vadd.xlane.f32.xlu0 %v452_v5  ;;  %v265_v56 = vmul.f32 0.015625, %v148_v62  ;;  %2472 = vmatpush3.msra.mxu0 %v1038_v52  ;;  %v3607_v52 = vsel %vm385_vm0, %v327_v48, 0.0  ;;  %v329_v48 = vsub.f32 %v3401_v8, %v266_v60  ;;  %v1032_v60 = vld [vmem:[#allocation5 + $0x10] sm:$0xff] }
  0xc4   :  { %2473 = vmatprep.subr.mxu0 %v4800_v51  ;;  %4822 = vst [vmem:[#allocation18_spill] sm:$0xff] %v3607_v52 }
  0xc5   :  { %2474 = vmatpush3.msra.mxu0 %v1037_v3  ;;  %v328_v62 = vsub.f32 %v3403_v9, %v265_v56  ;;  %v3614_v3 = vld [vmem:[#allocation2 + $0x1a8] sm:$0xff]  ;;  %v456_v9 = vmul.f32 %v3607_v52, %v3607_v52 }
  0xc6   :  { %231 = vadd.xlane.f32.xlu1 %v3572_v61  ;;  %2475 = vmatprep.subr.mxu0 %v4800_v51 }
  0xc7   :  { %v3584_v5 = vpop.xlane.xlu1 %157  ;;  %520 = vadd.xlane.f32.xlu0 %v453_v4  ;;  %2476 = vmatpush3.msra.mxu0 %v1036_v57  ;;  %v3621_v56 = vsel %vm385_vm0, %v328_v62, 0.0 }
  0xc8   :  { %2477 = vmatprep.subr.mxu0 %v4800_v51  ;;  %4823 = vst [vmem:[#allocation19_spill] sm:$0xff] %v3621_v56  ;;  %v457_v8 = vmul.f32 %v3621_v56, %v3621_v56 }
  0xc9   :  { %2478 = vmatpush3.msra.mxu0 %v1035_v0  ;;  %v3628_v0 = vld [vmem:[#allocation2 + $0x1b0] sm:$0xff] }
  0xca   :  { %233 = vadd.xlane.f32.xlu1 %v3586_v54  ;;  %v152_v54 = vpop.xlane.xlu0 %151  ;;  %2479 = vmatprep.subr.mxu0 %v4800_v51 }
  0xcb   :  { %v3598_v4 = vpop.xlane.xlu1 %161  ;;  %522 = vadd.xlane.f32.xlu0 %v454_v7  ;;  %v267_v57 = vmul.f32 0.015625, %v152_v54  ;;  %2480 = vmatpush3.msra.mxu0 %v1034_v1  ;;  %v268_v54 = vmul.f32 0.015625, %v3570_v53  ;;  %v3636_v1 = vsel %vm385_vm0, %v329_v48, 0.0  ;;  %v1030_v53 = vld [vmem:[#allocation5] sm:$0xff] }
  0xcc   :  { %2481 = vmatprep.subr.mxu0 %v4800_v51  ;;  %4824 = vst [vmem:[#allocation20_spill] sm:$0xff] %v3636_v1 }
  0xcd   :  { %2482 = vmatpush3.msra.mxu0 %v1033_v50  ;;  %v330_v62 = vsub.f32 %v3409_v11, %v267_v57  ;;  %v3643_v50 = vld [vmem:[#allocation2 + $0x1b8] sm:$0xff]  ;;  %v458_v11 = vmul.f32 %v3636_v1, %v3636_v1  ;;  %v331_v48 = vsub.f32 %v3407_v10, %v268_v54  ;;  %v3660_v10 = vld [vmem:[#allocation2 + $0x1c0] sm:$0xff]  ;;  %v270_v54 = vmul.f32 0.015625, %v3584_v5 }
  0xce   :  { %235 = vadd.xlane.f32.xlu1 %v3600_v63  ;;  %2483 = vmatprep.subr.mxu0 %v4800_v51  ;;  %v156_v52 = vpop.xlane.xlu0 %155  ;;  %4825 = vst [vmem:[#allocation21_spill] sm:$0xff] %v3643_v50 }
  0xcf   :  { %v3612_v7 = vpop.xlane.xlu1 %165  ;;  %524 = vadd.xlane.f32.xlu0 %v455_v6  ;;  %2484 = vmatpush3.msra.mxu0 %v1032_v60  ;;  %v3650_v57 = vsel %vm385_vm0, %v330_v62, 0.0  ;;  %v269_v60 = vmul.f32 0.015625, %v156_v52 }
  0xd0   :  { %2485 = vmatprep.subr.mxu0 %v4800_v51  ;;  %4826 = vst [vmem:[#allocation22_spill] sm:$0xff] %v3650_v57  ;;  %v459_v52 = vmul.f32 %v3650_v57, %v3650_v57  ;;  %v333_v57 = vsub.f32 %v3413_v12, %v270_v54 }
  0xd1   :  { %v332_v62 = vsub.f32 %v3415_v13, %v269_v60  ;;  %v3685_v60 = vld [vmem:[#allocation2 + $0x1d0] sm:$0xff] }
  0xd2   :  { %237 = vadd.xlane.f32.xlu1 %v3614_v3  ;;  %v3693_v12 = vsel %vm385_vm0, %v333_v57, 0.0 }
  0xd3   :  { %v3626_v6 = vpop.xlane.xlu1 %169  ;;  %526 = vadd.xlane.f32.xlu0 %v456_v9  ;;  %v1031_v9 = vld [vmem:[#allocation5 + $0x8] sm:$0xff]  ;;  %v3680_v13 = vsel %vm385_vm0, %v332_v62, 0.0  ;;  %4830 = vst [vmem:[#allocation26_spill] sm:$0xff] %v3693_v12 }
  0xd4   :  { %2486 = vmatpush3.msra.mxu0 %v1031_v9  ;;  %v3668_v9 = vsel %vm385_vm0, %v331_v48, 0.0  ;;  %4829 = vst [vmem:[#allocation25_spill] sm:$0xff] %v3680_v13 }
  0xd5   :  { %2487 = vmatprep.subr.mxu0 %v4800_v51  ;;  %4827 = vst [vmem:[#allocation23_spill] sm:$0xff] %v3668_v9  ;;  %v460_v1 = vmul.f32 %v3668_v9, %v3668_v9 }
  0xd6   :  { %239 = vadd.xlane.f32.xlu1 %v3628_v0  ;;  %2488 = vmatpush3.msra.mxu0 %v1030_v53  ;;  %v160_v53 = vpop.xlane.xlu0 %159 }
  0xd7   :  { %v3641_v56 = vpop.xlane.xlu1 %171  ;;  %528 = vadd.xlane.f32.xlu0 %v457_v8  ;;  %v271_v5 = vmul.f32 0.015625, %v160_v53  ;;  %v3696_v53 = vld [vmem:[#allocation2 + $0x1d8] sm:$0xff] }
  0xd9   :  { %v334_v9 = vsub.f32 %v3421_v15, %v271_v5  ;;  %v3706_v5 = vld [vmem:[#allocation2 + $0x1e0] sm:$0xff] }
  0xda   :  { %241 = vadd.xlane.f32.xlu1 %v3643_v50  ;;  %v272_v50 = vmul.f32 0.015625, %v3598_v4  ;;  %v164_v54 = vpop.xlane.xlu0 %163  ;;  %4832 = vst [vmem:[#allocation28_spill] sm:$0xff] %v3706_v5 }
  0xdb   :  { %v3658_v8 = vpop.xlane.xlu1 %173  ;;  %530 = vadd.xlane.f32.xlu0 %v458_v11  ;;  %v3673_v11 = vld [vmem:[#allocation2 + $0x1c8] sm:$0xff]  ;;  %v3703_v4 = vsel %vm385_vm0, %v334_v9, 0.0  ;;  %v273_v15 = vmul.f32 0.015625, %v164_v54 }
  0xdc   :  { %4828 = vst [vmem:[#allocation24_spill] sm:$0xff] %v3673_v11  ;;  %4831 = vst [vmem:[#allocation27_spill] sm:$0xff] %v3703_v4  ;;  %v3717_v54 = vld [vmem:[#allocation2 + $0x1e8] sm:$0xff] }
  0xde   :  { %243 = vadd.xlane.f32.xlu1 %v3660_v10 }
  0xdf   :  { %v3671_v51 = vpop.xlane.xlu1 %175  ;;  %532 = vadd.xlane.f32.xlu0 %v459_v52  ;;  %v461_v52 = vmul.f32 %v3680_v13, %v3680_v13  ;;  %v335_v13 = vsub.f32 %v3419_v14, %v272_v50  ;;  %v168_v50 = vpop.xlane.xlu0 %167 }
  0xe1   :  { %v3714_v14 = vsel %vm385_vm0, %v335_v13, 0.0 }
  0xe2   :  { %245 = vadd.xlane.f32.xlu1 %v3673_v11  ;;  %v274_v11 = vmul.f32 0.015625, %v3612_v7  ;;  %4833 = vst [vmem:[#allocation29_spill] sm:$0xff] %v3714_v14 }
  0xe3   :  { %v3683_v48 = vpop.xlane.xlu1 %177  ;;  %534 = vadd.xlane.f32.xlu0 %v460_v1  ;;  %v462_v1 = vmul.f32 %v3693_v12, %v3693_v12  ;;  %v336_v12 = vsub.f32 %v3427_v17, %v273_v15  ;;  %v275_v17 = vmul.f32 0.015625, %v168_v50  ;;  %v3727_v15 = vld [vmem:[#allocation2 + $0x1f0] sm:$0xff] }
  0xe5   :  { %v3724_v7 = vsel %vm385_vm0, %v336_v12, 0.0 }
  0xe6   :  { %247 = vadd.xlane.f32.xlu1 %v3685_v60 }
  0xe7   :  { %v180_v62 = vpop.xlane.xlu1 %179  ;;  %536 = vadd.xlane.f32.xlu0 %v461_v52  ;;  %v463_v52 = vmul.f32 %v3703_v4, %v3703_v4  ;;  %v337_v4 = vsub.f32 %v3425_v16, %v274_v11 }
  0xe9   :  { %v3735_v16 = vsel %vm385_vm0, %v337_v4, 0.0 }
  0xea   :  { %249 = vadd.xlane.f32.xlu1 %v3696_v53  ;;  %4834 = vst [vmem:[#allocation30_spill] sm:$0xff] %v3735_v16  ;;  %v466_v12 = vmul.f32 %v3735_v16, %v3735_v16 }
  0xeb   :  { %v182_v57 = vpop.xlane.xlu1 %181  ;;  %538 = vadd.xlane.f32.xlu0 %v462_v1  ;;  %v464_v1 = vmul.f32 %v3714_v14, %v3714_v14  ;;  %v338_v14 = vsub.f32 %v3433_v19, %v275_v17 }
  0xee   :  { %251 = vadd.xlane.f32.xlu1 %v3706_v5  ;;  %v276_v5 = vmul.f32 0.015625, %v3626_v6  ;;  %v3744_v6 = vsel %vm385_vm0, %v338_v14, 0.0  ;;  %v279_v14 = vmul.f32 0.015625, %v3671_v51 }
  0xef   :  { %v184_v9 = vpop.xlane.xlu1 %183  ;;  %540 = vadd.xlane.f32.xlu0 %v463_v52  ;;  %v465_v52 = vmul.f32 %v3724_v7, %v3724_v7  ;;  %v467_v4 = vmul.f32 %v3744_v6, %v3744_v6 }
  0xf0   :  { %v339_v50 = vsub.f32 %v3431_v18, %v276_v5 }
  0xf2   :  { %253 = vadd.xlane.f32.xlu1 %v3717_v54  ;;  %v3752_v16 = vsel %vm385_vm0, %v339_v50, 0.0  ;;  %v342_v50 = vsub.f32 %v3443_v22, %v279_v14 }
  0xf3   :  { %v186_v13 = vpop.xlane.xlu1 %185  ;;  %542 = vadd.xlane.f32.xlu0 %v464_v1  ;;  %v277_v1 = vmul.f32 0.015625, %v3641_v56  ;;  %v468_v56 = vmul.f32 %v3752_v16, %v3752_v16 }
  0xf5   :  { %v340_v17 = vsub.f32 %v3437_v20, %v277_v1  ;;  %v280_v1 = vmul.f32 0.015625, %v3683_v48 }
  0xf6   :  { %255 = vadd.xlane.f32.xlu1 %v3727_v15 }
  0xf7   :  { %v188_v11 = vpop.xlane.xlu1 %187  ;;  %544 = vadd.xlane.f32.xlu0 %v465_v52  ;;  %v278_v52 = vmul.f32 0.015625, %v3658_v8 }
  0xf9   :  { %v341_v5 = vsub.f32 %v3440_v21, %v278_v52  ;;  %v281_v52 = vmul.f32 0.015625, %v180_v62 }
  0xfb   :  { %v190_v19 = vpop.xlane.xlu1 %189  ;;  %546 = vadd.xlane.f32.xlu0 %v466_v12  ;;  %v3760_v12 = vsel %vm385_vm0, %v340_v17, 0.0  ;;  %v343_v17 = vsub.f32 %v3446_v23, %v280_v1  ;;  %v344_v48 = vsub.f32 %v3449_v24, %v281_v52 }
  0xfc   :  { %4835 = vst [vmem:[#allocation31_spill] sm:$0xff] %v3760_v12  ;;  %v469_v8 = vmul.f32 %v3760_v12, %v3760_v12 }
  0xfd   :  { %v3782_v14 = vsel %vm385_vm0, %v343_v17, 0.0  ;;  %v3789_v1 = vsel %vm385_vm0, %v344_v48, 0.0  ;;  %v284_v17 = vmul.f32 0.015625, %v186_v13  ;;  %v285_v48 = vmul.f32 0.015625, %v188_v11 }
  0xfe   :  { %v472_v23 = vmul.f32 %v3782_v14, %v3782_v14  ;;  %v473_v24 = vmul.f32 %v3789_v1, %v3789_v1 }
  0xff   :  { %v192_v18 = vpop.xlane.xlu1 %191  ;;  %548 = vadd.xlane.f32.xlu0 %v467_v4  ;;  %v3768_v4 = vsel %vm385_vm0, %v341_v5, 0.0  ;;  %v282_v5 = vmul.f32 0.015625, %v182_v57  ;;  %v348_v13 = vsub.f32 %v3461_v28, %v285_v48 }
 0x100   :  { %v470_v51 = vmul.f32 %v3768_v4, %v3768_v4 }
 0x101   :  { %v345_v62 = vsub.f32 %v3452_v25, %v282_v5 }
 0x103   :  { %v194_v20 = vpop.xlane.xlu1 %193  ;;  %550 = vadd.xlane.f32.xlu0 %v468_v56  ;;  %v3775_v56 = vsel %vm385_vm0, %v342_v50, 0.0  ;;  %v283_v50 = vmul.f32 0.015625, %v184_v9  ;;  %v3796_v52 = vsel %vm385_vm0, %v345_v62, 0.0  ;;  %v347_v9 = vsub.f32 %v3458_v27, %v284_v17 }
 0x104   :  { %v471_v22 = vmul.f32 %v3775_v56, %v3775_v56  ;;  %v474_v25 = vmul.f32 %v3796_v52, %v3796_v52  ;;  %v286_v62 = vmul.f32 0.015625, %v190_v19  ;;  %v3817_v17 = vsel %vm385_vm0, %v348_v13, 0.0 }
 0x105   :  { %v346_v57 = vsub.f32 %v3455_v26, %v283_v50  ;;  %v3810_v50 = vsel %vm385_vm0, %v347_v9, 0.0  ;;  %v477_v28 = vmul.f32 %v3817_v17, %v3817_v17  ;;  %v288_v9 = vmul.f32 0.015625, %v194_v20 }
 0x106   :  { %v476_v27 = vmul.f32 %v3810_v50, %v3810_v50  ;;  %v349_v11 = vsub.f32 %v3464_v29, %v286_v62 }
 0x107   :  { %v196_v21 = vpop.xlane.xlu1 %195  ;;  %552 = vadd.xlane.f32.xlu0 %v469_v8  ;;  %v3803_v5 = vsel %vm385_vm0, %v346_v57, 0.0  ;;  %v287_v57 = vmul.f32 0.015625, %v192_v18  ;;  %v351_v18 = vsub.f32 %v3470_v31, %v288_v9 }
 0x108   :  { %v475_v26 = vmul.f32 %v3803_v5, %v3803_v5  ;;  %v3824_v48 = vsel %vm385_vm0, %v349_v11, 0.0  ;;  %v289_v13 = vmul.f32 0.015625, %v196_v21 }
 0x109   :  { %v350_v19 = vsub.f32 %v3467_v30, %v287_v57  ;;  %v478_v29 = vmul.f32 %v3824_v48, %v3824_v48  ;;  %v3842_v57 = vsel %vm385_vm0, %v351_v18, 0.0 }
 0x10a   :  { %v352_v20 = vsub.f32 %v3473_v32, %v289_v13  ;;  %v480_v31 = vmul.f32 %v3842_v57, %v3842_v57 }
 0x10b   :  { %v198_v12 = vpop.xlane.xlu1 %197  ;;  %554 = vadd.xlane.f32.xlu0 %v470_v51  ;;  %v3833_v62 = vsel %vm385_vm0, %v350_v19, 0.0 }
 0x10c   :  { %v479_v30 = vmul.f32 %v3833_v62, %v3833_v62  ;;  %v290_v11 = vmul.f32 0.015625, %v198_v12  ;;  %v3851_v9 = vsel %vm385_vm0, %v352_v20, 0.0 }
 0x10d   :  { %v481_v32 = vmul.f32 %v3851_v9, %v3851_v9 }
 0x10e   :  { %v353_v21 = vsub.f32 %v3476_v33, %v290_v11 }
 0x10f   :  { %v200_v8 = vpop.xlane.xlu1 %199  ;;  %556 = vadd.xlane.f32.xlu0 %v471_v22 }
 0x110   :  { %v291_v19 = vmul.f32 0.015625, %v200_v8  ;;  %v3860_v13 = vsel %vm385_vm0, %v353_v21, 0.0 }
 0x111   :  { %v482_v33 = vmul.f32 %v3860_v13, %v3860_v13 }
 0x112   :  { %v354_v12 = vsub.f32 %v3479_v34, %v291_v19 }
 0x113   :  { %v202_v51 = vpop.xlane.xlu1 %201  ;;  %558 = vadd.xlane.f32.xlu0 %v472_v23 }
 0x114   :  { %v292_v18 = vmul.f32 0.015625, %v202_v51 }
 0x116   :  { %v355_v8 = vsub.f32 %v3482_v35, %v292_v18 }
 0x117   :  { %v204_v22 = vpop.xlane.xlu1 %203  ;;  %560 = vadd.xlane.f32.xlu0 %v473_v24 }
 0x118   :  { %v293_v20 = vmul.f32 0.015625, %v204_v22  ;;  %v3881_v22 = vsel %vm385_vm0, %v355_v8, 0.0 }
 0x119   :  { %v484_v18 = vmul.f32 %v3881_v22, %v3881_v22 }
 0x11a   :  { %v356_v19 = vsub.f32 %v3485_v36, %v293_v20 }
 0x11b   :  { %v206_v23 = vpop.xlane.xlu1 %205  ;;  %562 = vadd.xlane.f32.xlu0 %v474_v25 }
 0x11c   :  { %v3890_v20 = vsel %vm385_vm0, %v356_v19, 0.0 }
 0x11f   :  { %v208_v24 = vpop.xlane.xlu1 %207  ;;  %564 = vadd.xlane.f32.xlu0 %v475_v26 }
 0x123   :  { %v210_v25 = vpop.xlane.xlu1 %209  ;;  %566 = vadd.xlane.f32.xlu0 %v476_v27 }
 0x127   :  { %v3826_v26 = vpop.xlane.xlu1 %211  ;;  %568 = vadd.xlane.f32.xlu0 %v477_v28 }
 0x12b   :  { %v3835_v27 = vpop.xlane.xlu1 %213  ;;  %570 = vadd.xlane.f32.xlu0 %v478_v29 }
 0x12f   :  { %v3844_v28 = vpop.xlane.xlu1 %215  ;;  %572 = vadd.xlane.f32.xlu0 %v479_v30 }
 0x133   :  { %v3853_v29 = vpop.xlane.xlu1 %217  ;;  %574 = vadd.xlane.f32.xlu0 %v480_v31  ;;  %v3867_v31 = vsel %vm385_vm0, %v354_v12, 0.0 }
 0x134   :  { %v483_v21 = vmul.f32 %v3867_v31, %v3867_v31 }
 0x137   :  { %v220_v30 = vpop.xlane.xlu1 %219  ;;  %576 = vadd.xlane.f32.xlu0 %v481_v32  ;;  %v294_v32 = vmul.f32 0.015625, %v206_v23  ;;  %v295_v23 = vmul.f32 0.015625, %v208_v24 }
 0x138   :  { %v301_v11 = vmul.f32 0.015625, %v220_v30 }
 0x139   :  { %v357_v36 = vsub.f32 %v3488_v37, %v294_v32  ;;  %v296_v37 = vmul.f32 0.015625, %v210_v25 }
 0x13a   :  { %v364_v34 = vsub.f32 %v3509_v45, %v301_v11 }
 0x13b   :  { %v3870_v51 = vpop.xlane.xlu1 %221  ;;  %578 = vadd.xlane.f32.xlu0 %v482_v33  ;;  %v3904_v19 = vsel %vm385_vm0, %v357_v36, 0.0  ;;  %v359_v25 = vsub.f32 %v3494_v39, %v296_v37 }
 0x13c   :  { %v3877_v35 = vsel %vm385_vm0, %v364_v34, 0.0 }
 0x13d   :  { %4836 = vst [vmem:[#allocation32_spill] sm:$0xff] %v3877_v35  ;;  %v493_v45 = vmul.f32 %v3877_v35, %v3877_v35  ;;  %v3923_v39 = vsel %vm385_vm0, %v359_v25, 0.0 }
 0x13e   :  { %v488_v25 = vmul.f32 %v3923_v39, %v3923_v39 }
 0x13f   :  { %600 = vadd.xlane.f32.xlu1 %v493_v45  ;;  %v224_v12 = vpop.xlane.xlu1 %223  ;;  %580 = vadd.xlane.f32.xlu0 %v483_v21  ;;  %v485_v21 = vmul.f32 %v3890_v20, %v3890_v20  ;;  %v358_v45 = vsub.f32 %v3491_v38, %v295_v23  ;;  %v486_v38 = vmul.f32 %v3904_v19, %v3904_v19  ;;  %v297_v23 = vmul.f32 0.015625, %v3826_v26 }
 0x140   :  { %v303_v30 = vmul.f32 0.015625, %v224_v12  ;;  %v513_v33 = vpop.xlane.xlu0 %512 }
 0x141   :  { %v638_v8 = vmul.f32 0.015625, %v513_v33  ;;  %v3914_v36 = vsel %vm385_vm0, %v358_v45, 0.0  ;;  %v360_v26 = vsub.f32 %v3497_v40, %v297_v23  ;;  %v298_v45 = vmul.f32 0.015625, %v3835_v27 }
 0x142   :  { %v366_v11 = vsub.f32 %v3519_v55, %v303_v30  ;;  %v299_v23 = vmul.f32 0.015625, %v3844_v28 }
 0x143   :  { %v701_v34 = vadd.f32 1e-05, %v638_v8  ;;  %v3893_v35 = vpop.xlane.xlu1 %225  ;;  %582 = vadd.xlane.f32.xlu0 %v484_v18  ;;  %v3937_v40 = vsel %vm385_vm0, %v360_v26, 0.0  ;;  %v361_v27 = vsub.f32 %v3500_v41, %v298_v45  ;;  %v300_v45 = vmul.f32 0.015625, %v3853_v29 }
 0x144   :  { %v3900_v24 = vsel %vm385_vm0, %v366_v11, 0.0  ;;  %v515_v32 = vpop.xlane.xlu0 %514  ;;  %v489_v41 = vmul.f32 %v3937_v40, %v3937_v40 }
 0x145   :  { %2907 = vrsqrt.f32 %v701_v34  ;;  %v639_v55 = vmul.f32 0.015625, %v515_v32  ;;  %v495_v12 = vmul.f32 %v3900_v24, %v3900_v24  ;;  %v3954_v26 = vsel %vm385_vm0, %v361_v27, 0.0 }
 0x147   :  { %v702_v18 = vadd.f32 1e-05, %v639_v55  ;;  %604 = vadd.xlane.f32.xlu1 %v495_v12  ;;  %v228_v30 = vpop.xlane.xlu1 %227  ;;  %584 = vadd.xlane.f32.xlu0 %v485_v21  ;;  %v487_v21 = vmul.f32 %v3914_v36, %v3914_v36 }
 0x148   :  { %v305_v33 = vmul.f32 0.015625, %v228_v30  ;;  %v517_v8 = vpop.xlane.xlu0 %516 }
 0x149   :  { %2909 = vrsqrt.f32 %v702_v18  ;;  %v640_v11 = vmul.f32 0.015625, %v517_v8 }
 0x14a   :  { %v368_v34 = vsub.f32 %v3545_v2, %v305_v33 }
 0x14b   :  { %v703_v32 = vadd.f32 1e-05, %v640_v11  ;;  %v3917_v55 = vpop.xlane.xlu1 %229  ;;  %586 = vadd.xlane.f32.xlu0 %v486_v38 }
 0x14c   :  { %v3929_v37 = vsel %vm385_vm0, %v368_v34, 0.0  ;;  %v519_v2 = vpop.xlane.xlu0 %518 }
 0x14d   :  { %2911 = vrsqrt.f32 %v703_v32  ;;  %v641_v12 = vmul.f32 0.015625, %v519_v2  ;;  %v497_v18 = vmul.f32 %v3929_v37, %v3929_v37 }
 0x14f   :  { %v704_v30 = vadd.f32 1e-05, %v641_v12  ;;  %608 = vadd.xlane.f32.xlu1 %v497_v18  ;;  %v232_v38 = vpop.xlane.xlu1 %231  ;;  %588 = vadd.xlane.f32.xlu0 %v487_v21  ;;  %v3945_v21 = vld [vmem:[%s4785_s1] ss:$0 sm:$0xff] }
 0x150   :  { %v307_v33 = vmul.f32 0.015625, %v232_v38  ;;  %v521_v8 = vpop.xlane.xlu0 %520  ;;  %v3965_v38 = vld [vmem:[%s4786_s2] ss:$0 sm:$0xff] }
 0x151   :  { %2913 = vrsqrt.f32 %v704_v30  ;;  %v642_v11 = vmul.f32 0.015625, %v521_v8  ;;  %v490_v8 = vmul.f32 %v3954_v26, %v3954_v26 }
 0x152   :  { %v2908_v34 = vpop.eup %2907  ;;  %v370_v32 = vsub.f32 %v3572_v61, %v307_v33  ;;  %v362_v61 = vsub.f32 %v3503_v42, %v299_v23 }
 0x153   :  { %v705_v2 = vadd.f32 1e-05, %v642_v11  ;;  %v3947_v12 = vpop.xlane.xlu1 %233  ;;  %590 = vadd.xlane.f32.xlu0 %v488_v25  ;;  %v827_v28 = vmul.f32 %v2908_v34, %v3524_v59 }
 0x154   :  { %v3960_v18 = vsel %vm385_vm0, %v370_v32, 0.0  ;;  %v523_v30 = vpop.xlane.xlu0 %522  ;;  %v3976_v34 = vsel %vm385_vm0, %v362_v61, 0.0  ;;  %v363_v32 = vsub.f32 %v3506_v43, %v300_v45 }
 0x155   :  { %4837 = vst [vmem:[#allocation33_spill] sm:$0xff] %v3960_v18  ;;  %2915 = vrsqrt.f32 %v705_v2  ;;  %v643_v59 = vmul.f32 0.015625, %v523_v30  ;;  %v499_v25 = vmul.f32 %v3960_v18, %v3960_v18  ;;  %v897_v27 = vmul.f32 %v3945_v21, %v827_v28 }
 0x156   :  { %v2910_v42 = vpop.eup %2909  ;;  %v302_v2 = vmul.f32 0.015625, %v3870_v51  ;;  %v4838_v18 = vmov 0.0   ;;  %v491_v51 = vmul.f32 %v3976_v34, %v3976_v34 }
 0x157   :  { %v706_v23 = vadd.f32 1e-05, %v643_v59  ;;  %612 = vadd.xlane.f32.xlu1 %v499_v25  ;;  %v236_v29 = vpop.xlane.xlu1 %235  ;;  %592 = vadd.xlane.f32.xlu0 %v489_v41  ;;  %v967_v33 = vadd.f32 %v3965_v38, %v897_v27  ;;  %v828_v11 = vmul.f32 %v2910_v42, %v3535_v44  ;;  %v3992_v42 = vsel %vm385_vm0, %v363_v32, 0.0 }
 0x158   :  { %v309_v28 = vmul.f32 0.015625, %v236_v29  ;;  %v525_v30 = vpop.xlane.xlu0 %524 }
 0x159   :  { %2917 = vrsqrt.f32 %v706_v23  ;;  %v644_v59 = vmul.f32 0.015625, %v525_v30  ;;  %2490 = vmatmul.mubr.f32.vlgmr.msra.gmra.mxu0 %v967_v33  ;;  %v898_v41 = vmul.f32 %v3945_v21, %v828_v11  ;;  %v304_v23 = vmul.f32 0.015625, %v3893_v35 }
 0x15a   :  { %v2912_v25 = vpop.eup %2911  ;;  %v372_v27 = vsub.f32 %v3600_v63, %v309_v28  ;;  %2492 = vmatprep.mubr.msk.f32.mxu0 %vm3317_vm1, %v4838_v18  ;;  %v365_v63 = vsub.f32 %v3514_v49, %v302_v2  ;;  %v492_v2 = vmul.f32 %v3992_v42, %v3992_v42 }
 0x15b   :  { %v707_v44 = vadd.f32 1e-05, %v644_v59  ;;  %v3984_v61 = vpop.xlane.xlu1 %237  ;;  %594 = vadd.xlane.f32.xlu0 %v490_v8  ;;  %v968_v43 = vadd.f32 %v3965_v38, %v898_v41  ;;  %v829_v45 = vmul.f32 %v2912_v25, %v3539_v47  ;;  %v4839_v41 = vld [vmem:[#allocation12_spill] sm:$0xff] }
 0x15c   :  { %v3998_v29 = vsel %vm385_vm0, %v372_v27, 0.0  ;;  %v527_v33 = vpop.xlane.xlu0 %526  ;;  %v4011_v59 = vsel %vm385_vm0, %v365_v63, 0.0  ;;  %v367_v25 = vsub.f32 %v4839_v41, %v304_v23  ;;  %v306_v27 = vmul.f32 0.015625, %v3917_v55 }
 0x15d   :  { %2919 = vrsqrt.f32 %v707_v44  ;;  %v645_v8 = vmul.f32 0.015625, %v527_v33  ;;  %2493 = vmatmul.mubr.f32.gmra.mxu0 %v968_v43  ;;  %v501_v11 = vmul.f32 %v3998_v29, %v3998_v29  ;;  %v899_v47 = vmul.f32 %v3945_v21, %v829_v45 }
 0x15e   :  { %v2914_v28 = vpop.eup %2913  ;;  %2495 = vmatprep.mubr.msk.f32.mxu0 %vm3317_vm1, %v4838_v18  ;;  %v494_v55 = vmul.f32 %v4011_v59, %v4011_v59 }
 0x15f   :  { %v708_v49 = vadd.f32 1e-05, %v645_v8  ;;  %616 = vadd.xlane.f32.xlu1 %v501_v11  ;;  %v240_v35 = vpop.xlane.xlu1 %239  ;;  %596 = vadd.xlane.f32.xlu0 %v491_v51  ;;  %v969_v32 = vadd.f32 %v3965_v38, %v899_v47  ;;  %v830_v30 = vmul.f32 %v2914_v28, %v3552_v58  ;;  %v4840_v11 = vld [vmem:[#allocation14_spill] sm:$0xff]  ;;  %v4025_v28 = vsel %vm385_vm0, %v367_v25, 0.0 }
 0x160   :  { %v311_v44 = vmul.f32 0.015625, %v240_v35  ;;  %v529_v43 = vpop.xlane.xlu0 %528 }
 0x161   :  { %2921 = vrsqrt.f32 %v708_v49  ;;  %v646_v45 = vmul.f32 0.015625, %v529_v43  ;;  %2496 = vmatmul.mubr.f32.gmra.mxu0 %v969_v32  ;;  %v900_v51 = vmul.f32 %v3945_v21, %v830_v30  ;;  %v4841_v49 = vld [vmem:[#allocation13_spill] sm:$0xff] }
 0x162   :  { %v2916_v33 = vpop.eup %2915  ;;  %v374_v8 = vsub.f32 %v3628_v0, %v311_v44  ;;  %2498 = vmatprep.mubr.msk.f32.mxu0 %vm3317_vm1, %v4838_v18  ;;  %v369_v35 = vsub.f32 %v4841_v49, %v306_v27  ;;  %v308_v0 = vmul.f32 0.015625, %v3947_v12 }
 0x163   :  { %v709_v58 = vadd.f32 1e-05, %v646_v45  ;;  %v242_v63 = vpop.xlane.xlu1 %241  ;;  %598 = vadd.xlane.f32.xlu0 %v492_v2  ;;  %v970_v23 = vadd.f32 %v3965_v38, %v900_v51  ;;  %v831_v47 = vmul.f32 %v2916_v33, %v4840_v11  ;;  %v496_v45 = vmul.f32 %v4025_v28, %v4025_v28  ;;  %v4842_v51 = vld [vmem:[#allocation15_spill] sm:$0xff] }
 0x164   :  { %v4031_v32 = vsel %vm385_vm0, %v374_v8, 0.0  ;;  %v531_v2 = vpop.xlane.xlu0 %530  ;;  %v4044_v8 = vsel %vm385_vm0, %v369_v35, 0.0  ;;  %v310_v11 = vmul.f32 0.015625, %v3984_v61 }
 0x165   :  { %2923 = vrsqrt.f32 %v709_v58  ;;  %v647_v30 = vmul.f32 0.015625, %v531_v2  ;;  %2499 = vmatmul.mubr.f32.gmra.mxu0 %v970_v23  ;;  %v503_v41 = vmul.f32 %v4031_v32, %v4031_v32  ;;  %v901_v44 = vmul.f32 %v3945_v21, %v831_v47  ;;  %v4843_v58 = vld [vmem:[#allocation16_spill] sm:$0xff] }
 0x166   :  { %v2918_v43 = vpop.eup %2917  ;;  %2501 = vmatprep.mubr.msk.f32.mxu0 %vm3317_vm1, %v4838_v18  ;;  %v371_v23 = vsub.f32 %v4843_v58, %v308_v0  ;;  %v498_v61 = vmul.f32 %v4044_v8, %v4044_v8 }
 0x167   :  { %v710_v25 = vadd.f32 1e-05, %v647_v30  ;;  %620 = vadd.xlane.f32.xlu1 %v503_v41  ;;  %v244_v12 = vpop.xlane.xlu1 %243  ;;  %602 = vadd.xlane.f32.xlu0 %v494_v55  ;;  %v971_v27 = vadd.f32 %v3965_v38, %v901_v44  ;;  %v832_v33 = vmul.f32 %v2918_v43, %v4842_v51  ;;  %v4844_v43 = vld [vmem:[#allocation17_spill] sm:$0xff] }
 0x168   :  { %v313_v47 = vmul.f32 0.015625, %v244_v12  ;;  %v533_v49 = vpop.xlane.xlu0 %532  ;;  %v4058_v12 = vsel %vm385_vm0, %v371_v23, 0.0 }
 0x169   :  { %2925 = vrsqrt.f32 %v710_v25  ;;  %v648_v2 = vmul.f32 0.015625, %v533_v49  ;;  %2502 = vmatmul.mubr.f32.gmra.mxu0 %v971_v27  ;;  %v902_v55 = vmul.f32 %v3945_v21, %v832_v33  ;;  %v373_v27 = vsub.f32 %v3614_v3, %v310_v11 }
 0x16a   :  { %v2920_v30 = vpop.eup %2919  ;;  %v376_v41 = vsub.f32 %v3660_v10, %v313_v47  ;;  %2504 = vmatprep.mubr.msk.f32.mxu0 %vm3317_vm1, %v4838_v18  ;;  %v312_v10 = vmul.f32 0.015625, %v242_v63  ;;  %v500_v11 = vmul.f32 %v4058_v12, %v4058_v12 }
 0x16b   :  { %v711_v44 = vadd.f32 1e-05, %v648_v2  ;;  %v246_v35 = vpop.xlane.xlu1 %245  ;;  %606 = vadd.xlane.f32.xlu0 %v496_v45  ;;  %v972_v0 = vadd.f32 %v3965_v38, %v902_v55  ;;  %v833_v25 = vmul.f32 %v2920_v30, %v4844_v43  ;;  %v4845_v2 = vld [vmem:[#allocation18_spill] sm:$0xff]  ;;  %v4076_v30 = vsel %vm385_vm0, %v373_v27, 0.0 }
 0x16c   :  { %v4063_v51 = vsel %vm385_vm0, %v376_v41, 0.0  ;;  %v535_v33 = vpop.xlane.xlu0 %534  ;;  %v4846_v41 = vld [vmem:[#allocation21_spill] sm:$0xff] }
 0x16d   :  { %2927 = vrsqrt.f32 %v711_v44  ;;  %v649_v45 = vmul.f32 0.015625, %v535_v33  ;;  %2505 = vmatmul.mubr.f32.gmra.mxu0 %v972_v0  ;;  %v505_v58 = vmul.f32 %v4063_v51, %v4063_v51  ;;  %v903_v47 = vmul.f32 %v3945_v21, %v833_v25 }
 0x16e   :  { %v2922_v49 = vpop.eup %2921  ;;  %2507 = vmatprep.mubr.msk.f32.mxu0 %vm3317_vm1, %v4838_v18  ;;  %v375_v44 = vsub.f32 %v4846_v41, %v312_v10  ;;  %v314_v0 = vmul.f32 0.015625, %v246_v35  ;;  %v502_v35 = vmul.f32 %v4076_v30, %v4076_v30  ;;  %v4847_v10 = vld [vmem:[#allocation19_spill] sm:$0xff] }
 0x16f   :  { %v712_v23 = vadd.f32 1e-05, %v649_v45  ;;  %624 = vadd.xlane.f32.xlu1 %v505_v58  ;;  %v248_v3 = vpop.xlane.xlu1 %247  ;;  %610 = vadd.xlane.f32.xlu0 %v498_v61  ;;  %v973_v63 = vadd.f32 %v3965_v38, %v903_v47  ;;  %v834_v55 = vmul.f32 %v2922_v49, %v4845_v2 }
 0x170   :  { %v315_v43 = vmul.f32 0.015625, %v248_v3  ;;  %v537_v25 = vpop.xlane.xlu0 %536  ;;  %v4089_v3 = vsel %vm385_vm0, %v375_v44, 0.0 }
 0x171   :  { %2929 = vrsqrt.f32 %v712_v23  ;;  %v650_v33 = vmul.f32 0.015625, %v537_v25  ;;  %2508 = vmatmul.mubr.f32.gmra.mxu0 %v973_v63  ;;  %v904_v61 = vmul.f32 %v3945_v21, %v834_v55  ;;  %v4848_v63 = vld [vmem:[#allocation24_spill] sm:$0xff] }
 0x172   :  { %v2924_v45 = vpop.eup %2923  ;;  %v378_v58 = vsub.f32 %v3685_v60, %v315_v43  ;;  %2510 = vmatprep.mubr.msk.f32.mxu0 %vm3317_vm1, %v4838_v18  ;;  %v377_v2 = vsub.f32 %v4848_v63, %v314_v0 }
 0x173   :  { %v713_v47 = vadd.f32 1e-05, %v650_v33  ;;  %v250_v49 = vpop.xlane.xlu1 %249  ;;  %614 = vadd.xlane.f32.xlu0 %v500_v11  ;;  %v974_v27 = vadd.f32 %v3965_v38, %v904_v61  ;;  %v835_v23 = vmul.f32 %v2924_v45, %v4847_v10  ;;  %v504_v45 = vmul.f32 %v4089_v3, %v4089_v3 }
 0x174   :  { %v4094_v60 = vsel %vm385_vm0, %v378_v58, 0.0  ;;  %v316_v55 = vmul.f32 0.015625, %v250_v49  ;;  %v539_v41 = vpop.xlane.xlu0 %538  ;;  %v4849_v58 = vld [vmem:[#allocation20_spill] sm:$0xff]  ;;  %v4107_v49 = vsel %vm385_vm0, %v377_v2, 0.0 }
 0x175   :  { %2931 = vrsqrt.f32 %v713_v47  ;;  %v651_v11 = vmul.f32 0.015625, %v539_v41  ;;  %2511 = vmatmul.mubr.f32.gmra.mxu0 %v974_v27  ;;  %v507_v43 = vmul.f32 %v4094_v60, %v4094_v60  ;;  %v905_v25 = vmul.f32 %v3945_v21, %v835_v23 }
 0x176   :  { %v2926_v33 = vpop.eup %2925  ;;  %2513 = vmatprep.mubr.msk.f32.mxu0 %vm3317_vm1, %v4838_v18  ;;  %v379_v27 = vsub.f32 %v3696_v53, %v316_v55  ;;  %v506_v53 = vmul.f32 %v4107_v49, %v4107_v49  ;;  %v4851_v55 = vld [vmem:[#allocation22_spill] sm:$0xff] }
 0x177   :  { %v714_v44 = vadd.f32 1e-05, %v651_v11  ;;  %628 = vadd.xlane.f32.xlu1 %v507_v43  ;;  %v252_v0 = vpop.xlane.xlu1 %251  ;;  %618 = vadd.xlane.f32.xlu0 %v502_v35  ;;  %v975_v61 = vadd.f32 %v3965_v38, %v905_v25  ;;  %v836_v47 = vmul.f32 %v2926_v33, %v4849_v58  ;;  %v4850_v11 = vld [vmem:[#allocation28_spill] sm:$0xff] }
 0x178   :  { %v317_v10 = vmul.f32 0.015625, %v252_v0  ;;  %v541_v23 = vpop.xlane.xlu0 %540  ;;  %v4120_v0 = vsel %vm385_vm0, %v379_v27, 0.0 }
 0x179   :  { %2933 = vrsqrt.f32 %v714_v44  ;;  %v652_v63 = vmul.f32 0.015625, %v541_v23  ;;  %2514 = vmatmul.mubr.f32.gmra.mxu0 %v975_v61  ;;  %v906_v35 = vmul.f32 %v3945_v21, %v836_v47 }
 0x17a   :  { %v2928_v41 = vpop.eup %2927  ;;  %v380_v43 = vsub.f32 %v4850_v11, %v317_v10  ;;  %2516 = vmatprep.mubr.msk.f32.mxu0 %vm3317_vm1, %v4838_v18 }
 0x17b   :  { %v715_v25 = vadd.f32 1e-05, %v652_v63  ;;  %v254_v33 = vpop.xlane.xlu1 %253  ;;  %622 = vadd.xlane.f32.xlu0 %v504_v45  ;;  %v976_v2 = vadd.f32 %v3965_v38, %v906_v35  ;;  %v837_v44 = vmul.f32 %v2928_v41, %v4851_v55 }
 0x17c   :  { %v4124_v61 = vsel %vm385_vm0, %v380_v43, 0.0  ;;  %v318_v58 = vmul.f32 0.015625, %v254_v33  ;;  %v543_v47 = vpop.xlane.xlu0 %542  ;;  %v508_v43 = vmul.f32 %v4120_v0, %v4120_v0 }
 0x17d   :  { %2935 = vrsqrt.f32 %v715_v25  ;;  %v653_v10 = vmul.f32 0.015625, %v543_v47  ;;  %2517 = vmatmul.mubr.f32.gmra.mxu0 %v976_v2  ;;  %v509_v45 = vmul.f32 %v4124_v61, %v4124_v61  ;;  %v907_v23 = vmul.f32 %v3945_v21, %v837_v44  ;;  %v4852_v25 = vld [vmem:[#allocation23_spill] sm:$0xff] }
 0x17e   :  { %v2930_v63 = vpop.eup %2929  ;;  %v381_v35 = vsub.f32 %v3717_v54, %v318_v58  ;;  %2519 = vmatprep.mubr.msk.f32.mxu0 %vm3317_vm1, %v4838_v18 }
 0x17f   :  { %v716_v27 = vadd.f32 1e-05, %v653_v10  ;;  %632 = vadd.xlane.f32.xlu1 %v509_v45  ;;  %v256_v41 = vpop.xlane.xlu1 %255  ;;  %626 = vadd.xlane.f32.xlu0 %v506_v53  ;;  %v977_v11 = vadd.f32 %v3965_v38, %v907_v23  ;;  %v838_v33 = vmul.f32 %v2930_v63, %v4852_v25  ;;  %v4853_v63 = vld [vmem:[#allocation25_spill] sm:$0xff] }
 0x180   :  { %v4138_v2 = vsel %vm385_vm0, %v381_v35, 0.0  ;;  %v319_v55 = vmul.f32 0.015625, %v256_v41  ;;  %v545_v54 = vpop.xlane.xlu0 %544 }
 0x181   :  { %2937 = vrsqrt.f32 %v716_v27  ;;  %v654_v44 = vmul.f32 0.015625, %v545_v54  ;;  %2520 = vmatmul.mubr.f32.gmra.mxu0 %v977_v11  ;;  %v908_v58 = vmul.f32 %v3945_v21, %v838_v33  ;;  %v510_v23 = vmul.f32 %v4138_v2, %v4138_v2 }
 0x182   :  { %v2932_v47 = vpop.eup %2931  ;;  %v382_v53 = vsub.f32 %v3727_v15, %v319_v55  ;;  %2522 = vmatprep.mubr.msk.f32.mxu0 %vm3317_vm1, %v4838_v18  ;;  %v4854_v55 = vld [vmem:[#allocation26_spill] sm:$0xff] }
 0x183   :  { %v717_v10 = vadd.f32 1e-05, %v654_v44  ;;  %630 = vadd.xlane.f32.xlu0 %v508_v43  ;;  %v978_v45 = vadd.f32 %v3965_v38, %v908_v58  ;;  %v839_v35 = vmul.f32 %v2932_v47, %v4853_v63  ;;  %v4855_v63 = vld [vmem:[#allocation27_spill] sm:$0xff] }
 0x184   :  { %v4150_v27 = vsel %vm385_vm0, %v382_v53, 0.0  ;;  %v547_v41 = vpop.xlane.xlu0 %546 }
 0x185   :  { %2939 = vrsqrt.f32 %v717_v10  ;;  %v655_v11 = vmul.f32 0.015625, %v547_v41  ;;  %2523 = vmatmul.mubr.f32.gmra.mxu0 %v978_v45  ;;  %v511_v15 = vmul.f32 %v4150_v27, %v4150_v27  ;;  %v909_v43 = vmul.f32 %v3945_v21, %v839_v35 }
 0x186   :  { %v2934_v25 = vpop.eup %2933  ;;  %2525 = vmatprep.mubr.msk.f32.mxu0 %vm3317_vm1, %v4838_v18 }
 0x187   :  { %v718_v33 = vadd.f32 1e-05, %v655_v11  ;;  %636 = vadd.xlane.f32.xlu1 %v511_v15  ;;  %634 = vadd.xlane.f32.xlu0 %v510_v23  ;;  %v979_v46 = vadd.f32 %v3965_v38, %v909_v43  ;;  %v840_v54 = vmul.f32 %v2934_v25, %v4854_v55 }
 0x188   :  { %v549_v44 = vpop.xlane.xlu0 %548 }
 0x189   :  { %2941 = vrsqrt.f32 %v718_v33  ;;  %v656_v58 = vmul.f32 0.015625, %v549_v44  ;;  %2526 = vmatmul.mubr.f32.gmra.mxu0 %v979_v46  ;;  %v910_v47 = vmul.f32 %v3945_v21, %v840_v54  ;;  %v4856_v33 = vld [vmem:[#allocation29_spill] sm:$0xff] }
 0x18a   :  { %v2936_v53 = vpop.eup %2935  ;;  %2528 = vmatprep.mubr.msk.f32.mxu0 %vm3317_vm1, %v4838_v18 }
 0x18b   :  { %v719_v10 = vadd.f32 1e-05, %v656_v58  ;;  %v980_v45 = vadd.f32 %v3965_v38, %v910_v47  ;;  %v841_v35 = vmul.f32 %v2936_v53, %v4855_v63  ;;  %v1763_v58 = vld [vmem:[#allocation7 + $0x78] sm:$0xff]  ;;  %v1762_v63 = vld [vmem:[#allocation7 + $0x70] sm:$0xff] }
 0x18c   :  { %v551_v23 = vpop.xlane.xlu0 %550  ;;  %2679 = vmatpush3.msra.mxu1 %v1763_v58  ;;  %v1759_v58 = vld [vmem:[#allocation7 + $0x58] sm:$0xff] }
 0x18d   :  { %2943 = vrsqrt.f32 %v719_v10  ;;  %v657_v41 = vmul.f32 0.015625, %v551_v23  ;;  %2529 = vmatmul.mubr.f32.gmra.mxu0 %v980_v45  ;;  %v911_v11 = vmul.f32 %v3945_v21, %v841_v35  ;;  %2680 = vmatprep.subr.mxu1 %v4838_v18 }
 0x18e   :  { %v2938_v15 = vpop.eup %2937  ;;  %2531 = vmatprep.mubr.msk.f32.mxu0 %vm3317_vm1, %v4838_v18  ;;  %2681 = vmatpush3.msra.mxu1 %v1762_v63  ;;  %v1758_v63 = vld [vmem:[#allocation7 + $0x50] sm:$0xff] }
 0x18f   :  { %v720_v43 = vadd.f32 1e-05, %v657_v41  ;;  %v981_v25 = vadd.f32 %v3965_v38, %v911_v11  ;;  %v842_v46 = vmul.f32 %v2938_v15, %v4856_v33  ;;  %2682 = vmatprep.subr.mxu1 %v4838_v18  ;;  %v1761_v11 = vld [vmem:[#allocation7 + $0x68] sm:$0xff] }
 0x190   :  { %v553_v55 = vpop.xlane.xlu0 %552  ;;  %2683 = vmatpush3.msra.mxu1 %v1761_v11  ;;  %v4857_v33 = vld [vmem:[#allocation30_spill] sm:$0xff] }
 0x191   :  { %2945 = vrsqrt.f32 %v720_v43  ;;  %v658_v54 = vmul.f32 0.015625, %v553_v55  ;;  %2532 = vmatmul.mubr.f32.gmra.mxu0 %v981_v25  ;;  %v912_v44 = vmul.f32 %v3945_v21, %v842_v46  ;;  %v1760_v43 = vld [vmem:[#allocation7 + $0x60] sm:$0xff]  ;;  %2684 = vmatprep.subr.mxu1 %v4838_v18  ;;  %v1757_v11 = vld [vmem:[#allocation7 + $0x48] sm:$0xff] }
 0x192   :  { %v2940_v47 = vpop.eup %2939  ;;  %2534 = vmatprep.mubr.msk.f32.mxu0 %vm3317_vm1, %v4838_v18  ;;  %2685 = vmatpush3.msra.mxu1 %v1760_v43 }
 0x193   :  { %v721_v53 = vadd.f32 1e-05, %v658_v54  ;;  %v982_v10 = vadd.f32 %v3965_v38, %v912_v44  ;;  %v843_v45 = vmul.f32 %v2940_v47, %v3724_v7  ;;  %2686 = vmatprep.subr.mxu1 %v4838_v18 }
 0x194   :  { %v555_v35 = vpop.xlane.xlu0 %554  ;;  %2687 = vmatpush3.msra.mxu1 %v1759_v58 }
 0x195   :  { %2947 = vrsqrt.f32 %v721_v53  ;;  %v659_v23 = vmul.f32 0.015625, %v555_v35  ;;  %2535 = vmatmul.mubr.f32.gmra.mxu0 %v982_v10  ;;  %v913_v41 = vmul.f32 %v3945_v21, %v843_v45  ;;  %2688 = vmatprep.subr.mxu1 %v4838_v18 }
 0x196   :  { %v2942_v15 = vpop.eup %2941  ;;  %2537 = vmatprep.mubr.msk.f32.mxu0 %vm3317_vm1, %v4838_v18  ;;  %2689 = vmatpush3.msra.mxu1 %v1758_v63 }
 0x197   :  { %v722_v7 = vadd.f32 1e-05, %v659_v23  ;;  %v983_v25 = vadd.f32 %v3965_v38, %v913_v41  ;;  %v844_v46 = vmul.f32 %v2942_v15, %v4857_v33  ;;  %2690 = vmatprep.subr.mxu1 %v4838_v18 }
 0x198   :  { %v557_v55 = vpop.xlane.xlu0 %556  ;;  %2691 = vmatpush3.msra.mxu1 %v1757_v11 }
 0x199   :  { %2949 = vrsqrt.f32 %v722_v7  ;;  %v660_v54 = vmul.f32 0.015625, %v557_v55  ;;  %2538 = vmatmul.mubr.f32.gmra.mxu0 %v983_v25  ;;  %v914_v44 = vmul.f32 %v3945_v21, %v844_v46  ;;  %2692 = vmatprep.subr.mxu1 %v4838_v18  ;;  %v1756_v25 = vld [vmem:[#allocation7 + $0x40] sm:$0xff] }
 0x19a   :  { %v2944_v47 = vpop.eup %2943  ;;  %2540 = vmatprep.mubr.msk.f32.mxu0 %vm3317_vm1, %v4838_v18  ;;  %2693 = vmatpush3.msra.mxu1 %v1756_v25 }
 0x19b   :  { %v723_v53 = vadd.f32 1e-05, %v660_v54  ;;  %v984_v10 = vadd.f32 %v3965_v38, %v914_v44  ;;  %v845_v45 = vmul.f32 %v2944_v47, %v3744_v6  ;;  %2694 = vmatprep.subr.mxu1 %v4838_v18  ;;  %v1755_v54 = vld [vmem:[#allocation7 + $0x38] sm:$0xff]  ;;  %v4858_v47 = vld [vmem:[#allocation31_spill] sm:$0xff] }
 0x19c   :  { %v559_v35 = vpop.xlane.xlu0 %558  ;;  %2695 = vmatpush3.msra.mxu1 %v1755_v54 }
 0x19d   :  { %2951 = vrsqrt.f32 %v723_v53  ;;  %v661_v23 = vmul.f32 0.015625, %v559_v35  ;;  %2541 = vmatmul.mubr.f32.gmra.mxu0 %v984_v10  ;;  %v915_v41 = vmul.f32 %v3945_v21, %v845_v45  ;;  %2696 = vmatprep.subr.mxu1 %v4838_v18  ;;  %v1754_v10 = vld [vmem:[#allocation7 + $0x30] sm:$0xff] }
 0x19e   :  { %v2946_v15 = vpop.eup %2945  ;;  %2543 = vmatprep.mubr.msk.f32.mxu0 %vm3317_vm1, %v4838_v18  ;;  %2697 = vmatpush3.msra.mxu1 %v1754_v10  ;;  %v1749_v10 = vld [vmem:[#allocation7 + $0x8] sm:$0xff] }
 0x19f   :  { %v724_v43 = vadd.f32 1e-05, %v661_v23  ;;  %v985_v6 = vadd.f32 %v3965_v38, %v915_v41  ;;  %v846_v7 = vmul.f32 %v2946_v15, %v3752_v16  ;;  %2698 = vmatprep.subr.mxu1 %v4838_v18  ;;  %v1753_v23 = vld [vmem:[#allocation7 + $0x28] sm:$0xff] }
 0x1a0   :  { %v561_v33 = vpop.xlane.xlu0 %560  ;;  %2699 = vmatpush3.msra.mxu1 %v1753_v23  ;;  %v1748_v23 = vld [vmem:[#allocation7] sm:$0xff] }
 0x1a1   :  { %2953 = vrsqrt.f32 %v724_v43  ;;  %v662_v46 = vmul.f32 0.015625, %v561_v33  ;;  %2544 = vmatmul.mubr.f32.gmra.mxu0 %v985_v6  ;;  %v916_v55 = vmul.f32 %v3945_v21, %v846_v7  ;;  %2700 = vmatprep.subr.mxu1 %v4838_v18  ;;  %v1752_v6 = vld [vmem:[#allocation7 + $0x20] sm:$0xff] }
 0x1a2   :  { %v2948_v44 = vpop.eup %2947  ;;  %2546 = vmatprep.mubr.msk.f32.mxu0 %vm3317_vm1, %v4838_v18  ;;  %2701 = vmatpush3.msra.mxu1 %v1752_v6 }
 0x1a3   :  { %v725_v58 = vadd.f32 1e-05, %v662_v46  ;;  %v986_v16 = vadd.f32 %v3965_v38, %v916_v55  ;;  %v847_v53 = vmul.f32 %v2948_v44, %v4858_v47  ;;  %2702 = vmatprep.subr.mxu1 %v4838_v18  ;;  %v1751_v46 = vld [vmem:[#allocation7 + $0x18] sm:$0xff] }
 0x1a4   :  { %v563_v45 = vpop.xlane.xlu0 %562  ;;  %2703 = vmatpush3.msra.mxu1 %v1751_v46 }
 0x1a5   :  { %2955 = vrsqrt.f32 %v725_v58  ;;  %v663_v63 = vmul.f32 0.015625, %v563_v45  ;;  %2547 = vmatmul.mubr.f32.gmra.mxu0 %v986_v16  ;;  %v917_v35 = vmul.f32 %v3945_v21, %v847_v53  ;;  %2704 = vmatprep.subr.mxu1 %v4838_v18  ;;  %v1750_v58 = vld [vmem:[#allocation7 + $0x10] sm:$0xff] }
 0x1a6   :  { %v2950_v41 = vpop.eup %2949  ;;  %2549 = vmatprep.mubr.msk.f32.mxu0 %vm3317_vm1, %v4838_v18  ;;  %2705 = vmatpush3.msra.mxu1 %v1750_v58 }
 0x1a7   :  { %v726_v11 = vadd.f32 1e-05, %v663_v63  ;;  %v987_v15 = vadd.f32 %v3965_v38, %v917_v35  ;;  %v848_v43 = vmul.f32 %v2950_v41, %v3768_v4  ;;  %2706 = vmatprep.subr.mxu1 %v4838_v18 }
 0x1a8   :  { %v565_v7 = vpop.xlane.xlu0 %564  ;;  %2707 = vmatpush3.msra.mxu1 %v1749_v10 }
 0x1a9   :  { %2957 = vrsqrt.f32 %v726_v11  ;;  %v664_v25 = vmul.f32 0.015625, %v565_v7  ;;  %2550 = vmatmul.mubr.f32.gmra.mxu0 %v987_v15  ;;  %v918_v33 = vmul.f32 %v3945_v21, %v848_v43  ;;  %2708 = vmatprep.subr.mxu1 %v4838_v18 }
 0x1aa   :  { %v2952_v55 = vpop.eup %2951  ;;  %2552 = vmatprep.mubr.msk.f32.mxu0 %vm3317_vm1, %v4838_v18  ;;  %2709 = vmatpush3.msra.mxu1 %v1748_v23 }
 0x1ab   :  { %v727_v54 = vadd.f32 1e-05, %v664_v25  ;;  %v988_v4 = vadd.f32 %v3965_v38, %v918_v33  ;;  %v849_v44 = vmul.f32 %v2952_v55, %v3775_v56 }
 0x1ac   :  { %v567_v16 = vpop.xlane.xlu0 %566 }
 0x1ad   :  { %2959 = vrsqrt.f32 %v727_v54  ;;  %v665_v47 = vmul.f32 0.015625, %v567_v16  ;;  %2553 = vmatmul.mubr.f32.gmra.mxu0 %v988_v4  ;;  %v919_v53 = vmul.f32 %v3945_v21, %v849_v44 }
 0x1ae   :  { %v2954_v45 = vpop.eup %2953  ;;  %2555 = vmatprep.mubr.msk.f32.mxu0 %vm3317_vm1, %v4838_v18 }
 0x1af   :  { %v728_v63 = vadd.f32 1e-05, %v665_v47  ;;  %v989_v56 = vadd.f32 %v3965_v38, %v919_v53  ;;  %v850_v35 = vmul.f32 %v2954_v45, %v3782_v14 }
 0x1b0   :  { %v569_v41 = vpop.xlane.xlu0 %568 }
 0x1b1   :  { %2961 = vrsqrt.f32 %v728_v63  ;;  %v666_v11 = vmul.f32 0.015625, %v569_v41  ;;  %2556 = vmatmul.mubr.f32.gmra.mxu0 %v989_v56  ;;  %v920_v15 = vmul.f32 %v3945_v21, %v850_v35 }
 0x1b2   :  { %v2956_v43 = vpop.eup %2955  ;;  %2558 = vmatprep.mubr.msk.f32.mxu0 %vm3317_vm1, %v4838_v18 }
 0x1b3   :  { %v729_v6 = vadd.f32 1e-05, %v666_v11  ;;  %v990_v7 = vadd.f32 %v3965_v38, %v920_v15  ;;  %v851_v25 = vmul.f32 %v2956_v43, %v3789_v1 }
 0x1b4   :  { %v571_v14 = vpop.xlane.xlu0 %570 }
 0x1b5   :  { %2963 = vrsqrt.f32 %v729_v6  ;;  %v667_v33 = vmul.f32 0.015625, %v571_v14  ;;  %2559 = vmatmul.mubr.f32.gmra.mxu0 %v990_v7  ;;  %v921_v46 = vmul.f32 %v3945_v21, %v851_v25 }
 0x1b6   :  { %v2958_v55 = vpop.eup %2957  ;;  %2561 = vmatprep.mubr.msk.f32.mxu0 %vm3317_vm1, %v4838_v18 }
 0x1b7   :  { %v730_v54 = vadd.f32 1e-05, %v667_v33  ;;  %v991_v4 = vadd.f32 %v3965_v38, %v921_v46  ;;  %v852_v44 = vmul.f32 %v2958_v55, %v3796_v52 }
 0x1b8   :  { %v573_v58 = vpop.xlane.xlu0 %572 }
 0x1b9   :  { %2965 = vrsqrt.f32 %v730_v54  ;;  %v668_v16 = vmul.f32 0.015625, %v573_v58  ;;  %2562 = vmatmul.mubr.f32.gmra.mxu0 %v991_v4  ;;  %v922_v1 = vmul.f32 %v3945_v21, %v852_v44 }
 0x1ba   :  { %v2960_v47 = vpop.eup %2959  ;;  %2564 = vmatprep.mubr.msk.f32.mxu0 %vm3317_vm1, %v4838_v18 }
 0x1bb   :  { %v731_v53 = vadd.f32 1e-05, %v668_v16  ;;  %v992_v10 = vadd.f32 %v3965_v38, %v922_v1  ;;  %v853_v45 = vmul.f32 %v2960_v47, %v3803_v5 }
 0x1bc   :  { %v575_v63 = vpop.xlane.xlu0 %574 }
 0x1bd   :  { %2967 = vrsqrt.f32 %v731_v53  ;;  %v669_v56 = vmul.f32 0.015625, %v575_v63  ;;  %2565 = vmatmul.mubr.f32.gmra.mxu0 %v992_v10  ;;  %v923_v52 = vmul.f32 %v3945_v21, %v853_v45 }
 0x1be   :  { %v2962_v35 = vpop.eup %2961  ;;  %2567 = vmatprep.mubr.msk.f32.mxu0 %vm3317_vm1, %v4838_v18 }
 0x1bf   :  { %v732_v23 = vadd.f32 1e-05, %v669_v56  ;;  %v993_v41 = vadd.f32 %v3965_v38, %v923_v52  ;;  %v854_v11 = vmul.f32 %v2962_v35, %v3810_v50 }
 0x1c0   :  { %v577_v15 = vpop.xlane.xlu0 %576 }
 0x1c1   :  { %2969 = vrsqrt.f32 %v732_v23  ;;  %v670_v43 = vmul.f32 0.015625, %v577_v15  ;;  %2568 = vmatmul.mubr.f32.gmra.mxu0 %v993_v41  ;;  %v924_v5 = vmul.f32 %v3945_v21, %v854_v11 }
 0x1c2   :  { %v2964_v6 = vpop.eup %2963  ;;  %2570 = vmatprep.mubr.msk.f32.mxu0 %vm3317_vm1, %v4838_v18 }
 0x1c3   :  { %v733_v7 = vadd.f32 1e-05, %v670_v43  ;;  %v994_v25 = vadd.f32 %v3965_v38, %v924_v5  ;;  %v855_v14 = vmul.f32 %v2964_v6, %v3817_v17 }
 0x1c4   :  { %v579_v33 = vpop.xlane.xlu0 %578 }
 0x1c5   :  { %2971 = vrsqrt.f32 %v733_v7  ;;  %v671_v46 = vmul.f32 0.015625, %v579_v33  ;;  %2571 = vmatmul.mubr.f32.gmra.mxu0 %v994_v25  ;;  %v925_v50 = vmul.f32 %v3945_v21, %v855_v14 }
 0x1c6   :  { %v2966_v55 = vpop.eup %2965  ;;  %2573 = vmatprep.mubr.msk.f32.mxu0 %vm3317_vm1, %v4838_v18 }
 0x1c7   :  { %v734_v54 = vadd.f32 1e-05, %v671_v46  ;;  %v995_v4 = vadd.f32 %v3965_v38, %v925_v50  ;;  %v856_v44 = vmul.f32 %v2966_v55, %v3824_v48 }
 0x1c8   :  { %v581_v58 = vpop.xlane.xlu0 %580 }
 0x1c9   :  { %2973 = vrsqrt.f32 %v734_v54  ;;  %v672_v16 = vmul.f32 0.015625, %v581_v58  ;;  %2574 = vmatmul.mubr.f32.gmra.mxu0 %v995_v4  ;;  %v926_v17 = vmul.f32 %v3945_v21, %v856_v44 }
 0x1ca   :  { %v2968_v1 = vpop.eup %2967  ;;  %2576 = vmatprep.mubr.msk.f32.mxu0 %vm3317_vm1, %v4838_v18 }
 0x1cb   :  { %v735_v47 = vadd.f32 1e-05, %v672_v16  ;;  %v996_v53 = vadd.f32 %v3965_v38, %v926_v17  ;;  %v857_v10 = vmul.f32 %v2968_v1, %v3833_v62 }
 0x1cc   :  { %v583_v45 = vpop.xlane.xlu0 %582 }
 0x1cd   :  { %v673_v63 = vmul.f32 0.015625, %v583_v45  ;;  %2577 = vmatmul.mubr.f32.gmra.mxu0 %v996_v53  ;;  %v927_v48 = vmul.f32 %v3945_v21, %v857_v10  ;;  %2975 = vrsqrt.f32 %v735_v47 }
 0x1ce   :  { %v2970_v56 = vpop.eup %2969  ;;  %2579 = vmatprep.mubr.msk.f32.mxu0 %vm3317_vm1, %v4838_v18 }
 0x1cf   :  { %v736_v52 = vadd.f32 1e-05, %v673_v63  ;;  %v997_v35 = vadd.f32 %v3965_v38, %v927_v48  ;;  %v858_v23 = vmul.f32 %v2970_v56, %v3842_v57 }
 0x1d0   :  { %v585_v41 = vpop.xlane.xlu0 %584 }
 0x1d1   :  { %2977 = vrsqrt.f32 %v736_v52  ;;  %v674_v11 = vmul.f32 0.015625, %v585_v41  ;;  %2580 = vmatmul.mubr.f32.gmra.mxu0 %v997_v35  ;;  %v928_v62 = vmul.f32 %v3945_v21, %v858_v23 }
 0x1d2   :  { %v2972_v15 = vpop.eup %2971  ;;  %2582 = vmatprep.mubr.msk.f32.mxu0 %vm3317_vm1, %v4838_v18 }
 0x1d3   :  { %v737_v43 = vadd.f32 1e-05, %v674_v11  ;;  %v998_v5 = vadd.f32 %v3965_v38, %v928_v62  ;;  %v859_v6 = vmul.f32 %v2972_v15, %v3851_v9  ;;  %v601_v11 = vpop.xlane.xlu1 %600 }
 0x1d4   :  { %v587_v7 = vpop.xlane.xlu0 %586 }
 0x1d5   :  { %v675_v25 = vmul.f32 0.015625, %v587_v7  ;;  %2583 = vmatmul.mubr.f32.gmra.mxu0 %v998_v5  ;;  %v929_v57 = vmul.f32 %v3945_v21, %v859_v6  ;;  %2979 = vrsqrt.f32 %v737_v43  ;;  %v682_v5 = vmul.f32 0.015625, %v601_v11  ;;  %v4301_v6 = vld [vmem:[%s4786_s2] ss:$0 sm:$0xff] }
 0x1d6   :  { %v2974_v14 = vpop.eup %2973  ;;  %2585 = vmatprep.mubr.msk.f32.mxu0 %vm3317_vm1, %v4838_v18 }
 0x1d7   :  { %v738_v33 = vadd.f32 1e-05, %v675_v25  ;;  %v999_v46 = vadd.f32 %v3965_v38, %v929_v57  ;;  %v860_v50 = vmul.f32 %v2974_v14, %v3860_v13 }
 0x1d8   :  { %v589_v55 = vpop.xlane.xlu0 %588 }
 0x1d9   :  { %2981 = vrsqrt.f32 %v738_v33  ;;  %v676_v54 = vmul.f32 0.015625, %v589_v55  ;;  %2586 = vmatmul.mubr.f32.gmra.mxu0 %v999_v46  ;;  %v930_v9 = vmul.f32 %v3945_v21, %v860_v50  ;;  %v745_v46 = vadd.f32 1e-05, %v682_v5  ;;  %v605_v50 = vpop.xlane.xlu1 %604 }
 0x1da   :  { %2588 = vmatprep.mubr.msk.f32.mxu0 %vm3317_vm1, %v4838_v18  ;;  %v2976_v4 = vpop.eup %2975 }
 0x1db   :  { %v739_v44 = vadd.f32 1e-05, %v676_v54  ;;  %v1000_v58 = vadd.f32 %v3965_v38, %v930_v9  ;;  %v861_v17 = vmul.f32 %v2976_v4, %v3867_v31 }
 0x1dc   :  { %v591_v16 = vpop.xlane.xlu0 %590 }
 0x1dd   :  { %v677_v1 = vmul.f32 0.015625, %v591_v16  ;;  %2589 = vmatmul.mubr.f32.gmra.mxu0 %v1000_v58  ;;  %2983 = vrsqrt.f32 %v739_v44  ;;  %v931_v13 = vmul.f32 %v3945_v21, %v861_v17  ;;  %v684_v58 = vmul.f32 0.015625, %v605_v50  ;;  %v4859_v50 = vld [vmem:[#allocation32_spill] sm:$0xff] }
 0x1de   :  { %v2978_v47 = vpop.eup %2977  ;;  %2591 = vmatprep.mubr.msk.f32.mxu0 %vm3317_vm1, %v4838_v18 }
 0x1df   :  { %v740_v53 = vadd.f32 1e-05, %v677_v1  ;;  %v862_v10 = vmul.f32 %v2978_v47, %v3881_v22  ;;  %v1001_v63 = vadd.f32 %v3965_v38, %v931_v13 }
 0x1e0   :  { %v593_v45 = vpop.xlane.xlu0 %592 }
 0x1e1   :  { %2985 = vrsqrt.f32 %v740_v53  ;;  %v678_v48 = vmul.f32 0.015625, %v593_v45  ;;  %v932_v56 = vmul.f32 %v3945_v21, %v862_v10  ;;  %2592 = vmatmul.mubr.f32.gmra.mxu0 %v1001_v63  ;;  %v4292_v21 = vld [vmem:[%s4785_s1] ss:$0 sm:$0xff]  ;;  %v747_v10 = vadd.f32 1e-05, %v684_v58 }
 0x1e2   :  { %v2980_v31 = vpop.eup %2979  ;;  %2594 = vmatprep.mubr.msk.f32.mxu0 %vm3317_vm1, %v4838_v18 }
 0x1e3   :  { %v741_v52 = vadd.f32 1e-05, %v678_v48  ;;  %v1002_v35 = vadd.f32 %v3965_v38, %v932_v56  ;;  %v863_v41 = vmul.f32 %v2980_v31, %v3890_v20  ;;  %v609_v56 = vpop.xlane.xlu1 %608 }
 0x1e4   :  { %v595_v23 = vpop.xlane.xlu0 %594 }
 0x1e5   :  { %v679_v22 = vmul.f32 0.015625, %v595_v23  ;;  %2987 = vrsqrt.f32 %v741_v52  ;;  %2595 = vmatmul.mubr.f32.gmra.mxu0 %v1002_v35  ;;  %v933_v15 = vmul.f32 %v4292_v21, %v863_v41  ;;  %v686_v41 = vmul.f32 0.015625, %v609_v56 }
 0x1e6   :  { %v2982_v62 = vpop.eup %2981  ;;  %2597 = vmatprep.mubr.msk.f32.mxu0 %vm3317_vm1, %v4838_v18 }
 0x1e7   :  { %v742_v43 = vadd.f32 1e-05, %v679_v22  ;;  %v864_v38 = vmul.f32 %v2982_v62, %v3904_v19  ;;  %v1003_v7 = vadd.f32 %v4301_v6, %v933_v15  ;;  %v613_v5 = vpop.xlane.xlu1 %612 }
 0x1e8   :  { %v597_v20 = vpop.xlane.xlu0 %596 }
 0x1e9   :  { %2989 = vrsqrt.f32 %v742_v43  ;;  %v680_v25 = vmul.f32 0.015625, %v597_v20  ;;  %v934_v57 = vmul.f32 %v4292_v21, %v864_v38  ;;  %2598 = vmatmul.mubr.f32.gmra.mxu0 %v1003_v7  ;;  %v749_v38 = vadd.f32 1e-05, %v686_v41 }
 0x1ea   :  { %v2984_v14 = vpop.eup %2983  ;;  %2600 = vmatprep.mubr.msk.f32.mxu0 %vm3317_vm1, %v4838_v18 }
 0x1eb   :  { %v743_v33 = vadd.f32 1e-05, %v680_v25  ;;  %v1004_v19 = vadd.f32 %v4301_v6, %v934_v57  ;;  %v865_v54 = vmul.f32 %v2984_v14, %v3914_v36  ;;  %v688_v14 = vmul.f32 0.015625, %v613_v5 }
 0x1ec   :  { %v599_v55 = vpop.xlane.xlu0 %598 }
 0x1ed   :  { %v681_v9 = vmul.f32 0.015625, %v599_v55  ;;  %2991 = vrsqrt.f32 %v743_v33  ;;  %2601 = vmatmul.mubr.f32.gmra.mxu0 %v1004_v19  ;;  %v935_v44 = vmul.f32 %v4292_v21, %v865_v54 }
 0x1ee   :  { %v2986_v4 = vpop.eup %2985  ;;  %2603 = vmatprep.mubr.msk.f32.mxu0 %vm3317_vm1, %v4838_v18  ;;  %2993 = vrsqrt.f32 %v745_v46 }
 0x1ef   :  { %v744_v16 = vadd.f32 1e-05, %v681_v9  ;;  %v866_v17 = vmul.f32 %v2986_v4, %v3923_v39  ;;  %v1005_v47 = vadd.f32 %v4301_v6, %v935_v44  ;;  %v751_v4 = vadd.f32 1e-05, %v688_v14 }
 0x1f0   :  { %v603_v1 = vpop.xlane.xlu0 %602 }
 0x1f1   :  { %2995 = vrsqrt.f32 %v744_v16  ;;  %v683_v13 = vmul.f32 0.015625, %v603_v1  ;;  %v936_v36 = vmul.f32 %v4292_v21, %v866_v17  ;;  %2604 = vmatmul.mubr.f32.gmra.mxu0 %v1005_v47  ;;  %v617_v16 = vpop.xlane.xlu1 %616 }
 0x1f2   :  { %v2988_v53 = vpop.eup %2987  ;;  %2606 = vmatprep.mubr.msk.f32.mxu0 %vm3317_vm1, %v4838_v18  ;;  %v690_v47 = vmul.f32 0.015625, %v617_v16 }
 0x1f3   :  { %v746_v45 = vadd.f32 1e-05, %v683_v13  ;;  %v1006_v63 = vadd.f32 %v4301_v6, %v936_v36  ;;  %v867_v39 = vmul.f32 %v2988_v53, %v3937_v40 }
 0x1f4   :  { %v607_v48 = vpop.xlane.xlu0 %606 }
 0x1f5   :  { %v685_v31 = vmul.f32 0.015625, %v607_v48  ;;  %2997 = vrsqrt.f32 %v746_v45  ;;  %2607 = vmatmul.mubr.f32.gmra.mxu0 %v1006_v63  ;;  %v937_v35 = vmul.f32 %v4292_v21, %v867_v39  ;;  %v753_v48 = vadd.f32 1e-05, %v690_v47  ;;  %v621_v39 = vpop.xlane.xlu1 %620 }
 0x1f6   :  { %v2990_v52 = vpop.eup %2989  ;;  %2999 = vrsqrt.f32 %v747_v10  ;;  %2609 = vmatprep.mubr.msk.f32.mxu0 %vm3317_vm1, %v4838_v18 }
 0x1f7   :  { %v868_v23 = vmul.f32 %v2990_v52, %v3954_v26  ;;  %v748_v11 = vadd.f32 1e-05, %v685_v31  ;;  %v1007_v22 = vadd.f32 %v4301_v6, %v937_v35  ;;  %v692_v35 = vmul.f32 0.015625, %v621_v39 }
 0x1f8   :  { %v611_v62 = vpop.xlane.xlu0 %610 }
 0x1f9   :  { %v938_v40 = vmul.f32 %v4292_v21, %v868_v23  ;;  %2610 = vmatmul.mubr.f32.gmra.mxu0 %v1007_v22  ;;  %3001 = vrsqrt.f32 %v748_v11  ;;  %v687_v20 = vmul.f32 0.015625, %v611_v62 }
 0x1fa   :  { %v2992_v15 = vpop.eup %2991  ;;  %2612 = vmatprep.mubr.msk.f32.mxu0 %vm3317_vm1, %v4838_v18  ;;  %3003 = vrsqrt.f32 %v749_v38 }
 0x1fb   :  { %v1008_v43 = vadd.f32 %v4301_v6, %v938_v40  ;;  %v869_v26 = vmul.f32 %v2992_v15, %v3976_v34  ;;  %v2994_v7 = vpop.eup %2993  ;;  %v750_v19 = vadd.f32 1e-05, %v687_v20  ;;  %v755_v15 = vadd.f32 1e-05, %v692_v35 }
 0x1fc   :  { %v871_v55 = vmul.f32 %v2994_v7, %v4859_v50  ;;  %v615_v54 = vpop.xlane.xlu0 %614 }
 0x1fd   :  { %2613 = vmatmul.mubr.f32.gmra.mxu0 %v1008_v43  ;;  %v939_v57 = vmul.f32 %v4292_v21, %v869_v26  ;;  %3005 = vrsqrt.f32 %v750_v19  ;;  %v625_v43 = vpop.xlane.xlu1 %624 }
 0x1fe   :  { %v2996_v25 = vpop.eup %2995  ;;  %2615 = vmatprep.mubr.msk.f32.mxu0 %vm3317_vm1, %v4838_v18  ;;  %v941_v17 = vmul.f32 %v4292_v21, %v871_v55  ;;  %3007 = vrsqrt.f32 %v751_v4  ;;  %v694_v7 = vmul.f32 0.015625, %v625_v43 }
 0x1ff   :  { %v870_v33 = vmul.f32 %v2996_v25, %v3992_v42  ;;  %v1009_v46 = vadd.f32 %v4301_v6, %v939_v57  ;;  %v689_v42 = vmul.f32 0.015625, %v615_v54  ;;  %v4366_v25 = vld [vmem:[%s4788_s4] ss:$0 sm:$0xff]  ;;  %v4860_v57 = vld [vmem:[#allocation33_spill] sm:$0xff] }
 0x200   :  { %v1011_v53 = vadd.f32 %v4301_v6, %v941_v17  ;;  %v619_v63 = vpop.xlane.xlu0 %618 }
 0x201   :  { %v940_v34 = vmul.f32 %v4292_v21, %v870_v33  ;;  %2616 = vmatmul.mubr.f32.gmra.mxu0 %v1009_v46  ;;  %v752_v36 = vadd.f32 1e-05, %v689_v42  ;;  %v691_v56 = vmul.f32 0.015625, %v619_v63 }
 0x202   :  { %v2998_v9 = vpop.eup %2997  ;;  %2618 = vmatprep.mubr.msk.f32.mxu0 %vm3317_vm1, %v4838_v18 }
 0x203   :  { %v1010_v44 = vadd.f32 %v4301_v6, %v940_v34  ;;  %v3000_v58 = vpop.eup %2999  ;;  %v872_v1 = vmul.f32 %v2998_v9, %v4011_v59  ;;  %3009 = vrsqrt.f32 %v752_v36  ;;  %v754_v23 = vadd.f32 1e-05, %v691_v56 }
 0x204   :  { %v873_v13 = vmul.f32 %v3000_v58, %v3900_v24  ;;  %3011 = vrsqrt.f32 %v753_v48  ;;  %v623_v41 = vpop.xlane.xlu0 %622 }
 0x205   :  { %2619 = vmatmul.mubr.f32.gmra.mxu0 %v1010_v44  ;;  %v942_v10 = vmul.f32 %v4292_v21, %v872_v1  ;;  %3013 = vrsqrt.f32 %v754_v23  ;;  %v629_v44 = vpop.xlane.xlu1 %628 }
 0x206   :  { %2621 = vmatprep.mubr.msk.f32.mxu0 %vm3317_vm1, %v4838_v18  ;;  %v3002_v45 = vpop.eup %3001  ;;  %v943_v59 = vmul.f32 %v4292_v21, %v873_v13  ;;  %3015 = vrsqrt.f32 %v755_v15  ;;  %v696_v13 = vmul.f32 0.015625, %v629_v44 }
 0x207   :  { %v1012_v31 = vadd.f32 %v4301_v6, %v942_v10  ;;  %v874_v24 = vmul.f32 %v3002_v45, %v4025_v28  ;;  %v3004_v52 = vpop.eup %3003  ;;  %v693_v28 = vmul.f32 0.015625, %v623_v41 }
 0x208   :  { %v1013_v11 = vadd.f32 %v4301_v6, %v943_v59  ;;  %v875_v62 = vmul.f32 %v3004_v52, %v3929_v37  ;;  %v627_v50 = vpop.xlane.xlu0 %626 }
 0x209   :  { %2622 = vmatmul.mubr.f32.gmra.mxu0 %v1011_v53  ;;  %v944_v22 = vmul.f32 %v4292_v21, %v874_v24  ;;  %v756_v37 = vadd.f32 1e-05, %v693_v28  ;;  %v695_v58 = vmul.f32 0.015625, %v627_v50  ;;  %v759_v24 = vadd.f32 1e-05, %v696_v13  ;;  %v633_v23 = vpop.xlane.xlu1 %632 }
 0x20a   :  { %2624 = vmatprep.mubr.msk.f32.mxu0 %vm3317_vm1, %v4838_v18  ;;  %v3006_v40 = vpop.eup %3005  ;;  %v945_v20 = vmul.f32 %v4292_v21, %v875_v62  ;;  %v698_v43 = vmul.f32 0.015625, %v633_v23 }
 0x20b   :  { %v3008_v38 = vpop.eup %3007  ;;  %v1014_v5 = vadd.f32 %v4301_v6, %v944_v22  ;;  %v876_v26 = vmul.f32 %v3006_v40, %v4044_v8  ;;  %v757_v8 = vadd.f32 1e-05, %v694_v7  ;;  %3017 = vrsqrt.f32 %v756_v37 }
 0x20c   :  { %v877_v14 = vmul.f32 %v3008_v38, %v4860_v57  ;;  %v1015_v33 = vadd.f32 %v4301_v6, %v945_v20  ;;  %v758_v10 = vadd.f32 1e-05, %v695_v58  ;;  %v631_v45 = vpop.xlane.xlu0 %630 }
 0x20d   :  { %2625 = vmatmul.mubr.f32.gmra.mxu0 %v1012_v31  ;;  %v946_v19 = vmul.f32 %v4292_v21, %v876_v26  ;;  %3019 = vrsqrt.f32 %v757_v8  ;;  %v697_v52 = vmul.f32 0.015625, %v631_v45 }
 0x20e   :  { %2627 = vmatprep.mubr.msk.f32.mxu0 %vm3317_vm1, %v4838_v18  ;;  %v947_v9 = vmul.f32 %v4292_v21, %v877_v14 }
 0x20f   :  { %v1016_v42 = vadd.f32 %v4301_v6, %v946_v19  ;;  %v760_v28 = vadd.f32 1e-05, %v697_v52  ;;  %v761_v19 = vadd.f32 1e-05, %v698_v43 }
 0x210   :  { %v3010_v46 = vpop.eup %3009  ;;  %v635_v20 = vpop.xlane.xlu0 %634 }
 0x211   :  { %2628 = vmatmul.mubr.f32.gmra.mxu0 %v1013_v11  ;;  %v3012_v4 = vpop.eup %3011  ;;  %v878_v17 = vmul.f32 %v3010_v46, %v4058_v12  ;;  %v1017_v12 = vadd.f32 %v4301_v6, %v947_v9  ;;  %v699_v46 = vmul.f32 0.015625, %v635_v20 }
 0x212   :  { %2630 = vmatprep.mubr.msk.f32.mxu0 %vm3317_vm1, %v4838_v18  ;;  %v879_v53 = vmul.f32 %v3012_v4, %v3998_v29  ;;  %v3014_v39 = vpop.eup %3013 }
 0x213   :  { %v948_v48 = vmul.f32 %v4292_v21, %v878_v17  ;;  %v3016_v31 = vpop.eup %3015  ;;  %v880_v22 = vmul.f32 %v3014_v39, %v4076_v30  ;;  %v762_v13 = vadd.f32 1e-05, %v699_v46 }
 0x214   :  { %v949_v29 = vmul.f32 %v4292_v21, %v879_v53  ;;  %v881_v15 = vmul.f32 %v3016_v31, %v4031_v32 }
 0x215   :  { %2631 = vmatmul.mubr.f32.gmra.mxu0 %v1014_v5  ;;  %v1018_v11 = vadd.f32 %v4301_v6, %v948_v48  ;;  %v950_v7 = vmul.f32 %v4292_v21, %v880_v22 }
 0x216   :  { %2633 = vmatprep.mubr.msk.f32.mxu0 %vm3317_vm1, %v4838_v18  ;;  %v1019_v30 = vadd.f32 %v4301_v6, %v949_v29  ;;  %v951_v14 = vmul.f32 %v4292_v21, %v881_v15 }
 0x217   :  { %v1020_v4 = vadd.f32 %v4301_v6, %v950_v7 }
 0x218   :  { %v3018_v5 = vpop.eup %3017  ;;  %v1021_v45 = vadd.f32 %v4301_v6, %v951_v14 }
 0x219   :  { %v1119_v55 = vpop.f32.mrf.mxu0  ;;  %2634 = vmatmul.mubr.f32.gmra.mxu0 %v1015_v33  ;;  %v882_v50 = vmul.f32 %v3018_v5, %v4089_v3 }
 0x21a   :  { %v4372_v54 = vadd.f32 %v4366_v25, %v1119_v55  ;;  %2636 = vmatprep.mubr.msk.f32.mxu0 %vm3317_vm1, %v4838_v18  ;;  %v3020_v57 = vpop.eup %3019  ;;  %v637_v55 = vpop.xlane.xlu1 %636 }
 0x21b   :  { %v2491_v34 = vpop.f32.mrf.mxu0  ;;  %v883_v17 = vmul.f32 %v3020_v57, %v4063_v51  ;;  %v700_v3 = vmul.f32 0.015625, %v637_v55 }
 0x21c   :  { %v1496_v16 = vmul.f32 0.70710677, %v4372_v54  ;;  %v1433_v34 = vmul.f32 0.5, %v4372_v54  ;;  %v952_v54 = vmul.f32 %v4292_v21, %v882_v50 }
 0x21d   :  { %v1124_v1 = vpop.f32.mrf.mxu0  ;;  %2637 = vmatmul.mubr.f32.gmra.mxu0 %v1016_v42  ;;  %v763_v31 = vadd.f32 1e-05, %v700_v3  ;;  %v953_v52 = vmul.f32 %v4292_v21, %v883_v17 }
 0x21e   :  { %3021 = verf.f32 %v1496_v16  ;;  %v4381_v47 = vadd.f32 %v4366_v25, %v1124_v1  ;;  %2639 = vmatprep.mubr.msk.f32.mxu0 %vm3317_vm1, %v4838_v18 }
 0x21f   :  { %v2494_v36 = vpop.f32.mrf.mxu0 }
 0x220   :  { %v1497_v63 = vmul.f32 0.70710677, %v4381_v47  ;;  %v1434_v53 = vmul.f32 0.5, %v4381_v47 }
 0x221   :  { %v1129_v59 = vpop.f32.mrf.mxu0  ;;  %2640 = vmatmul.mubr.f32.gmra.mxu0 %v1017_v12 }
 0x222   :  { %3023 = verf.f32 %v1497_v63  ;;  %v4390_v56 = vadd.f32 %v4366_v25, %v1129_v59  ;;  %2642 = vmatprep.mubr.msk.f32.mxu0 %vm3317_vm1, %v4838_v18 }
 0x223   :  { %v2497_v35 = vpop.f32.mrf.mxu0  ;;  %3025 = vrsqrt.f32 %v758_v10 }
 0x224   :  { %v1498_v41 = vmul.f32 0.70710677, %v4390_v56  ;;  %v1435_v29 = vmul.f32 0.5, %v4390_v56  ;;  %v1023_v56 = vadd.f32 %v4301_v6, %v953_v52 }
 0x225   :  { %v1134_v62 = vpop.f32.mrf.mxu0  ;;  %2643 = vmatmul.mubr.f32.gmra.mxu0 %v1018_v11 }
 0x226   :  { %3027 = verf.f32 %v1498_v41  ;;  %v4399_v40 = vadd.f32 %v4366_v25, %v1134_v62  ;;  %2645 = vmatprep.mubr.msk.f32.mxu0 %vm3317_vm1, %v4838_v18 }
 0x227   :  { %3029 = vrsqrt.f32 %v759_v24  ;;  %v2500_v38 = vpop.f32.mrf.mxu0  ;;  %v1022_v24 = vadd.f32 %v4301_v6, %v952_v54 }
 0x228   :  { %v1499_v26 = vmul.f32 0.70710677, %v4399_v40  ;;  %v1436_v5 = vmul.f32 0.5, %v4399_v40 }
 0x229   :  { %v1139_v37 = vpop.f32.mrf.mxu0  ;;  %2646 = vmatmul.mubr.f32.gmra.mxu0 %v1019_v30 }
 0x22a   :  { %3031 = verf.f32 %v1499_v26  ;;  %v4408_v32 = vadd.f32 %v4366_v25, %v1139_v37  ;;  %2648 = vmatprep.mubr.msk.f32.mxu0 %vm3317_vm1, %v4838_v18 }
 0x22b   :  { %v3022_v33 = vpop.eup %3021  ;;  %3033 = vrsqrt.f32 %v760_v28  ;;  %v2503_v8 = vpop.f32.mrf.mxu0 }
 0x22c   :  { %v1500_v9 = vmul.f32 0.70710677, %v4408_v32  ;;  %v1622_v44 = vadd.f32 1.0, %v3022_v33  ;;  %v1437_v46 = vmul.f32 0.5, %v4408_v32 }
 0x22d   :  { %v1144_v58 = vpop.f32.mrf.mxu0  ;;  %2649 = vmatmul.mubr.f32.gmra.mxu0 %v1020_v4 }
 0x22e   :  { %3035 = verf.f32 %v1500_v9  ;;  %v4418_v16 = vadd.f32 %v4366_v25, %v1144_v58  ;;  %v1685_v42 = vmul.f32 %v1622_v44, %v1433_v34  ;;  %2651 = vmatprep.mubr.msk.f32.mxu0 %vm3317_vm1, %v4838_v18 }
 0x22f   :  { %v3024_v1 = vpop.eup %3023  ;;  %3037 = vrsqrt.f32 %v761_v19  ;;  %v2506_v36 = vpop.f32.mrf.mxu0 }
 0x230   :  { %v1501_v10 = vmul.f32 0.70710677, %v4418_v16  ;;  %2711 = vmatmul.mubr.f32.vlgmr.msra.gmra.mxu1 %v1685_v42  ;;  %v1623_v63 = vadd.f32 1.0, %v3024_v1  ;;  %v3026_v12 = vpop.eup %3025  ;;  %v1438_v17 = vmul.f32 0.5, %v4418_v16 }
 0x231   :  { %v1149_v51 = vpop.f32.mrf.mxu0  ;;  %2713 = vmatprep.mubr.msk.f32.mxu1 %vm3317_vm1, %v4838_v18  ;;  %2652 = vmatmul.mubr.f32.gmra.mxu0 %v1021_v45  ;;  %v884_v11 = vmul.f32 %v3026_v12, %v4107_v49 }
 0x232   :  { %3039 = verf.f32 %v1501_v10  ;;  %v4430_v48 = vadd.f32 %v4366_v25, %v1149_v51  ;;  %v1686_v39 = vmul.f32 %v1623_v63, %v1434_v53  ;;  %2654 = vmatprep.mubr.msk.f32.mxu0 %vm3317_vm1, %v4838_v18 }
 0x233   :  { %v3028_v59 = vpop.eup %3027  ;;  %3041 = vrsqrt.f32 %v762_v13  ;;  %v2509_v47 = vpop.f32.mrf.mxu0  ;;  %v954_v30 = vmul.f32 %v4292_v21, %v884_v11 }
 0x234   :  { %v3030_v35 = vpop.eup %3029  ;;  %v1502_v23 = vmul.f32 0.70710677, %v4430_v48  ;;  %2714 = vmatmul.mubr.f32.gmra.mxu1 %v1686_v39  ;;  %v1624_v41 = vadd.f32 1.0, %v3028_v59  ;;  %v1439_v12 = vmul.f32 0.5, %v4430_v48 }
 0x235   :  { %v1154_v22 = vpop.f32.mrf.mxu0  ;;  %2716 = vmatprep.mubr.msk.f32.mxu1 %vm3317_vm1, %v4838_v18  ;;  %2655 = vmatmul.mubr.f32.gmra.mxu0 %v1022_v24  ;;  %v885_v49 = vmul.f32 %v3030_v35, %v4094_v60  ;;  %v1024_v50 = vadd.f32 %v4301_v6, %v954_v30 }
 0x236   :  { %3043 = verf.f32 %v1502_v23  ;;  %v4442_v62 = vadd.f32 %v4366_v25, %v1154_v22  ;;  %v1687_v15 = vmul.f32 %v1624_v41, %v1435_v29  ;;  %2657 = vmatprep.mubr.msk.f32.mxu0 %vm3317_vm1, %v4838_v18 }
 0x237   :  { %v3032_v43 = vpop.eup %3031  ;;  %3045 = vrsqrt.f32 %v763_v31  ;;  %v2512_v28 = vpop.f32.mrf.mxu0  ;;  %v955_v40 = vmul.f32 %v4292_v21, %v885_v49 }
 0x238   :  { %v3034_v38 = vpop.eup %3033  ;;  %v1503_v20 = vmul.f32 0.70710677, %v4442_v62  ;;  %2717 = vmatmul.mubr.f32.gmra.mxu1 %v1687_v15  ;;  %v1625_v26 = vadd.f32 1.0, %v3032_v43 }
 0x239   :  { %v1159_v7 = vpop.f32.mrf.mxu0  ;;  %2719 = vmatprep.mubr.msk.f32.mxu1 %vm3317_vm1, %v4838_v18  ;;  %2658 = vmatmul.mubr.f32.gmra.mxu0 %v1023_v56  ;;  %v886_v33 = vmul.f32 %v3034_v38, %v4120_v0  ;;  %v1025_v3 = vadd.f32 %v4301_v6, %v955_v40 }
 0x23a   :  { %3047 = verf.f32 %v1503_v20  ;;  %v4454_v37 = vadd.f32 %v4366_v25, %v1159_v7  ;;  %v1688_v57 = vmul.f32 %v1625_v26, %v1436_v5  ;;  %2660 = vmatprep.mubr.msk.f32.mxu0 %vm3317_vm1, %v4838_v18 }
 0x23b   :  { %v3036_v60 = vpop.eup %3035  ;;  %v2515_v14 = vpop.f32.mrf.mxu0  ;;  %v956_v32 = vmul.f32 %v4292_v21, %v886_v33 }
 0x23c   :  { %v3038_v19 = vpop.eup %3037  ;;  %v1504_v8 = vmul.f32 0.70710677, %v4454_v37  ;;  %2720 = vmatmul.mubr.f32.gmra.mxu1 %v1688_v57  ;;  %v1626_v55 = vadd.f32 1.0, %v3036_v60 }
 0x23d   :  { %v1164_v34 = vpop.f32.mrf.mxu0  ;;  %2722 = vmatprep.mubr.msk.f32.mxu1 %vm3317_vm1, %v4838_v18  ;;  %2661 = vmatmul.mubr.f32.gmra.mxu0 %v1024_v50  ;;  %v887_v58 = vmul.f32 %v3038_v19, %v4124_v61  ;;  %v1026_v16 = vadd.f32 %v4301_v6, %v956_v32 }
 0x23e   :  { %3049 = verf.f32 %v1504_v8  ;;  %v4466_v9 = vadd.f32 %v4366_v25, %v1164_v34  ;;  %v1689_v4 = vmul.f32 %v1626_v55, %v1437_v46  ;;  %2663 = vmatprep.mubr.msk.f32.mxu0 %vm3317_vm1, %v4838_v18 }
 0x23f   :  { %v3040_v0 = vpop.eup %3039  ;;  %v2518_v44 = vpop.f32.mrf.mxu0  ;;  %v957_v45 = vmul.f32 %v4292_v21, %v887_v58 }
 0x240   :  { %v3042_v42 = vpop.eup %3041  ;;  %v1505_v1 = vmul.f32 0.70710677, %v4466_v9  ;;  %2723 = vmatmul.mubr.f32.gmra.mxu1 %v1689_v4  ;;  %v1627_v13 = vadd.f32 1.0, %v3040_v0 }
 0x241   :  { %v1169_v36 = vpop.f32.mrf.mxu0  ;;  %2725 = vmatprep.mubr.msk.f32.mxu1 %vm3317_vm1, %v4838_v18  ;;  %2664 = vmatmul.mubr.f32.gmra.mxu0 %v1025_v3  ;;  %v888_v59 = vmul.f32 %v3042_v42, %v4138_v2  ;;  %v1027_v48 = vadd.f32 %v4301_v6, %v957_v45  ;;  %v1440_v2 = vmul.f32 0.5, %v4442_v62  ;;  %v1441_v62 = vmul.f32 0.5, %v4454_v37 }
 0x242   :  { %3051 = verf.f32 %v1505_v1  ;;  %v4478_v54 = vadd.f32 %v4366_v25, %v1169_v36  ;;  %v1690_v53 = vmul.f32 %v1627_v13, %v1438_v17  ;;  %2666 = vmatprep.mubr.msk.f32.mxu0 %vm3317_vm1, %v4838_v18 }
 0x243   :  { %v3044_v61 = vpop.eup %3043  ;;  %v2521_v10 = vpop.f32.mrf.mxu0  ;;  %v958_v11 = vmul.f32 %v4292_v21, %v888_v59 }
 0x244   :  { %v3046_v63 = vpop.eup %3045  ;;  %v1506_v51 = vmul.f32 0.70710677, %v4478_v54  ;;  %2726 = vmatmul.mubr.f32.gmra.mxu1 %v1690_v53  ;;  %v1628_v39 = vadd.f32 1.0, %v3044_v61  ;;  %v1443_v50 = vmul.f32 0.5, %v4478_v54 }
 0x245   :  { %v1174_v31 = vpop.f32.mrf.mxu0  ;;  %2728 = vmatprep.mubr.msk.f32.mxu1 %vm3317_vm1, %v4838_v18  ;;  %2667 = vmatmul.mubr.f32.gmra.mxu0 %v1026_v16  ;;  %v889_v29 = vmul.f32 %v3046_v63, %v4150_v27  ;;  %v1028_v38 = vadd.f32 %v4301_v6, %v958_v11 }
 0x246   :  { %3053 = verf.f32 %v1506_v51  ;;  %v1175_v47 = vadd.f32 %v4366_v25, %v1174_v31  ;;  %v1691_v24 = vmul.f32 %v1628_v39, %v1439_v12  ;;  %2669 = vmatprep.mubr.msk.f32.mxu0 %vm3317_vm1, %v4838_v18 }
 0x247   :  { %v3048_v52 = vpop.eup %3047  ;;  %v2524_v35 = vpop.f32.mrf.mxu0  ;;  %v959_v27 = vmul.f32 %v4292_v21, %v889_v29  ;;  %v1442_v21 = vmul.f32 0.5, %v4466_v9 }
 0x248   :  { %v1507_v23 = vmul.f32 0.70710677, %v1175_v47  ;;  %2729 = vmatmul.mubr.f32.gmra.mxu1 %v1691_v24  ;;  %v1629_v41 = vadd.f32 1.0, %v3048_v52  ;;  %v1444_v32 = vmul.f32 0.5, %v1175_v47 }
 0x249   :  { %v1179_v22 = vpop.f32.mrf.mxu0  ;;  %2731 = vmatprep.mubr.msk.f32.mxu1 %vm3317_vm1, %v4838_v18  ;;  %2670 = vmatmul.mubr.f32.gmra.mxu0 %v1027_v48  ;;  %v1029_v60 = vadd.f32 %v4301_v6, %v959_v27 }
 0x24a   :  { %3055 = verf.f32 %v1507_v23  ;;  %v1180_v15 = vadd.f32 %v4366_v25, %v1179_v22  ;;  %v1692_v43 = vmul.f32 %v1629_v41, %v1440_v2  ;;  %2672 = vmatprep.mubr.msk.f32.mxu0 %vm3317_vm1, %v4838_v18 }
 0x24b   :  { %v3050_v28 = vpop.eup %3049  ;;  %v2527_v56 = vpop.f32.mrf.mxu0 }
 0x24c   :  { %v1508_v49 = vmul.f32 0.70710677, %v1180_v15  ;;  %2732 = vmatmul.mubr.f32.gmra.mxu1 %v1692_v43  ;;  %v1630_v5 = vadd.f32 1.0, %v3050_v28  ;;  %v1445_v54 = vmul.f32 0.5, %v1180_v15 }
 0x24d   :  { %v1184_v20 = vpop.f32.mrf.mxu0  ;;  %2734 = vmatprep.mubr.msk.f32.mxu1 %vm3317_vm1, %v4838_v18  ;;  %2673 = vmatmul.mubr.f32.gmra.mxu0 %v1028_v38 }
 0x24e   :  { %3057 = verf.f32 %v1508_v49  ;;  %v1185_v26 = vadd.f32 %v4366_v25, %v1184_v20  ;;  %v1693_v30 = vmul.f32 %v1630_v5, %v1441_v62  ;;  %2675 = vmatprep.mubr.msk.f32.mxu0 %vm3317_vm1, %v4838_v18 }
 0x24f   :  { %v3052_v7 = vpop.eup %3051  ;;  %v2530_v57 = vpop.f32.mrf.mxu0 }
 0x250   :  { %v1509_v37 = vmul.f32 0.70710677, %v1185_v26  ;;  %2735 = vmatmul.mubr.f32.gmra.mxu1 %v1693_v30  ;;  %v1631_v14 = vadd.f32 1.0, %v3052_v7  ;;  %v1446_v51 = vmul.f32 0.5, %v1185_v26 }
 0x251   :  { %v1189_v40 = vpop.f32.mrf.mxu0  ;;  %2737 = vmatprep.mubr.msk.f32.mxu1 %vm3317_vm1, %v4838_v18  ;;  %2676 = vmatmul.mubr.f32.gmra.mxu0 %v1029_v60 }
 0x252   :  { %3059 = verf.f32 %v1509_v37  ;;  %v1190_v33 = vadd.f32 %v4366_v25, %v1189_v40  ;;  %v1694_v19 = vmul.f32 %v1631_v14, %v1442_v21 }
 0x253   :  { %v3054_v46 = vpop.eup %3053  ;;  %v2533_v8 = vpop.f32.mrf.mxu0 }
 0x254   :  { %v1510_v55 = vmul.f32 0.70710677, %v1190_v33  ;;  %2738 = vmatmul.mubr.f32.gmra.mxu1 %v1694_v19  ;;  %v1632_v34 = vadd.f32 1.0, %v3054_v46  ;;  %v1447_v48 = vmul.f32 0.5, %v1190_v33 }
 0x255   :  { %v1194_v9 = vpop.f32.mrf.mxu0  ;;  %2740 = vmatprep.mubr.msk.f32.mxu1 %vm3317_vm1, %v4838_v18 }
 0x256   :  { %3061 = verf.f32 %v1510_v55  ;;  %v1195_v6 = vadd.f32 %v4366_v25, %v1194_v9  ;;  %v1695_v4 = vmul.f32 %v1632_v34, %v1443_v50 }
 0x257   :  { %v3056_v0 = vpop.eup %3055  ;;  %v2536_v44 = vpop.f32.mrf.mxu0 }
 0x258   :  { %v1511_v58 = vmul.f32 0.70710677, %v1195_v6  ;;  %2741 = vmatmul.mubr.f32.gmra.mxu1 %v1695_v4  ;;  %v1633_v42 = vadd.f32 1.0, %v3056_v0  ;;  %v1448_v43 = vmul.f32 0.5, %v1195_v6 }
 0x259   :  { %v1199_v17 = vpop.f32.mrf.mxu0  ;;  %2743 = vmatprep.mubr.msk.f32.mxu1 %vm3317_vm1, %v4838_v18 }
 0x25a   :  { %3063 = verf.f32 %v1511_v58  ;;  %v1200_v1 = vadd.f32 %v4366_v25, %v1199_v17  ;;  %v1696_v3 = vmul.f32 %v1633_v42, %v1444_v32 }
 0x25b   :  { %v3058_v13 = vpop.eup %3057  ;;  %v2539_v36 = vpop.f32.mrf.mxu0 }
 0x25c   :  { %v1512_v53 = vmul.f32 0.70710677, %v1200_v1  ;;  %2744 = vmatmul.mubr.f32.gmra.mxu1 %v1696_v3  ;;  %v1634_v61 = vadd.f32 1.0, %v3058_v13  ;;  %v1449_v20 = vmul.f32 0.5, %v1200_v1 }
 0x25d   :  { %v1204_v10 = vpop.f32.mrf.mxu0  ;;  %2746 = vmatprep.mubr.msk.f32.mxu1 %vm3317_vm1, %v4838_v18 }
 0x25e   :  { %3065 = verf.f32 %v1512_v53  ;;  %v1205_v16 = vadd.f32 %v4366_v25, %v1204_v10  ;;  %v1697_v45 = vmul.f32 %v1634_v61, %v1445_v54 }
 0x25f   :  { %v3060_v63 = vpop.eup %3059  ;;  %v2542_v12 = vpop.f32.mrf.mxu0 }
 0x260   :  { %v1513_v39 = vmul.f32 0.70710677, %v1205_v16  ;;  %2747 = vmatmul.mubr.f32.gmra.mxu1 %v1697_v45  ;;  %v1635_v59 = vadd.f32 1.0, %v3060_v63  ;;  %v1450_v14 = vmul.f32 0.5, %v1205_v16 }
 0x261   :  { %v1209_v31 = vpop.f32.mrf.mxu0  ;;  %2749 = vmatprep.mubr.msk.f32.mxu1 %vm3317_vm1, %v4838_v18 }
 0x262   :  { %3067 = verf.f32 %v1513_v39  ;;  %v1210_v47 = vadd.f32 %v4366_v25, %v1209_v31  ;;  %v1698_v24 = vmul.f32 %v1635_v59, %v1446_v51 }
 0x263   :  { %v3062_v52 = vpop.eup %3061  ;;  %v2545_v35 = vpop.f32.mrf.mxu0 }
 0x264   :  { %v1514_v29 = vmul.f32 0.70710677, %v1210_v47  ;;  %2750 = vmatmul.mubr.f32.gmra.mxu1 %v1698_v24  ;;  %v1636_v2 = vadd.f32 1.0, %v3062_v52  ;;  %v1451_v34 = vmul.f32 0.5, %v1210_v47 }
 0x265   :  { %v1214_v23 = vpop.f32.mrf.mxu0  ;;  %2752 = vmatprep.mubr.msk.f32.mxu1 %vm3317_vm1, %v4838_v18 }
 0x266   :  { %3069 = verf.f32 %v1514_v29  ;;  %v1215_v41 = vadd.f32 %v4366_v25, %v1214_v23  ;;  %v1699_v11 = vmul.f32 %v1636_v2, %v1447_v48 }
 0x267   :  { %v3064_v22 = vpop.eup %3063  ;;  %v2548_v15 = vpop.f32.mrf.mxu0 }
 0x268   :  { %v1515_v28 = vmul.f32 0.70710677, %v1215_v41  ;;  %2753 = vmatmul.mubr.f32.gmra.mxu1 %v1699_v11  ;;  %v1637_v56 = vadd.f32 1.0, %v3064_v22  ;;  %v1452_v42 = vmul.f32 0.5, %v1215_v41 }
 0x269   :  { %v1219_v27 = vpop.f32.mrf.mxu0  ;;  %2755 = vmatprep.mubr.msk.f32.mxu1 %vm3317_vm1, %v4838_v18 }
 0x26a   :  { %3071 = verf.f32 %v1515_v28  ;;  %v1220_v62 = vadd.f32 %v4366_v25, %v1219_v27  ;;  %v1700_v49 = vmul.f32 %v1637_v56, %v1448_v43 }
 0x26b   :  { %v3066_v38 = vpop.eup %3065  ;;  %v2551_v5 = vpop.f32.mrf.mxu0 }
 0x26c   :  { %v1516_v26 = vmul.f32 0.70710677, %v1220_v62  ;;  %2756 = vmatmul.mubr.f32.gmra.mxu1 %v1700_v49  ;;  %v1638_v30 = vadd.f32 1.0, %v3066_v38  ;;  %v1453_v61 = vmul.f32 0.5, %v1220_v62 }
 0x26d   :  { %v1224_v7 = vpop.f32.mrf.mxu0  ;;  %2758 = vmatprep.mubr.msk.f32.mxu1 %vm3317_vm1, %v4838_v18 }
 0x26e   :  { %3073 = verf.f32 %v1516_v26  ;;  %v1225_v57 = vadd.f32 %v4366_v25, %v1224_v7  ;;  %v1701_v21 = vmul.f32 %v1638_v30, %v1449_v20 }
 0x26f   :  { %v3068_v37 = vpop.eup %3067  ;;  %v2554_v60 = vpop.f32.mrf.mxu0 }
 0x270   :  { %v1517_v40 = vmul.f32 0.70710677, %v1225_v57  ;;  %2759 = vmatmul.mubr.f32.gmra.mxu1 %v1701_v21  ;;  %v1639_v33 = vadd.f32 1.0, %v3068_v37  ;;  %v1454_v59 = vmul.f32 0.5, %v1225_v57 }
 0x271   :  { %v1229_v19 = vpop.f32.mrf.mxu0  ;;  %2761 = vmatprep.mubr.msk.f32.mxu1 %vm3317_vm1, %v4838_v18 }
 0x272   :  { %3075 = verf.f32 %v1517_v40  ;;  %v1230_v46 = vadd.f32 %v4366_v25, %v1229_v19  ;;  %v1702_v8 = vmul.f32 %v1639_v33, %v1450_v14 }
 0x273   :  { %v3070_v50 = vpop.eup %3069  ;;  %v2557_v55 = vpop.f32.mrf.mxu0 }
 0x274   :  { %v1518_v9 = vmul.f32 0.70710677, %v1230_v46  ;;  %2762 = vmatmul.mubr.f32.gmra.mxu1 %v1702_v8  ;;  %v1640_v6 = vadd.f32 1.0, %v3070_v50  ;;  %v1455_v2 = vmul.f32 0.5, %v1230_v46 }
 0x275   :  { %v1234_v4 = vpop.f32.mrf.mxu0  ;;  %2764 = vmatprep.mubr.msk.f32.mxu1 %vm3317_vm1, %v4838_v18 }
 0x276   :  { %3077 = verf.f32 %v1518_v9  ;;  %v1235_v0 = vadd.f32 %v4366_v25, %v1234_v4  ;;  %v1703_v44 = vmul.f32 %v1640_v6, %v1451_v34 }
 0x277   :  { %v3072_v32 = vpop.eup %3071  ;;  %v2560_v58 = vpop.f32.mrf.mxu0 }
 0x278   :  { %v1519_v17 = vmul.f32 0.70710677, %v1235_v0  ;;  %2765 = vmatmul.mubr.f32.gmra.mxu1 %v1703_v44  ;;  %v1641_v1 = vadd.f32 1.0, %v3072_v32  ;;  %v1456_v56 = vmul.f32 0.5, %v1235_v0 }
 0x279   :  { %v1239_v3 = vpop.f32.mrf.mxu0  ;;  %2767 = vmatprep.mubr.msk.f32.mxu1 %vm3317_vm1, %v4838_v18 }
 0x27a   :  { %3079 = verf.f32 %v1519_v17  ;;  %v1240_v13 = vadd.f32 %v4366_v25, %v1239_v3  ;;  %v1704_v36 = vmul.f32 %v1641_v1, %v1452_v42 }
 0x27b   :  { %v3074_v54 = vpop.eup %3073  ;;  %v2563_v53 = vpop.f32.mrf.mxu0 }
 0x27c   :  { %v1520_v10 = vmul.f32 0.70710677, %v1240_v13  ;;  %2768 = vmatmul.mubr.f32.gmra.mxu1 %v1704_v36  ;;  %v1642_v16 = vadd.f32 1.0, %v3074_v54  ;;  %v1457_v30 = vmul.f32 0.5, %v1240_v13 }
 0x27d   :  { %v1244_v45 = vpop.f32.mrf.mxu0  ;;  %2770 = vmatprep.mubr.msk.f32.mxu1 %vm3317_vm1, %v4838_v18 }
 0x27e   :  { %3081 = verf.f32 %v1520_v10  ;;  %v1245_v63 = vadd.f32 %v4366_v25, %v1244_v45  ;;  %v1705_v12 = vmul.f32 %v1642_v16, %v1453_v61 }
 0x27f   :  { %v3076_v51 = vpop.eup %3075  ;;  %v2566_v39 = vpop.f32.mrf.mxu0 }
 0x280   :  { %v1521_v31 = vmul.f32 0.70710677, %v1245_v63  ;;  %2771 = vmatmul.mubr.f32.gmra.mxu1 %v1705_v12  ;;  %v1643_v47 = vadd.f32 1.0, %v3076_v51  ;;  %v1458_v33 = vmul.f32 0.5, %v1245_v63 }
 0x281   :  { %v1249_v24 = vpop.f32.mrf.mxu0  ;;  %2773 = vmatprep.mubr.msk.f32.mxu1 %vm3317_vm1, %v4838_v18 }
 0x282   :  { %3083 = verf.f32 %v1521_v31  ;;  %v1250_v52 = vadd.f32 %v4366_v25, %v1249_v24  ;;  %v1706_v35 = vmul.f32 %v1643_v47, %v1454_v59 }
 0x283   :  { %v3078_v48 = vpop.eup %3077  ;;  %v2569_v29 = vpop.f32.mrf.mxu0 }
 0x284   :  { %v1522_v23 = vmul.f32 0.70710677, %v1250_v52  ;;  %2774 = vmatmul.mubr.f32.gmra.mxu1 %v1706_v35  ;;  %v1644_v41 = vadd.f32 1.0, %v3078_v48  ;;  %v1459_v6 = vmul.f32 0.5, %v1250_v52 }
 0x285   :  { %v1254_v11 = vpop.f32.mrf.mxu0  ;;  %2776 = vmatprep.mubr.msk.f32.mxu1 %vm3317_vm1, %v4838_v18 }
 0x286   :  { %3085 = verf.f32 %v1522_v23  ;;  %v1255_v22 = vadd.f32 %v4366_v25, %v1254_v11  ;;  %v1707_v15 = vmul.f32 %v1644_v41, %v1455_v2 }
 0x287   :  { %v3080_v43 = vpop.eup %3079  ;;  %v2572_v28 = vpop.f32.mrf.mxu0 }
 0x288   :  { %v1523_v27 = vmul.f32 0.70710677, %v1255_v22  ;;  %2777 = vmatmul.mubr.f32.gmra.mxu1 %v1707_v15  ;;  %v1645_v62 = vadd.f32 1.0, %v3080_v43  ;;  %v1460_v1 = vmul.f32 0.5, %v1255_v22 }
 0x289   :  { %v1259_v49 = vpop.f32.mrf.mxu0  ;;  %2779 = vmatprep.mubr.msk.f32.mxu1 %vm3317_vm1, %v4838_v18 }
 0x28a   :  { %3087 = verf.f32 %v1523_v27  ;;  %v1260_v38 = vadd.f32 %v4366_v25, %v1259_v49  ;;  %v1708_v5 = vmul.f32 %v1645_v62, %v1456_v56 }
 0x28b   :  { %v3082_v20 = vpop.eup %3081  ;;  %v2575_v26 = vpop.f32.mrf.mxu0 }
 0x28c   :  { %v1524_v7 = vmul.f32 0.70710677, %v1260_v38  ;;  %2780 = vmatmul.mubr.f32.gmra.mxu1 %v1708_v5  ;;  %v1646_v57 = vadd.f32 1.0, %v3082_v20  ;;  %v1461_v16 = vmul.f32 0.5, %v1260_v38 }
 0x28d   :  { %v1264_v21 = vpop.f32.mrf.mxu0  ;;  %2782 = vmatprep.mubr.msk.f32.mxu1 %vm3317_vm1, %v4838_v18 }
 0x28e   :  { %3089 = verf.f32 %v1524_v7  ;;  %v1265_v37 = vadd.f32 %v4366_v25, %v1264_v21  ;;  %v1709_v60 = vmul.f32 %v1646_v57, %v1457_v30 }
 0x28f   :  { %v3084_v14 = vpop.eup %3083  ;;  %v2578_v40 = vpop.f32.mrf.mxu0 }
 0x290   :  { %v1525_v19 = vmul.f32 0.70710677, %v1265_v37  ;;  %2783 = vmatmul.mubr.f32.gmra.mxu1 %v1709_v60  ;;  %v1647_v46 = vadd.f32 1.0, %v3084_v14  ;;  %v1462_v47 = vmul.f32 0.5, %v1265_v37 }
 0x291   :  { %v1269_v8 = vpop.f32.mrf.mxu0  ;;  %2785 = vmatprep.mubr.msk.f32.mxu1 %vm3317_vm1, %v4838_v18 }
 0x292   :  { %3091 = verf.f32 %v1525_v19  ;;  %v1270_v50 = vadd.f32 %v4366_v25, %v1269_v8  ;;  %v1710_v55 = vmul.f32 %v1647_v46, %v1458_v33 }
 0x293   :  { %v3086_v34 = vpop.eup %3085  ;;  %v2581_v9 = vpop.f32.mrf.mxu0 }
 0x294   :  { %v1526_v4 = vmul.f32 0.70710677, %v1270_v50  ;;  %2786 = vmatmul.mubr.f32.gmra.mxu1 %v1710_v55  ;;  %v1648_v0 = vadd.f32 1.0, %v3086_v34  ;;  %v1463_v23 = vmul.f32 0.5, %v1270_v50 }
 0x295   :  { %v1274_v44 = vpop.f32.mrf.mxu0  ;;  %2788 = vmatprep.mubr.msk.f32.mxu1 %vm3317_vm1, %v4838_v18 }
 0x296   :  { %3093 = verf.f32 %v1526_v4  ;;  %v1275_v32 = vadd.f32 %v4366_v25, %v1274_v44  ;;  %v1711_v58 = vmul.f32 %v1648_v0, %v1459_v6 }
 0x297   :  { %v3088_v42 = vpop.eup %3087  ;;  %v2584_v17 = vpop.f32.mrf.mxu0 }
 0x298   :  { %v1527_v3 = vmul.f32 0.70710677, %v1275_v32  ;;  %2789 = vmatmul.mubr.f32.gmra.mxu1 %v1711_v58  ;;  %v1649_v13 = vadd.f32 1.0, %v3088_v42  ;;  %v1464_v27 = vmul.f32 0.5, %v1275_v32  ;;  %v4592_v42 = vld [vmem:[%s4788_s4] ss:$0 sm:$0xff] }
 0x299   :  { %v1279_v36 = vpop.f32.mrf.mxu0  ;;  %2791 = vmatprep.mubr.msk.f32.mxu1 %vm3317_vm1, %v4838_v18 }
 0x29a   :  { %3095 = verf.f32 %v1527_v3  ;;  %v1280_v54 = vadd.f32 %v4366_v25, %v1279_v36  ;;  %v1712_v53 = vmul.f32 %v1649_v13, %v1460_v1 }
 0x29b   :  { %v3090_v61 = vpop.eup %3089  ;;  %v2587_v10 = vpop.f32.mrf.mxu0 }
 0x29c   :  { %v1528_v45 = vmul.f32 0.70710677, %v1280_v54  ;;  %2792 = vmatmul.mubr.f32.gmra.mxu1 %v1712_v53  ;;  %v1650_v63 = vadd.f32 1.0, %v3090_v61  ;;  %v1465_v7 = vmul.f32 0.5, %v1280_v54 }
 0x29d   :  { %v1284_v12 = vpop.f32.mrf.mxu0  ;;  %2794 = vmatprep.mubr.msk.f32.mxu1 %vm3317_vm1, %v4838_v18 }
 0x29e   :  { %3097 = verf.f32 %v1528_v45  ;;  %v1285_v51 = vadd.f32 %v4366_v25, %v1284_v12  ;;  %v1713_v39 = vmul.f32 %v1650_v63, %v1461_v16 }
 0x29f   :  { %v3092_v59 = vpop.eup %3091  ;;  %v2590_v31 = vpop.f32.mrf.mxu0 }
 0x2a0   :  { %v1529_v24 = vmul.f32 0.70710677, %v1285_v51  ;;  %2795 = vmatmul.mubr.f32.gmra.mxu1 %v1713_v39  ;;  %v1651_v52 = vadd.f32 1.0, %v3092_v59  ;;  %v1466_v19 = vmul.f32 0.5, %v1285_v51 }
 0x2a1   :  { %2797 = vmatprep.mubr.msk.f32.mxu1 %vm3317_vm1, %v4838_v18  ;;  %v1289_v35 = vpop.f32.mrf.mxu0 }
 0x2a2   :  { %3099 = verf.f32 %v1529_v24  ;;  %v1714_v48 = vmul.f32 %v1651_v52, %v1462_v47  ;;  %v1290_v2 = vadd.f32 %v4366_v25, %v1289_v35 }
 0x2a3   :  { %v3094_v29 = vpop.eup %3093  ;;  %v2593_v41 = vpop.f32.mrf.mxu0 }
 0x2a4   :  { %2798 = vmatmul.mubr.f32.gmra.mxu1 %v1714_v48  ;;  %v1652_v11 = vadd.f32 1.0, %v3094_v29  ;;  %v1530_v22 = vmul.f32 0.70710677, %v1290_v2  ;;  %v1467_v0 = vmul.f32 0.5, %v1290_v2 }
 0x2a5   :  { %2800 = vmatprep.mubr.msk.f32.mxu1 %vm3317_vm1, %v4838_v18  ;;  %v1294_v15 = vpop.f32.mrf.mxu0 }
 0x2a6   :  { %v1715_v43 = vmul.f32 %v1652_v11, %v1463_v23  ;;  %3101 = verf.f32 %v1530_v22  ;;  %v1295_v56 = vadd.f32 %v4366_v25, %v1294_v15 }
 0x2a7   :  { %v3096_v28 = vpop.eup %3095  ;;  %v2596_v62 = vpop.f32.mrf.mxu0 }
 0x2a8   :  { %2801 = vmatmul.mubr.f32.gmra.mxu1 %v1715_v43  ;;  %v1653_v49 = vadd.f32 1.0, %v3096_v28  ;;  %v1531_v38 = vmul.f32 0.70710677, %v1295_v56  ;;  %v1468_v13 = vmul.f32 0.5, %v1295_v56 }
 0x2a9   :  { %2803 = vmatprep.mubr.msk.f32.mxu1 %vm3317_vm1, %v4838_v18  ;;  %v1299_v5 = vpop.f32.mrf.mxu0 }
 0x2aa   :  { %v1716_v20 = vmul.f32 %v1653_v49, %v1464_v27  ;;  %3103 = verf.f32 %v1531_v38  ;;  %v1300_v30 = vadd.f32 %v4366_v25, %v1299_v5 }
 0x2ab   :  { %v3098_v26 = vpop.eup %3097  ;;  %v2599_v57 = vpop.f32.mrf.mxu0 }
 0x2ac   :  { %2804 = vmatmul.mubr.f32.gmra.mxu1 %v1716_v20  ;;  %v1654_v21 = vadd.f32 1.0, %v3098_v26  ;;  %v1532_v37 = vmul.f32 0.70710677, %v1300_v30  ;;  %v1469_v63 = vmul.f32 0.5, %v1300_v30 }
 0x2ad   :  { %2806 = vmatprep.mubr.msk.f32.mxu1 %vm3317_vm1, %v4838_v18  ;;  %v1304_v60 = vpop.f32.mrf.mxu0 }
 0x2ae   :  { %v1717_v14 = vmul.f32 %v1654_v21, %v1465_v7  ;;  %3105 = verf.f32 %v1532_v37  ;;  %v1305_v33 = vadd.f32 %v4366_v25, %v1304_v60 }
 0x2af   :  { %v3100_v40 = vpop.eup %3099  ;;  %v2602_v46 = vpop.f32.mrf.mxu0 }
 0x2b0   :  { %2807 = vmatmul.mubr.f32.gmra.mxu1 %v1717_v14  ;;  %v1655_v8 = vadd.f32 1.0, %v3100_v40  ;;  %v1533_v50 = vmul.f32 0.70710677, %v1305_v33  ;;  %v1470_v52 = vmul.f32 0.5, %v1305_v33 }
 0x2b1   :  { %2809 = vmatprep.mubr.msk.f32.mxu1 %vm3317_vm1, %v4838_v18  ;;  %v1309_v55 = vpop.f32.mrf.mxu0 }
 0x2b2   :  { %v1718_v34 = vmul.f32 %v1655_v8, %v1466_v19  ;;  %3107 = verf.f32 %v1533_v50  ;;  %v1310_v9 = vadd.f32 %v4366_v25, %v1309_v55 }
 0x2b3   :  { %v3102_v6 = vpop.eup %3101  ;;  %v2605_v4 = vpop.f32.mrf.mxu0 }
 0x2b4   :  { %2810 = vmatmul.mubr.f32.gmra.mxu1 %v1718_v34  ;;  %v1534_v44 = vmul.f32 0.70710677, %v1310_v9  ;;  %v1656_v32 = vadd.f32 1.0, %v3102_v6  ;;  %v1471_v22 = vmul.f32 0.5, %v1310_v9 }
 0x2b5   :  { %2812 = vmatprep.mubr.msk.f32.mxu1 %vm3317_vm1, %v4838_v18  ;;  %v1314_v58 = vpop.f32.mrf.mxu0 }
 0x2b6   :  { %3109 = verf.f32 %v1534_v44  ;;  %v1315_v17 = vadd.f32 %v4592_v42, %v1314_v58  ;;  %v1719_v1 = vmul.f32 %v1656_v32, %v1467_v0 }
 0x2b7   :  { %v3104_v25 = vpop.eup %3103  ;;  %v2608_v3 = vpop.f32.mrf.mxu0 }
 0x2b8   :  { %v1535_v36 = vmul.f32 0.70710677, %v1315_v17  ;;  %2813 = vmatmul.mubr.f32.gmra.mxu1 %v1719_v1  ;;  %v1657_v54 = vadd.f32 1.0, %v3104_v25  ;;  %v1472_v38 = vmul.f32 0.5, %v1315_v17 }
 0x2b9   :  { %v1319_v53 = vpop.f32.mrf.mxu0  ;;  %2815 = vmatprep.mubr.msk.f32.mxu1 %vm3317_vm1, %v4838_v18 }
 0x2ba   :  { %3111 = verf.f32 %v1535_v36  ;;  %v1320_v61 = vadd.f32 %v4592_v42, %v1319_v53  ;;  %v1720_v10 = vmul.f32 %v1657_v54, %v1468_v13 }
 0x2bb   :  { %v3106_v16 = vpop.eup %3105  ;;  %v2611_v45 = vpop.f32.mrf.mxu0 }
 0x2bc   :  { %v1536_v12 = vmul.f32 0.70710677, %v1320_v61  ;;  %2816 = vmatmul.mubr.f32.gmra.mxu1 %v1720_v10  ;;  %v1658_v51 = vadd.f32 1.0, %v3106_v16  ;;  %v1473_v37 = vmul.f32 0.5, %v1320_v61 }
 0x2bd   :  { %v1324_v39 = vpop.f32.mrf.mxu0  ;;  %2818 = vmatprep.mubr.msk.f32.mxu1 %vm3317_vm1, %v4838_v18 }
 0x2be   :  { %3113 = verf.f32 %v1536_v12  ;;  %v1325_v59 = vadd.f32 %v4592_v42, %v1324_v39  ;;  %v1721_v31 = vmul.f32 %v1658_v51, %v1469_v63 }
 0x2bf   :  { %v3108_v47 = vpop.eup %3107  ;;  %v2614_v24 = vpop.f32.mrf.mxu0 }
 0x2c0   :  { %v1537_v35 = vmul.f32 0.70710677, %v1325_v59  ;;  %2819 = vmatmul.mubr.f32.gmra.mxu1 %v1721_v31  ;;  %v1659_v48 = vadd.f32 1.0, %v3108_v47  ;;  %v1474_v50 = vmul.f32 0.5, %v1325_v59 }
 0x2c1   :  { %v1329_v29 = vpop.f32.mrf.mxu0  ;;  %2821 = vmatprep.mubr.msk.f32.mxu1 %vm3317_vm1, %v4838_v18 }
 0x2c2   :  { %3115 = verf.f32 %v1537_v35  ;;  %v1330_v2 = vadd.f32 %v4592_v42, %v1329_v29  ;;  %v1722_v23 = vmul.f32 %v1659_v48, %v1470_v52 }
 0x2c3   :  { %v3110_v41 = vpop.eup %3109  ;;  %v2617_v11 = vpop.f32.mrf.mxu0 }
 0x2c4   :  { %v1538_v15 = vmul.f32 0.70710677, %v1330_v2  ;;  %2822 = vmatmul.mubr.f32.gmra.mxu1 %v1722_v23  ;;  %v1660_v43 = vadd.f32 1.0, %v3110_v41  ;;  %v1475_v32 = vmul.f32 0.5, %v1330_v2 }
 0x2c5   :  { %v1334_v28 = vpop.f32.mrf.mxu0  ;;  %2824 = vmatprep.mubr.msk.f32.mxu1 %vm3317_vm1, %v4838_v18 }
 0x2c6   :  { %3117 = verf.f32 %v1538_v15  ;;  %v1335_v56 = vadd.f32 %v4592_v42, %v1334_v28  ;;  %v1723_v27 = vmul.f32 %v1660_v43, %v1471_v22 }
 0x2c7   :  { %v3112_v62 = vpop.eup %3111  ;;  %v2620_v49 = vpop.f32.mrf.mxu0 }
 0x2c8   :  { %v1539_v5 = vmul.f32 0.70710677, %v1335_v56  ;;  %2825 = vmatmul.mubr.f32.gmra.mxu1 %v1723_v27  ;;  %v1661_v20 = vadd.f32 1.0, %v3112_v62  ;;  %v1476_v54 = vmul.f32 0.5, %v1335_v56 }
 0x2c9   :  { %v1339_v26 = vpop.f32.mrf.mxu0  ;;  %2827 = vmatprep.mubr.msk.f32.mxu1 %vm3317_vm1, %v4838_v18 }
 0x2ca   :  { %3119 = verf.f32 %v1539_v5  ;;  %v1340_v30 = vadd.f32 %v4592_v42, %v1339_v26  ;;  %v1724_v7 = vmul.f32 %v1661_v20, %v1472_v38 }
 0x2cb   :  { %v3114_v57 = vpop.eup %3113  ;;  %v2623_v21 = vpop.f32.mrf.mxu0 }
 0x2cc   :  { %v1540_v60 = vmul.f32 0.70710677, %v1340_v30  ;;  %2828 = vmatmul.mubr.f32.gmra.mxu1 %v1724_v7  ;;  %v1662_v14 = vadd.f32 1.0, %v3114_v57  ;;  %v1477_v51 = vmul.f32 0.5, %v1340_v30 }
 0x2cd   :  { %v1344_v40 = vpop.f32.mrf.mxu0  ;;  %2830 = vmatprep.mubr.msk.f32.mxu1 %vm3317_vm1, %v4838_v18 }
 0x2ce   :  { %3121 = verf.f32 %v1540_v60  ;;  %v1345_v33 = vadd.f32 %v4592_v42, %v1344_v40  ;;  %v1725_v19 = vmul.f32 %v1662_v14, %v1473_v37 }
 0x2cf   :  { %v3116_v46 = vpop.eup %3115  ;;  %v2626_v8 = vpop.f32.mrf.mxu0 }
 0x2d0   :  { %v1541_v55 = vmul.f32 0.70710677, %v1345_v33  ;;  %2831 = vmatmul.mubr.f32.gmra.mxu1 %v1725_v19  ;;  %v1663_v34 = vadd.f32 1.0, %v3116_v46  ;;  %v1478_v48 = vmul.f32 0.5, %v1345_v33  ;;  %v4642_v46 = vld [vmem:[%s4790_s6] ss:$0 sm:$0xff] }
 0x2d1   :  { %v1349_v9 = vpop.f32.mrf.mxu0  ;;  %2833 = vmatprep.mubr.msk.f32.mxu1 %vm3317_vm1, %v4838_v18  ;;  %s3318_s6 = smov [#allocation8]  }
 0x2d2   :  { %3123 = verf.f32 %v1541_v55  ;;  %v1350_v6 = vadd.f32 %v4592_v42, %v1349_v9  ;;  %v1726_v4 = vmul.f32 %v1663_v34, %v1474_v50  ;;  %s2282_s26 = sshll.u32 %s3318_s6, 4  ;;  %s2283_s26 = int_to_ptr.vmem [resolvable:$true] %s2282_s26 }
 0x2d3   :  { %v3118_v0 = vpop.eup %3117  ;;  %v2629_v44 = vpop.f32.mrf.mxu0  ;;  %s3285_s27 = scalar_lea.vmem %s2283_s26, 8064  ;;  %p3290_p2 = scmp.lt.s32.totalorder %s2283_s26, %s2283_s26 }
 0x2d4   :  { %v1542_v58 = vmul.f32 0.70710677, %v1350_v6  ;;  %2834 = vmatmul.mubr.f32.gmra.mxu1 %v1726_v4  ;;  %v1664_v17 = vadd.f32 1.0, %v3118_v0  ;;  %v1479_v43 = vmul.f32 0.5, %v1350_v6  ;;  %p3286_p1 = scmp.ne.s32.totalorder %s2283_s26, %s3285_s27  ;;  %p3291_p3 = scmp.lt.s32.totalorder %s3285_s27, %s3285_s27 }
 0x2d5   :  { %v1354_v1 = vpop.f32.mrf.mxu0  ;;  %2836 = vmatprep.mubr.msk.f32.mxu1 %vm3317_vm1, %v4838_v18 }
 0x2d6   :  { %3125 = verf.f32 %v1542_v58  ;;  %v1355_v25 = vadd.f32 %v4592_v42, %v1354_v1  ;;  %v1727_v3 = vmul.f32 %v1664_v17, %v1475_v32  ;;  %v3162_v17 = vld [vmem:[#allocation2] sm:$0xff]  ;;  %p3292_p4 = por %p3291_p3, %p3290_p2 }
 0x2d7   :  { %v3120_v13 = vpop.eup %3119  ;;  %v2632_v36 = vpop.f32.mrf.mxu0 }
 0x2d8   :  { %v1543_v53 = vmul.f32 0.70710677, %v1355_v25  ;;  %2837 = vmatmul.mubr.f32.gmra.mxu1 %v1727_v3  ;;  %v1665_v61 = vadd.f32 1.0, %v3120_v13  ;;  %v1480_v20 = vmul.f32 0.5, %v1355_v25  ;;  %p3293_p5 = pnand %p3292_p4, %p3286_p1 }
 0x2d9   :  { %v1359_v10 = vpop.f32.mrf.mxu0  ;;  %2839 = vmatprep.mubr.msk.f32.mxu1 %vm3317_vm1, %v4838_v18 }
 0x2da   :  { %3127 = verf.f32 %v1543_v53  ;;  %v1360_v16 = vadd.f32 %v4592_v42, %v1359_v10  ;;  %v1728_v45 = vmul.f32 %v1665_v61, %v1476_v54 }
 0x2db   :  { %v3122_v63 = vpop.eup %3121  ;;  %v2635_v12 = vpop.f32.mrf.mxu0 }
 0x2dc   :  { %v1544_v39 = vmul.f32 0.70710677, %v1360_v16  ;;  %2840 = vmatmul.mubr.f32.gmra.mxu1 %v1728_v45  ;;  %v1666_v59 = vadd.f32 1.0, %v3122_v63  ;;  %v1481_v14 = vmul.f32 0.5, %v1360_v16  ;;  %v3163_v12 = vld [vmem:[#allocation2 + $0x8] sm:$0xff] }
 0x2dd   :  { %v1364_v31 = vpop.f32.mrf.mxu0  ;;  %2842 = vmatprep.mubr.msk.f32.mxu1 %vm3317_vm1, %v4838_v18 }
 0x2de   :  { %3129 = verf.f32 %v1544_v39  ;;  %v1365_v47 = vadd.f32 %v4592_v42, %v1364_v31  ;;  %v1729_v24 = vmul.f32 %v1666_v59, %v1477_v51 }
 0x2df   :  { %v3124_v52 = vpop.eup %3123  ;;  %v2638_v35 = vpop.f32.mrf.mxu0 }
 0x2e0   :  { %v1545_v29 = vmul.f32 0.70710677, %v1365_v47  ;;  %2843 = vmatmul.mubr.f32.gmra.mxu1 %v1729_v24  ;;  %v1667_v2 = vadd.f32 1.0, %v3124_v52  ;;  %v1482_v6 = vmul.f32 0.5, %v1365_v47 }
 0x2e1   :  { %v1369_v23 = vpop.f32.mrf.mxu0  ;;  %2845 = vmatprep.mubr.msk.f32.mxu1 %vm3317_vm1, %v4838_v18 }
 0x2e2   :  { %3131 = verf.f32 %v1545_v29  ;;  %v1370_v41 = vadd.f32 %v4592_v42, %v1369_v23  ;;  %v1730_v11 = vmul.f32 %v1667_v2, %v1478_v48 }
 0x2e3   :  { %v3126_v22 = vpop.eup %3125  ;;  %v2641_v15 = vpop.f32.mrf.mxu0 }
 0x2e4   :  { %v1546_v28 = vmul.f32 0.70710677, %v1370_v41  ;;  %2846 = vmatmul.mubr.f32.gmra.mxu1 %v1730_v11  ;;  %v1668_v56 = vadd.f32 1.0, %v3126_v22  ;;  %v1483_v53 = vmul.f32 0.5, %v1370_v41  ;;  %v3164_v41 = vld [vmem:[#allocation2 + $0x10] sm:$0xff] }
 0x2e5   :  { %v1374_v27 = vpop.f32.mrf.mxu0  ;;  %2848 = vmatprep.mubr.msk.f32.mxu1 %vm3317_vm1, %v4838_v18 }
 0x2e6   :  { %3133 = verf.f32 %v1546_v28  ;;  %v1375_v62 = vadd.f32 %v4592_v42, %v1374_v27  ;;  %v1731_v49 = vmul.f32 %v1668_v56, %v1479_v43 }
 0x2e7   :  { %v3128_v38 = vpop.eup %3127  ;;  %v2644_v5 = vpop.f32.mrf.mxu0 }
 0x2e8   :  { %v1547_v26 = vmul.f32 0.70710677, %v1375_v62  ;;  %2849 = vmatmul.mubr.f32.gmra.mxu1 %v1731_v49  ;;  %v1669_v30 = vadd.f32 1.0, %v3128_v38  ;;  %v1484_v52 = vmul.f32 0.5, %v1375_v62 }
 0x2e9   :  { %v1379_v7 = vpop.f32.mrf.mxu0  ;;  %2851 = vmatprep.mubr.msk.f32.mxu1 %vm3317_vm1, %v4838_v18 }
 0x2ea   :  { %3135 = verf.f32 %v1547_v26  ;;  %v4634_v57 = vadd.f32 %v4592_v42, %v1379_v7  ;;  %v1732_v21 = vmul.f32 %v1669_v30, %v1480_v20  ;;  %v3165_v26 = vld [vmem:[#allocation2 + $0x18] sm:$0xff] }
 0x2eb   :  { %v3130_v37 = vpop.eup %3129  ;;  %v2647_v60 = vpop.f32.mrf.mxu0 }
 0x2ec   :  { %v1548_v40 = vmul.f32 0.70710677, %v4634_v57  ;;  %2852 = vmatmul.mubr.f32.gmra.mxu1 %v1732_v21  ;;  %v1670_v33 = vadd.f32 1.0, %v3130_v37  ;;  %v1485_v27 = vmul.f32 0.5, %v4634_v57 }
 0x2ed   :  { %v1384_v19 = vpop.f32.mrf.mxu0  ;;  %2854 = vmatprep.mubr.msk.f32.mxu1 %vm3317_vm1, %v4838_v18 }
 0x2ee   :  { %3137 = verf.f32 %v1548_v40  ;;  %v4645_v8 = vadd.f32 %v4592_v42, %v1384_v19  ;;  %v1733_v50 = vmul.f32 %v1670_v33, %v1481_v14 }
 0x2ef   :  { %v3132_v55 = vpop.eup %3131  ;;  %v2650_v34 = vpop.f32.mrf.mxu0 }
 0x2f0   :  { %v1837_v9 = vpop.f32.mrf.mxu1  ;;  %v1549_v4 = vmul.f32 0.70710677, %v4645_v8  ;;  %2855 = vmatmul.mubr.f32.gmra.mxu1 %v1733_v50  ;;  %v1671_v44 = vadd.f32 1.0, %v3132_v55  ;;  %v1486_v14 = vmul.f32 0.5, %v4645_v8  ;;  %v3166_v34 = vld [vmem:[#allocation2 + $0x20] sm:$0xff] }
 0x2f1   :  { %v1838_v0 = vadd.f32 %v4642_v46, %v1837_v9  ;;  %v1389_v32 = vpop.f32.mrf.mxu0  ;;  %2857 = vmatprep.mubr.msk.f32.mxu1 %vm3317_vm1, %v4838_v18 }
 0x2f2   :  { %v2712_v58 = vpop.f32.mrf.mxu1  ;;  %3139 = verf.f32 %v1549_v4  ;;  %v4652_v25 = vadd.f32 %v4592_v42, %v1389_v32  ;;  %v1734_v3 = vmul.f32 %v1671_v44, %v1482_v6 }
 0x2f3   :  { %v2151_v1 = vadd.f32 %v3162_v17, %v1838_v0  ;;  %v3134_v13 = vpop.eup %3133  ;;  %v2653_v36 = vpop.f32.mrf.mxu0 }
 0x2f4   :  { %v1842_v54 = vpop.f32.mrf.mxu1  ;;  %v1550_v61 = vmul.f32 0.70710677, %v4652_v25  ;;  %2858 = vmatmul.mubr.f32.gmra.mxu1 %v1734_v3  ;;  %v1672_v16 = vadd.f32 1.0, %v3134_v13  ;;  %v1487_v32 = vmul.f32 0.5, %v4652_v25  ;;  %v3167_v36 = vld [vmem:[#allocation2 + $0x28] sm:$0xff] }
 0x2f5   :  { %2214 = vst [vmem:[#allocation8] sm:$0xff] %v2151_v1  ;;  %v1843_v10 = vadd.f32 %v4642_v46, %v1842_v54  ;;  %v1394_v45 = vpop.f32.mrf.mxu0  ;;  %2860 = vmatprep.mubr.msk.f32.mxu1 %vm3317_vm1, %v4838_v18 }
 0x2f6   :  { %v2715_v63 = vpop.f32.mrf.mxu1  ;;  %3141 = verf.f32 %v1550_v61  ;;  %v4659_v39 = vadd.f32 %v4592_v42, %v1394_v45  ;;  %v1735_v59 = vmul.f32 %v1672_v16, %v1483_v53 }
 0x2f7   :  { %v2152_v51 = vadd.f32 %v3163_v12, %v1843_v10  ;;  %v3136_v31 = vpop.eup %3135  ;;  %v2656_v47 = vpop.f32.mrf.mxu0 }
 0x2f8   :  { %v1847_v24 = vpop.f32.mrf.mxu1  ;;  %v1551_v35 = vmul.f32 0.70710677, %v4659_v39  ;;  %2861 = vmatmul.mubr.f32.gmra.mxu1 %v1735_v59  ;;  %v1673_v29 = vadd.f32 1.0, %v3136_v31  ;;  %v1488_v45 = vmul.f32 0.5, %v4659_v39  ;;  %v3168_v47 = vld [vmem:[#allocation2 + $0x30] sm:$0xff] }
 0x2f9   :  { %2215 = vst [vmem:[#allocation8 + $0x8] sm:$0xff] %v2152_v51  ;;  %v1848_v48 = vadd.f32 %v4642_v46, %v1847_v24  ;;  %v1399_v2 = vpop.f32.mrf.mxu0  ;;  %2863 = vmatprep.mubr.msk.f32.mxu1 %vm3317_vm1, %v4838_v18 }
 0x2fa   :  { %v2718_v23 = vpop.f32.mrf.mxu1  ;;  %3143 = verf.f32 %v1551_v35  ;;  %v4666_v22 = vadd.f32 %v4592_v42, %v1399_v2  ;;  %v1736_v15 = vmul.f32 %v1673_v29, %v1484_v52 }
 0x2fb   :  { %v2153_v11 = vadd.f32 %v3164_v41, %v1848_v48  ;;  %v3138_v43 = vpop.eup %3137  ;;  %v2659_v28 = vpop.f32.mrf.mxu0 }
 0x2fc   :  { %v1852_v56 = vpop.f32.mrf.mxu1  ;;  %v1552_v62 = vmul.f32 0.70710677, %v4666_v22  ;;  %2864 = vmatmul.mubr.f32.gmra.mxu1 %v1736_v15  ;;  %v1674_v38 = vadd.f32 1.0, %v3138_v43  ;;  %v1489_v2 = vmul.f32 0.5, %v4666_v22 }
 0x2fd   :  { %2216 = vst [vmem:[#allocation8 + $0x10] sm:$0xff] %v2153_v11  ;;  %v1853_v49 = vadd.f32 %v4642_v46, %v1852_v56  ;;  %v1404_v5 = vpop.f32.mrf.mxu0  ;;  %2866 = vmatprep.mubr.msk.f32.mxu1 %vm3317_vm1, %v4838_v18  ;;  %v3169_v56 = vld [vmem:[#allocation2 + $0x38] sm:$0xff] }
 0x2fe   :  { %v2721_v20 = vpop.f32.mrf.mxu1  ;;  %3145 = verf.f32 %v1552_v62  ;;  %v4674_v7 = vadd.f32 %v4592_v42, %v1404_v5  ;;  %v1737_v21 = vmul.f32 %v1674_v38, %v1485_v27 }
 0x2ff   :  { %v2154_v30 = vadd.f32 %v3165_v26, %v1853_v49  ;;  %v3140_v57 = vpop.eup %3139  ;;  %v2662_v37 = vpop.f32.mrf.mxu0 }
 0x300   :  { %v1857_v60 = vpop.f32.mrf.mxu1  ;;  %v1553_v40 = vmul.f32 0.70710677, %v4674_v7  ;;  %2867 = vmatmul.mubr.f32.gmra.mxu1 %v1737_v21  ;;  %v1675_v19 = vadd.f32 1.0, %v3140_v57  ;;  %v1490_v5 = vmul.f32 0.5, %v4674_v7 }
 0x301   :  { %2217 = vst [vmem:[#allocation8 + $0x18] sm:$0xff] %v2154_v30  ;;  %v1858_v33 = vadd.f32 %v4642_v46, %v1857_v60  ;;  %v1409_v50 = vpop.f32.mrf.mxu0  ;;  %2869 = vmatprep.mubr.msk.f32.mxu1 %vm3317_vm1, %v4838_v18  ;;  %v3170_v60 = vld [vmem:[#allocation2 + $0x40] sm:$0xff] }
 0x302   :  { %v2724_v55 = vpop.f32.mrf.mxu1  ;;  %3147 = verf.f32 %v1553_v40  ;;  %v4682_v6 = vadd.f32 %v4592_v42, %v1409_v50  ;;  %v1738_v4 = vmul.f32 %v1675_v19, %v1486_v14 }
 0x303   :  { %v2155_v9 = vadd.f32 %v3166_v34, %v1858_v33  ;;  %v3142_v8 = vpop.eup %3141  ;;  %v2665_v0 = vpop.f32.mrf.mxu0 }
 0x304   :  { %v1862_v44 = vpop.f32.mrf.mxu1  ;;  %v1554_v58 = vmul.f32 0.70710677, %v4682_v6  ;;  %2870 = vmatmul.mubr.f32.gmra.mxu1 %v1738_v4  ;;  %v1676_v1 = vadd.f32 1.0, %v3142_v8  ;;  %v1491_v50 = vmul.f32 0.5, %v4682_v6  ;;  %v3171_v0 = vld [vmem:[#allocation2 + $0x48] sm:$0xff] }
 0x305   :  { %2218 = vst [vmem:[#allocation8 + $0x20] sm:$0xff] %v2155_v9  ;;  %v1863_v17 = vadd.f32 %v4642_v46, %v1862_v44  ;;  %v1414_v3 = vpop.f32.mrf.mxu0  ;;  %2872 = vmatprep.mubr.msk.f32.mxu1 %vm3317_vm1, %v4838_v18 }
 0x306   :  { %v2727_v13 = vpop.f32.mrf.mxu1  ;;  %3149 = verf.f32 %v1554_v58  ;;  %v4690_v53 = vadd.f32 %v4592_v42, %v1414_v3  ;;  %v1739_v61 = vmul.f32 %v1676_v1, %v1487_v32 }
 0x307   :  { %v2156_v54 = vadd.f32 %v3167_v36, %v1863_v17  ;;  %v3144_v25 = vpop.eup %3143  ;;  %v2668_v10 = vpop.f32.mrf.mxu0  ;;  %v3172_v13 = vld [vmem:[#allocation2 + $0x50] sm:$0xff] }
 0x308   :  { %v1867_v16 = vpop.f32.mrf.mxu1  ;;  %v1555_v63 = vmul.f32 0.70710677, %v4690_v53  ;;  %2873 = vmatmul.mubr.f32.gmra.mxu1 %v1739_v61  ;;  %v1677_v51 = vadd.f32 1.0, %v3144_v25  ;;  %v1492_v58 = vmul.f32 0.5, %v4690_v53 }
 0x309   :  { %2219 = vst [vmem:[#allocation8 + $0x28] sm:$0xff] %v2156_v54  ;;  %v1868_v12 = vadd.f32 %v4642_v46, %v1867_v16  ;;  %v1419_v59 = vpop.f32.mrf.mxu0  ;;  %2875 = vmatprep.mubr.msk.f32.mxu1 %vm3317_vm1, %v4838_v18 }
 0x30a   :  { %v2730_v31 = vpop.f32.mrf.mxu1  ;;  %3151 = verf.f32 %v1555_v63  ;;  %v4698_v52 = vadd.f32 %v4592_v42, %v1419_v59  ;;  %v1740_v35 = vmul.f32 %v1677_v51, %v1488_v45  ;;  %v3173_v63 = vld [vmem:[#allocation2 + $0x58] sm:$0xff] }
 0x30b   :  { %v2157_v24 = vadd.f32 %v3168_v47, %v1868_v12  ;;  %v3146_v39 = vpop.eup %3145  ;;  %v2671_v48 = vpop.f32.mrf.mxu0 }
 0x30c   :  { %v1872_v29 = vpop.f32.mrf.mxu1  ;;  %v1678_v23 = vadd.f32 1.0, %v3146_v39  ;;  %v1556_v41 = vmul.f32 0.70710677, %v4698_v52  ;;  %2876 = vmatmul.mubr.f32.gmra.mxu1 %v1740_v35  ;;  %v1493_v25 = vmul.f32 0.5, %v4698_v52  ;;  %v3174_v39 = vld [vmem:[#allocation2 + $0x60] sm:$0xff] }
 0x30d   :  { %2220 = vst [vmem:[#allocation8 + $0x30] sm:$0xff] %v2157_v24  ;;  %v1873_v11 = vadd.f32 %v4642_v46, %v1872_v29  ;;  %v1424_v15 = vpop.f32.mrf.mxu0  ;;  %2878 = vmatprep.mubr.msk.f32.mxu1 %vm3317_vm1, %v4838_v18 }
 0x30e   :  { %v2733_v43 = vpop.f32.mrf.mxu1  ;;  %v1741_v28 = vmul.f32 %v1678_v23, %v1489_v2  ;;  %3153 = verf.f32 %v1556_v41  ;;  %v1425_v62 = vadd.f32 %v4592_v42, %v1424_v15 }
 0x30f   :  { %v2158_v27 = vadd.f32 %v3169_v56, %v1873_v11  ;;  %v3148_v49 = vpop.eup %3147  ;;  %v2674_v22 = vpop.f32.mrf.mxu0 }
 0x310   :  { %v1877_v38 = vpop.f32.mrf.mxu1  ;;  %v1679_v20 = vadd.f32 1.0, %v3148_v49  ;;  %v1557_v26 = vmul.f32 0.70710677, %v1425_v62  ;;  %2879 = vmatmul.mubr.f32.gmra.mxu1 %v1741_v28  ;;  %v1494_v31 = vmul.f32 0.5, %v1425_v62  ;;  %v3175_v28 = vld [vmem:[#allocation2 + $0x68] sm:$0xff]  ;;  %v3176_v22 = vld [vmem:[#allocation2 + $0x70] sm:$0xff] }
 0x311   :  { %2221 = vst [vmem:[#allocation8 + $0x38] sm:$0xff] %v2158_v27  ;;  %v1878_v30 = vadd.f32 %v4642_v46, %v1877_v38  ;;  %v1429_v21 = vpop.f32.mrf.mxu0  ;;  %2881 = vmatprep.mubr.msk.f32.mxu1 %vm3317_vm1, %v4838_v18 }
 0x312   :  { %v2736_v57 = vpop.f32.mrf.mxu1  ;;  %v1742_v37 = vmul.f32 %v1679_v20, %v1490_v5  ;;  %3155 = verf.f32 %v1557_v26  ;;  %v1430_v40 = vadd.f32 %v4592_v42, %v1429_v21 }
 0x313   :  { %v2159_v14 = vadd.f32 %v3170_v60, %v1878_v30  ;;  %v3150_v33 = vpop.eup %3149  ;;  %v2677_v19 = vpop.f32.mrf.mxu0  ;;  %v3177_v30 = vld [vmem:[#allocation2 + $0x78] sm:$0xff]  ;;  %v3178_v60 = vld [vmem:[#allocation2 + $0x80] sm:$0xff] }
 0x314   :  { %v1882_v7 = vpop.f32.mrf.mxu1  ;;  %v1680_v55 = vadd.f32 1.0, %v3150_v33  ;;  %v1558_v34 = vmul.f32 0.70710677, %v1430_v40  ;;  %2882 = vmatmul.mubr.f32.gmra.mxu1 %v1742_v37  ;;  %v1495_v23 = vmul.f32 0.5, %v1430_v40 }
 0x315   :  { %2222 = vst [vmem:[#allocation8 + $0x40] sm:$0xff] %v2159_v14  ;;  %v1883_v9 = vadd.f32 %v4642_v46, %v1882_v7  ;;  %2884 = vmatprep.mubr.msk.f32.mxu1 %vm3317_vm1, %v4838_v18  ;;  %v3179_v7 = vld [vmem:[#allocation2 + $0x88] sm:$0xff] }
 0x316   :  { %v2739_v4 = vpop.f32.mrf.mxu1  ;;  %v1743_v8 = vmul.f32 %v1680_v55, %v1491_v50  ;;  %3157 = verf.f32 %v1558_v34 }
 0x317   :  { %v2160_v44 = vadd.f32 %v3171_v0, %v1883_v9  ;;  %v3152_v42 = vpop.eup %3151  ;;  %v3180_v4 = vld [vmem:[#allocation2 + $0x90] sm:$0xff] }
 0x318   :  { %v1887_v32 = vpop.f32.mrf.mxu1  ;;  %v1681_v17 = vadd.f32 1.0, %v3152_v42  ;;  %2885 = vmatmul.mubr.f32.gmra.mxu1 %v1743_v8 }
 0x319   :  { %2223 = vst [vmem:[#allocation8 + $0x48] sm:$0xff] %v2160_v44  ;;  %v1888_v6 = vadd.f32 %v4642_v46, %v1887_v32  ;;  %2887 = vmatprep.mubr.msk.f32.mxu1 %vm3317_vm1, %v4838_v18  ;;  %v3181_v32 = vld [vmem:[#allocation2 + $0x98] sm:$0xff] }
 0x31a   :  { %v2742_v1 = vpop.f32.mrf.mxu1  ;;  %v1744_v3 = vmul.f32 %v1681_v17, %v1492_v58 }
 0x31b   :  { %v2161_v36 = vadd.f32 %v3172_v13, %v1888_v6  ;;  %v3154_v54 = vpop.eup %3153 }
 0x31c   :  { %v1892_v61 = vpop.f32.mrf.mxu1  ;;  %v1682_v10 = vadd.f32 1.0, %v3154_v54  ;;  %2888 = vmatmul.mubr.f32.gmra.mxu1 %v1744_v3  ;;  %v3182_v3 = vld [vmem:[#allocation2 + $0xa0] sm:$0xff] }
 0x31d   :  { %2224 = vst [vmem:[#allocation8 + $0x50] sm:$0xff] %v2161_v36  ;;  %v1893_v53 = vadd.f32 %v4642_v46, %v1892_v61  ;;  %2890 = vmatprep.mubr.msk.f32.mxu1 %vm3317_vm1, %v4838_v18 }
 0x31e   :  { %v2745_v16 = vpop.f32.mrf.mxu1  ;;  %v1745_v45 = vmul.f32 %v1682_v10, %v1493_v25  ;;  %v3183_v25 = vld [vmem:[#allocation2 + $0xa8] sm:$0xff] }
 0x31f   :  { %v2162_v12 = vadd.f32 %v3173_v63, %v1893_v53  ;;  %v3156_v51 = vpop.eup %3155  ;;  %v3184_v63 = vld [vmem:[#allocation2 + $0xb0] sm:$0xff] }
 0x320   :  { %v1897_v59 = vpop.f32.mrf.mxu1  ;;  %v1683_v47 = vadd.f32 1.0, %v3156_v51  ;;  %2891 = vmatmul.mubr.f32.gmra.mxu1 %v1745_v45 }
 0x321   :  { %2225 = vst [vmem:[#allocation8 + $0x58] sm:$0xff] %v2162_v12  ;;  %v1898_v24 = vadd.f32 %v4642_v46, %v1897_v59  ;;  %2893 = vmatprep.mubr.msk.f32.mxu1 %vm3317_vm1, %v4838_v18 }
 0x322   :  { %v2748_v52 = vpop.f32.mrf.mxu1  ;;  %v1746_v35 = vmul.f32 %v1683_v47, %v1494_v31  ;;  %v3185_v47 = vld [vmem:[#allocation2 + $0xb8] sm:$0xff] }
 0x323   :  { %v2163_v48 = vadd.f32 %v3174_v39, %v1898_v24  ;;  %v3158_v29 = vpop.eup %3157 }
 0x324   :  { %v1902_v2 = vpop.f32.mrf.mxu1  ;;  %v1684_v41 = vadd.f32 1.0, %v3158_v29  ;;  %2894 = vmatmul.mubr.f32.gmra.mxu1 %v1746_v35 }
 0x325   :  { %2226 = vst [vmem:[#allocation8 + $0x60] sm:$0xff] %v2163_v48  ;;  %v1903_v11 = vadd.f32 %v4642_v46, %v1902_v2  ;;  %2896 = vmatprep.mubr.msk.f32.mxu1 %vm3317_vm1, %v4838_v18  ;;  %v3186_v48 = vld [vmem:[#allocation2 + $0xc0] sm:$0xff] }
 0x326   :  { %v2751_v15 = vpop.f32.mrf.mxu1  ;;  %v1747_v43 = vmul.f32 %v1684_v41, %v1495_v23 }
 0x327   :  { %v2164_v56 = vadd.f32 %v3175_v28, %v1903_v11  ;;  %v3187_v11 = vld [vmem:[#allocation2 + $0xc8] sm:$0xff] }
 0x328   :  { %v1907_v27 = vpop.f32.mrf.mxu1  ;;  %2897 = vmatmul.mubr.f32.gmra.mxu1 %v1747_v43 }
 0x329   :  { %2227 = vst [vmem:[#allocation8 + $0x68] sm:$0xff] %v2164_v56  ;;  %v1908_v62 = vadd.f32 %v4642_v46, %v1907_v27  ;;  %v3188_v27 = vld [vmem:[#allocation2 + $0xd0] sm:$0xff] }
 0x32a   :  { %v2754_v49 = vpop.f32.mrf.mxu1 }
 0x32b   :  { %v2165_v38 = vadd.f32 %v3176_v22, %v1908_v62 }
 0x32c   :  { %v1912_v5 = vpop.f32.mrf.mxu1 }
 0x32d   :  { %2228 = vst [vmem:[#allocation8 + $0x70] sm:$0xff] %v2165_v38  ;;  %v1913_v20 = vadd.f32 %v4642_v46, %v1912_v5  ;;  %v3189_v5 = vld [vmem:[#allocation2 + $0xd8] sm:$0xff] }
 0x32e   :  { %v2757_v26 = vpop.f32.mrf.mxu1 }
 0x32f   :  { %v2166_v21 = vadd.f32 %v3177_v30, %v1913_v20 }
 0x330   :  { %v1917_v57 = vpop.f32.mrf.mxu1 }
 0x331   :  { %2229 = vst [vmem:[#allocation8 + $0x78] sm:$0xff] %v2166_v21  ;;  %v1918_v18 = vadd.f32 %v4642_v46, %v1917_v57  ;;  %v3190_v57 = vld [vmem:[#allocation2 + $0xe0] sm:$0xff] }
 0x332   :  { %v2760_v37 = vpop.f32.mrf.mxu1 }
 0x333   :  { %v2167_v14 = vadd.f32 %v3178_v60, %v1918_v18 }
 0x334   :  { %v1922_v40 = vpop.f32.mrf.mxu1 }
 0x335   :  { %2230 = vst [vmem:[#allocation8 + $0x80] sm:$0xff] %v2167_v14  ;;  %v1923_v33 = vadd.f32 %v4642_v46, %v1922_v40  ;;  %v3191_v40 = vld [vmem:[#allocation2 + $0xe8] sm:$0xff] }
 0x336   :  { %v2763_v19 = vpop.f32.mrf.mxu1 }
 0x337   :  { %v2168_v50 = vadd.f32 %v3179_v7, %v1923_v33 }
 0x338   :  { %v1927_v55 = vpop.f32.mrf.mxu1 }
 0x339   :  { %2231 = vst [vmem:[#allocation8 + $0x88] sm:$0xff] %v2168_v50  ;;  %v1928_v34 = vadd.f32 %v4642_v46, %v1927_v55  ;;  %v3192_v55 = vld [vmem:[#allocation2 + $0xf0] sm:$0xff] }
 0x33a   :  { %v2766_v9 = vpop.f32.mrf.mxu1 }
 0x33b   :  { %v2169_v8 = vadd.f32 %v3180_v4, %v1928_v34 }
 0x33c   :  { %v1932_v0 = vpop.f32.mrf.mxu1 }
 0x33d   :  { %2232 = vst [vmem:[#allocation8 + $0x90] sm:$0xff] %v2169_v8  ;;  %v1933_v44 = vadd.f32 %v4642_v46, %v1932_v0  ;;  %v3193_v0 = vld [vmem:[#allocation2 + $0xf8] sm:$0xff] }
 0x33e   :  { %v2769_v42 = vpop.f32.mrf.mxu1 }
 0x33f   :  { %v2170_v58 = vadd.f32 %v3181_v32, %v1933_v44 }
 0x340   :  { %v1937_v17 = vpop.f32.mrf.mxu1 }
 0x341   :  { %2233 = vst [vmem:[#allocation8 + $0x98] sm:$0xff] %v2170_v58  ;;  %v1938_v6 = vadd.f32 %v4642_v46, %v1937_v17  ;;  %v3194_v17 = vld [vmem:[#allocation2 + $0x100] sm:$0xff] }
 0x342   :  { %v2772_v1 = vpop.f32.mrf.mxu1 }
 0x343   :  { %v2171_v13 = vadd.f32 %v3182_v3, %v1938_v6 }
 0x344   :  { %v1942_v36 = vpop.f32.mrf.mxu1 }
 0x345   :  { %2234 = vst [vmem:[#allocation8 + $0xa0] sm:$0xff] %v2171_v13  ;;  %v1943_v54 = vadd.f32 %v4642_v46, %v1942_v36  ;;  %v3195_v36 = vld [vmem:[#allocation2 + $0x108] sm:$0xff] }
 0x346   :  { %v2775_v61 = vpop.f32.mrf.mxu1 }
 0x347   :  { %v2172_v10 = vadd.f32 %v3183_v25, %v1943_v54 }
 0x348   :  { %v1947_v53 = vpop.f32.mrf.mxu1 }
 0x349   :  { %2235 = vst [vmem:[#allocation8 + $0xa8] sm:$0xff] %v2172_v10  ;;  %v1948_v16 = vadd.f32 %v4642_v46, %v1947_v53  ;;  %v3196_v53 = vld [vmem:[#allocation2 + $0x110] sm:$0xff] }
 0x34a   :  { %v2778_v45 = vpop.f32.mrf.mxu1 }
 0x34b   :  { %v2173_v12 = vadd.f32 %v3184_v63, %v1948_v16 }
 0x34c   :  { %v1952_v51 = vpop.f32.mrf.mxu1 }
 0x34d   :  { %2236 = vst [vmem:[#allocation8 + $0xb0] sm:$0xff] %v2173_v12  ;;  %v1953_v59 = vadd.f32 %v4642_v46, %v1952_v51  ;;  %v3197_v51 = vld [vmem:[#allocation2 + $0x118] sm:$0xff] }
 0x34e   :  { %v2781_v31 = vpop.f32.mrf.mxu1 }
 0x34f   :  { %v2174_v24 = vadd.f32 %v3185_v47, %v1953_v59 }
 0x350   :  { %v1957_v52 = vpop.f32.mrf.mxu1 }
 0x351   :  { %2237 = vst [vmem:[#allocation8 + $0xb8] sm:$0xff] %v2174_v24  ;;  %v1958_v35 = vadd.f32 %v4642_v46, %v1957_v52  ;;  %v3198_v52 = vld [vmem:[#allocation2 + $0x120] sm:$0xff] }
 0x352   :  { %v2784_v39 = vpop.f32.mrf.mxu1 }
 0x353   :  { %v2175_v29 = vadd.f32 %v3186_v48, %v1958_v35 }
 0x354   :  { %v1962_v2 = vpop.f32.mrf.mxu1 }
 0x355   :  { %2238 = vst [vmem:[#allocation8 + $0xc0] sm:$0xff] %v2175_v29  ;;  %v1963_v23 = vadd.f32 %v4642_v46, %v1962_v2  ;;  %v3199_v2 = vld [vmem:[#allocation2 + $0x128] sm:$0xff] }
 0x356   :  { %v2787_v41 = vpop.f32.mrf.mxu1 }
 0x357   :  { %v2176_v15 = vadd.f32 %v3187_v11, %v1963_v23 }
 0x358   :  { %v1967_v43 = vpop.f32.mrf.mxu1 }
 0x359   :  { %2239 = vst [vmem:[#allocation8 + $0xc8] sm:$0xff] %v2176_v15  ;;  %v1968_v28 = vadd.f32 %v4642_v46, %v1967_v43  ;;  %v3200_v43 = vld [vmem:[#allocation2 + $0x130] sm:$0xff] }
 0x35a   :  { %v2790_v56 = vpop.f32.mrf.mxu1 }
 0x35b   :  { %v2177_v62 = vadd.f32 %v3188_v27, %v1968_v28 }
 0x35c   :  { %v1972_v49 = vpop.f32.mrf.mxu1 }
 0x35d   :  { %2240 = vst [vmem:[#allocation8 + $0xd0] sm:$0xff] %v2177_v62  ;;  %v1973_v22 = vadd.f32 %v4642_v46, %v1972_v49  ;;  %v3201_v49 = vld [vmem:[#allocation2 + $0x138] sm:$0xff] }
 0x35e   :  { %v2793_v38 = vpop.f32.mrf.mxu1 }
 0x35f   :  { %v2178_v20 = vadd.f32 %v3189_v5, %v1973_v22 }
 0x360   :  { %v1977_v26 = vpop.f32.mrf.mxu1 }
 0x361   :  { %2241 = vst [vmem:[#allocation8 + $0xd8] sm:$0xff] %v2178_v20  ;;  %v1978_v30 = vadd.f32 %v4642_v46, %v1977_v26  ;;  %v3202_v26 = vld [vmem:[#allocation2 + $0x140] sm:$0xff] }
 0x362   :  { %v2796_v21 = vpop.f32.mrf.mxu1 }
 0x363   :  { %v2179_v18 = vadd.f32 %v3190_v57, %v1978_v30 }
 0x364   :  { %v1982_v37 = vpop.f32.mrf.mxu1 }
 0x365   :  { %2242 = vst [vmem:[#allocation8 + $0xe0] sm:$0xff] %v2179_v18  ;;  %v1983_v60 = vadd.f32 %v4642_v46, %v1982_v37  ;;  %v3203_v37 = vld [vmem:[#allocation2 + $0x148] sm:$0xff] }
 0x366   :  { %v2799_v14 = vpop.f32.mrf.mxu1 }
 0x367   :  { %v2180_v33 = vadd.f32 %v3191_v40, %v1983_v60 }
 0x368   :  { %v1987_v19 = vpop.f32.mrf.mxu1 }
 0x369   :  { %2243 = vst [vmem:[#allocation8 + $0xe8] sm:$0xff] %v2180_v33  ;;  %v1988_v7 = vadd.f32 %v4642_v46, %v1987_v19  ;;  %v3204_v19 = vld [vmem:[#allocation2 + $0x150] sm:$0xff] }
 0x36a   :  { %v2802_v50 = vpop.f32.mrf.mxu1 }
 0x36b   :  { %v2181_v34 = vadd.f32 %v3192_v55, %v1988_v7 }
 0x36c   :  { %v1992_v9 = vpop.f32.mrf.mxu1 }
 0x36d   :  { %2244 = vst [vmem:[#allocation8 + $0xf0] sm:$0xff] %v2181_v34  ;;  %v1993_v4 = vadd.f32 %v4642_v46, %v1992_v9  ;;  %v3205_v9 = vld [vmem:[#allocation2 + $0x158] sm:$0xff] }
 0x36e   :  { %v2805_v8 = vpop.f32.mrf.mxu1 }
 0x36f   :  { %v2182_v44 = vadd.f32 %v3193_v0, %v1993_v4 }
 0x370   :  { %v1997_v42 = vpop.f32.mrf.mxu1 }
 0x371   :  { %2245 = vst [vmem:[#allocation8 + $0xf8] sm:$0xff] %v2182_v44  ;;  %v1998_v32 = vadd.f32 %v4642_v46, %v1997_v42  ;;  %v3206_v42 = vld [vmem:[#allocation2 + $0x160] sm:$0xff] }
 0x372   :  { %v2808_v58 = vpop.f32.mrf.mxu1 }
 0x373   :  { %v2183_v6 = vadd.f32 %v3194_v17, %v1998_v32 }
 0x374   :  { %v2002_v1 = vpop.f32.mrf.mxu1 }
 0x375   :  { %2246 = vst [vmem:[#allocation8 + $0x100] sm:$0xff] %v2183_v6  ;;  %v2003_v3 = vadd.f32 %v4642_v46, %v2002_v1  ;;  %v3207_v1 = vld [vmem:[#allocation2 + $0x168] sm:$0xff] }
 0x376   :  { %v2811_v13 = vpop.f32.mrf.mxu1 }
 0x377   :  { %v2184_v54 = vadd.f32 %v3195_v36, %v2003_v3 }
 0x378   :  { %v2007_v61 = vpop.f32.mrf.mxu1 }
 0x379   :  { %2247 = vst [vmem:[#allocation8 + $0x108] sm:$0xff] %v2184_v54  ;;  %v2008_v25 = vadd.f32 %v4642_v46, %v2007_v61  ;;  %v3208_v61 = vld [vmem:[#allocation2 + $0x170] sm:$0xff] }
 0x37a   :  { %v2814_v10 = vpop.f32.mrf.mxu1 }
 0x37b   :  { %v2185_v16 = vadd.f32 %v3196_v53, %v2008_v25 }
 0x37c   :  { %v2012_v45 = vpop.f32.mrf.mxu1 }
 0x37d   :  { %2248 = vst [vmem:[#allocation8 + $0x110] sm:$0xff] %v2185_v16  ;;  %v2013_v63 = vadd.f32 %v4642_v46, %v2012_v45  ;;  %v3209_v45 = vld [vmem:[#allocation2 + $0x178] sm:$0xff] }
 0x37e   :  { %v2817_v12 = vpop.f32.mrf.mxu1 }
 0x37f   :  { %v2186_v59 = vadd.f32 %v3197_v51, %v2013_v63 }
 0x380   :  { %v2017_v31 = vpop.f32.mrf.mxu1 }
 0x381   :  { %2249 = vst [vmem:[#allocation8 + $0x118] sm:$0xff] %v2186_v59  ;;  %v2018_v47 = vadd.f32 %v4642_v46, %v2017_v31  ;;  %v3210_v31 = vld [vmem:[#allocation2 + $0x180] sm:$0xff] }
 0x382   :  { %v2820_v24 = vpop.f32.mrf.mxu1 }
 0x383   :  { %v2187_v35 = vadd.f32 %v3198_v52, %v2018_v47 }
 0x384   :  { %v2022_v39 = vpop.f32.mrf.mxu1 }
 0x385   :  { %2250 = vst [vmem:[#allocation8 + $0x120] sm:$0xff] %v2187_v35  ;;  %v2023_v48 = vadd.f32 %v4642_v46, %v2022_v39  ;;  %v3211_v39 = vld [vmem:[#allocation2 + $0x188] sm:$0xff] }
 0x386   :  { %v2823_v29 = vpop.f32.mrf.mxu1 }
 0x387   :  { %v2188_v23 = vadd.f32 %v3199_v2, %v2023_v48 }
 0x388   :  { %v2027_v41 = vpop.f32.mrf.mxu1 }
 0x389   :  { %2251 = vst [vmem:[#allocation8 + $0x128] sm:$0xff] %v2188_v23  ;;  %v2028_v11 = vadd.f32 %v4642_v46, %v2027_v41  ;;  %v3212_v41 = vld [vmem:[#allocation2 + $0x190] sm:$0xff] }
 0x38a   :  { %v2826_v15 = vpop.f32.mrf.mxu1 }
 0x38b   :  { %v2189_v28 = vadd.f32 %v3200_v43, %v2028_v11 }
 0x38c   :  { %v2032_v56 = vpop.f32.mrf.mxu1 }
 0x38d   :  { %2252 = vst [vmem:[#allocation8 + $0x130] sm:$0xff] %v2189_v28  ;;  %v2033_v27 = vadd.f32 %v4642_v46, %v2032_v56  ;;  %v3213_v56 = vld [vmem:[#allocation2 + $0x198] sm:$0xff] }
 0x38e   :  { %v2829_v62 = vpop.f32.mrf.mxu1 }
 0x38f   :  { %v2190_v22 = vadd.f32 %v3201_v49, %v2033_v27 }
 0x390   :  { %v2037_v38 = vpop.f32.mrf.mxu1 }
 0x391   :  { %2253 = vst [vmem:[#allocation8 + $0x138] sm:$0xff] %v2190_v22  ;;  %v2038_v5 = vadd.f32 %v4642_v46, %v2037_v38  ;;  %v3214_v38 = vld [vmem:[#allocation2 + $0x1a0] sm:$0xff] }
 0x392   :  { %v2832_v20 = vpop.f32.mrf.mxu1 }
 0x393   :  { %v2191_v30 = vadd.f32 %v3202_v26, %v2038_v5 }
 0x394   :  { %v2042_v21 = vpop.f32.mrf.mxu1 }
 0x395   :  { %2254 = vst [vmem:[#allocation8 + $0x140] sm:$0xff] %v2191_v30  ;;  %v2043_v57 = vadd.f32 %v4642_v46, %v2042_v21  ;;  %v3215_v21 = vld [vmem:[#allocation2 + $0x1a8] sm:$0xff] }
 0x396   :  { %v2835_v18 = vpop.f32.mrf.mxu1 }
 0x397   :  { %v2192_v60 = vadd.f32 %v3203_v37, %v2043_v57 }
 0x398   :  { %v2047_v14 = vpop.f32.mrf.mxu1 }
 0x399   :  { %2255 = vst [vmem:[#allocation8 + $0x148] sm:$0xff] %v2192_v60  ;;  %v2048_v40 = vadd.f32 %v4642_v46, %v2047_v14  ;;  %v3216_v14 = vld [vmem:[#allocation2 + $0x1b0] sm:$0xff] }
 0x39a   :  { %v2838_v33 = vpop.f32.mrf.mxu1 }
 0x39b   :  { %v2193_v7 = vadd.f32 %v3204_v19, %v2048_v40 }
 0x39c   :  { %v2052_v50 = vpop.f32.mrf.mxu1 }
 0x39d   :  { %2256 = vst [vmem:[#allocation8 + $0x150] sm:$0xff] %v2193_v7  ;;  %v2053_v55 = vadd.f32 %v4642_v46, %v2052_v50  ;;  %v3217_v50 = vld [vmem:[#allocation2 + $0x1b8] sm:$0xff] }
 0x39e   :  { %v2841_v34 = vpop.f32.mrf.mxu1 }
 0x39f   :  { %v2194_v4 = vadd.f32 %v3205_v9, %v2053_v55 }
 0x3a0   :  { %v2057_v8 = vpop.f32.mrf.mxu1 }
 0x3a1   :  { %2257 = vst [vmem:[#allocation8 + $0x158] sm:$0xff] %v2194_v4  ;;  %v2058_v0 = vadd.f32 %v4642_v46, %v2057_v8  ;;  %v3218_v8 = vld [vmem:[#allocation2 + $0x1c0] sm:$0xff] }
 0x3a2   :  { %v2844_v44 = vpop.f32.mrf.mxu1 }
 0x3a3   :  { %v2195_v32 = vadd.f32 %v3206_v42, %v2058_v0 }
 0x3a4   :  { %v2062_v58 = vpop.f32.mrf.mxu1 }
 0x3a5   :  { %2258 = vst [vmem:[#allocation8 + $0x160] sm:$0xff] %v2195_v32  ;;  %v2063_v17 = vadd.f32 %v4642_v46, %v2062_v58  ;;  %v3219_v58 = vld [vmem:[#allocation2 + $0x1c8] sm:$0xff] }
 0x3a6   :  { %v2847_v6 = vpop.f32.mrf.mxu1 }
 0x3a7   :  { %v2196_v3 = vadd.f32 %v3207_v1, %v2063_v17 }
 0x3a8   :  { %v2067_v13 = vpop.f32.mrf.mxu1 }
 0x3a9   :  { %2259 = vst [vmem:[#allocation8 + $0x168] sm:$0xff] %v2196_v3  ;;  %v2068_v36 = vadd.f32 %v4642_v46, %v2067_v13  ;;  %v3220_v13 = vld [vmem:[#allocation2 + $0x1d0] sm:$0xff] }
 0x3aa   :  { %v2850_v54 = vpop.f32.mrf.mxu1 }
 0x3ab   :  { %v2197_v25 = vadd.f32 %v3208_v61, %v2068_v36 }
 0x3ac   :  { %v2072_v10 = vpop.f32.mrf.mxu1 }
 0x3ad   :  { %2260 = vst [vmem:[#allocation8 + $0x170] sm:$0xff] %v2197_v25  ;;  %v2073_v53 = vadd.f32 %v4642_v46, %v2072_v10  ;;  %v3221_v10 = vld [vmem:[#allocation2 + $0x1d8] sm:$0xff] }
 0x3ae   :  { %v2853_v16 = vpop.f32.mrf.mxu1 }
 0x3af   :  { %v2198_v63 = vadd.f32 %v3209_v45, %v2073_v53 }
 0x3b0   :  { %v2077_v12 = vpop.f32.mrf.mxu1 }
 0x3b1   :  { %2261 = vst [vmem:[#allocation8 + $0x178] sm:$0xff] %v2198_v63  ;;  %v2078_v51 = vadd.f32 %v4642_v46, %v2077_v12  ;;  %v3222_v12 = vld [vmem:[#allocation2 + $0x1e0] sm:$0xff] }
 0x3b2   :  { %v2856_v59 = vpop.f32.mrf.mxu1 }
 0x3b3   :  { %v2199_v47 = vadd.f32 %v3210_v31, %v2078_v51 }
 0x3b4   :  { %v2082_v24 = vpop.f32.mrf.mxu1 }
 0x3b5   :  { %2262 = vst [vmem:[#allocation8 + $0x180] sm:$0xff] %v2199_v47  ;;  %v2083_v52 = vadd.f32 %v4642_v46, %v2082_v24  ;;  %v3223_v24 = vld [vmem:[#allocation2 + $0x1e8] sm:$0xff] }
 0x3b6   :  { %v2859_v35 = vpop.f32.mrf.mxu1 }
 0x3b7   :  { %v2200_v48 = vadd.f32 %v3211_v39, %v2083_v52 }
 0x3b8   :  { %v2087_v29 = vpop.f32.mrf.mxu1 }
 0x3b9   :  { %2263 = vst [vmem:[#allocation8 + $0x188] sm:$0xff] %v2200_v48  ;;  %v2088_v2 = vadd.f32 %v4642_v46, %v2087_v29  ;;  %v3224_v29 = vld [vmem:[#allocation2 + $0x1f0] sm:$0xff] }
 0x3ba   :  { %v2862_v23 = vpop.f32.mrf.mxu1 }
 0x3bb   :  { %v2201_v11 = vadd.f32 %v3212_v41, %v2088_v2 }
 0x3bc   :  { %v2092_v15 = vpop.f32.mrf.mxu1 }
 0x3bd   :  { %2264 = vst [vmem:[#allocation8 + $0x190] sm:$0xff] %v2201_v11  ;;  %v2093_v43 = vadd.f32 %v4642_v46, %v2092_v15 }
 0x3be   :  { %v2865_v28 = vpop.f32.mrf.mxu1 }
 0x3bf   :  { %v2202_v27 = vadd.f32 %v3213_v56, %v2093_v43 }
 0x3c0   :  { %v2097_v62 = vpop.f32.mrf.mxu1 }
 0x3c1   :  { %2265 = vst [vmem:[#allocation8 + $0x198] sm:$0xff] %v2202_v27  ;;  %v2098_v49 = vadd.f32 %v4642_v46, %v2097_v62 }
 0x3c2   :  { %v2868_v22 = vpop.f32.mrf.mxu1 }
 0x3c3   :  { %v2203_v5 = vadd.f32 %v3214_v38, %v2098_v49 }
 0x3c4   :  { %v2102_v20 = vpop.f32.mrf.mxu1 }
 0x3c5   :  { %2266 = vst [vmem:[#allocation8 + $0x1a0] sm:$0xff] %v2203_v5  ;;  %v2103_v26 = vadd.f32 %v4642_v46, %v2102_v20 }
 0x3c6   :  { %v2871_v30 = vpop.f32.mrf.mxu1 }
 0x3c7   :  { %v2204_v57 = vadd.f32 %v3215_v21, %v2103_v26 }
 0x3c8   :  { %v2107_v18 = vpop.f32.mrf.mxu1 }
 0x3c9   :  { %2267 = vst [vmem:[#allocation8 + $0x1a8] sm:$0xff] %v2204_v57  ;;  %v2108_v37 = vadd.f32 %v4642_v46, %v2107_v18 }
 0x3ca   :  { %v2874_v60 = vpop.f32.mrf.mxu1 }
 0x3cb   :  { %v2205_v40 = vadd.f32 %v3216_v14, %v2108_v37 }
 0x3cc   :  { %v2112_v33 = vpop.f32.mrf.mxu1 }
 0x3cd   :  { %2268 = vst [vmem:[#allocation8 + $0x1b0] sm:$0xff] %v2205_v40  ;;  %v2113_v19 = vadd.f32 %v4642_v46, %v2112_v33 }
 0x3ce   :  { %v2877_v7 = vpop.f32.mrf.mxu1 }
 0x3cf   :  { %v2206_v55 = vadd.f32 %v3217_v50, %v2113_v19 }
 0x3d0   :  { %v2117_v34 = vpop.f32.mrf.mxu1 }
 0x3d1   :  { %2269 = vst [vmem:[#allocation8 + $0x1b8] sm:$0xff] %v2206_v55  ;;  %v2118_v9 = vadd.f32 %v4642_v46, %v2117_v34 }
 0x3d2   :  { %v2880_v4 = vpop.f32.mrf.mxu1 }
 0x3d3   :  { %v2207_v0 = vadd.f32 %v3218_v8, %v2118_v9 }
 0x3d4   :  { %v2122_v44 = vpop.f32.mrf.mxu1 }
 0x3d5   :  { %2270 = vst [vmem:[#allocation8 + $0x1c0] sm:$0xff] %v2207_v0  ;;  %v2123_v42 = vadd.f32 %v4642_v46, %v2122_v44 }
 0x3d6   :  { %v2883_v32 = vpop.f32.mrf.mxu1 }
 0x3d7   :  { %v2208_v17 = vadd.f32 %v3219_v58, %v2123_v42 }
 0x3d8   :  { %v2127_v6 = vpop.f32.mrf.mxu1 }
 0x3d9   :  { %2271 = vst [vmem:[#allocation8 + $0x1c8] sm:$0xff] %v2208_v17  ;;  %v2128_v1 = vadd.f32 %v4642_v46, %v2127_v6 }
 0x3da   :  { %v2886_v3 = vpop.f32.mrf.mxu1 }
 0x3db   :  { %v2209_v36 = vadd.f32 %v3220_v13, %v2128_v1 }
 0x3dc   :  { %v2132_v54 = vpop.f32.mrf.mxu1 }
 0x3dd   :  { %2272 = vst [vmem:[#allocation8 + $0x1d0] sm:$0xff] %v2209_v36  ;;  %v2133_v61 = vadd.f32 %v4642_v46, %v2132_v54 }
 0x3de   :  { %v2889_v25 = vpop.f32.mrf.mxu1 }
 0x3df   :  { %v2210_v53 = vadd.f32 %v3221_v10, %v2133_v61 }
 0x3e0   :  { %v2137_v16 = vpop.f32.mrf.mxu1 }
 0x3e1   :  { %2273 = vst [vmem:[#allocation8 + $0x1d8] sm:$0xff] %v2210_v53  ;;  %v2138_v45 = vadd.f32 %v4642_v46, %v2137_v16 }
 0x3e2   :  { %v2892_v63 = vpop.f32.mrf.mxu1 }
 0x3e3   :  { %v2211_v51 = vadd.f32 %v3222_v12, %v2138_v45 }
 0x3e4   :  { %v2142_v59 = vpop.f32.mrf.mxu1 }
 0x3e5   :  { %2274 = vst [vmem:[#allocation8 + $0x1e0] sm:$0xff] %v2211_v51  ;;  %v2143_v31 = vadd.f32 %v4642_v46, %v2142_v59 }
 0x3e6   :  { %v2895_v47 = vpop.f32.mrf.mxu1 }
 0x3e7   :  { %v2212_v52 = vadd.f32 %v3223_v24, %v2143_v31 }
 0x3e8   :  { %v2147_v35 = vpop.f32.mrf.mxu1 }
 0x3e9   :  { %2275 = vst [vmem:[#allocation8 + $0x1e8] sm:$0xff] %v2212_v52  ;;  %v2148_v39 = vadd.f32 %v4642_v46, %v2147_v35 }
 0x3ea   :  { %v2898_v48 = vpop.f32.mrf.mxu1 }
 0x3eb   :  { %v2213_v2 = vadd.f32 %v3224_v29, %v2148_v39 }
 0x3ed   :  { %2276 = vst [vmem:[#allocation8 + $0x1f0] sm:$0xff] %v2213_v2 }
 0x3ee   :  { %3296 = shalt.err (!%p3293_p5)
}
 0x3ef   :  { %2288 = dma.vmem_to_hbm [thread:$0]  %s2283_s26, 8064, %s4791_s7, [#allocation4], %s3313_s29, %s3313_s29, %s3314_s30  }
 0x3f0   :  { %3309 = dma.done.wait [#allocation4], 8064  }
 0x3f1   :  { %3310 = vsyncadd [#allocation4], 4294959232 }
 0x3f2   :  { %2292 = vsyncpa [#allocation3], 1 }
 0x3f3   :  { %2293 = vsyncpa [#allocation6], 1 }
 0x3f4   :  { %2294 = vsyncpa [#allocation4], 1 }

</bundles_post_ra>
